<compile_context>
chip_gen: v5e
topology: v5e:2x2
jax: 0.10.0
libtpu: 0.0.40
codegen_flags: <defaults>
</compile_context>

<pallas_src>
import functools

import jax
import jax.numpy as jnp
import numpy as np
from jax import lax
from jax.experimental import pallas as pl
from jax.experimental.pallas import tpu as pltpu

# bf16 matmuls on the MXU for all TPU generations; f32 accumulation + f32 gate math.
MATMUL_DTYPE = jnp.bfloat16
# Storage dtype of the big per-layer intermediates (gates_x, per-step hidden states).
ACT_DTYPE = MATMUL_DTYPE
# Explicit scoped-VMEM budget; stays under v7x's 64 MiB physical VMEM.
VMEM_LIMIT_BYTES = 48 * 1024 * 1024


def _round_up(x, m):
    return ((x + m - 1) // m) * m


def _pick_tile(dim, target, quantum):
    """Largest tile <= target that divides `dim` and is a multiple of `quantum`;
    falls back to the full dim (full-extent blocks are exempt from the (8,128) rule)."""
    if dim <= target:
        return dim
    t = (target // quantum) * quantum
    while t >= quantum:
        if dim % t == 0:
            return t
        t -= quantum
    return dim


# -----------------------------------------------------------------------------
# Tiled linear kernel: out = x @ w + b.  Used for the hoisted LSTM input
# projection and for the hidden -> vocab output projection.
# -----------------------------------------------------------------------------
def linear_kernel(x_ref, w_ref, b_ref, o_ref):
    o_ref[...] = (jnp.dot(x_ref[...], w_ref[...],
                          preferred_element_type=jnp.float32)
                  + b_ref[...]).astype(o_ref.dtype)


def run_linear(x_2d, w_t, b_2d, *, out_dtype=jnp.float32,
               row_tile=512, col_tile=512):
    """x_2d: (N, K) @ w_t: (K, V) + b_2d: (1, V) -> (N, V) in out_dtype.

    Grid = (col tiles, row tiles) with rows innermost so the (K, tv) weight block
    (index_map depends only on the col index) is held resident across the inner row
    sweep and streamed from HBM exactly once.
    """
    # TODO(synk): add a K grid axis + accumulator for very large reduction dims.
    N, K = x_2d.shape
    V = w_t.shape[1]
    tn = _pick_tile(N, row_tile, 8)
    tv = _pick_tile(V, col_tile, 128)
    grid = (V // tv, N // tn)
    x_2d = x_2d.astype(MATMUL_DTYPE)
    w_t = w_t.astype(MATMUL_DTYPE)
    in_bytes = np.dtype(MATMUL_DTYPE).itemsize
    out_bytes = np.dtype(out_dtype).itemsize
    return pl.pallas_call(
        linear_kernel,
        out_shape=jax.ShapeDtypeStruct((N, V), out_dtype),
        grid_spec=pltpu.PrefetchScalarGridSpec(
            num_scalar_prefetch=0,
            grid=grid,
            in_specs=[
                pl.BlockSpec((tn, K), lambda j, i: (i, 0)),   # activations (row tile)
                pl.BlockSpec((K, tv), lambda j, i: (0, j)),   # weights (resident over rows)
                pl.BlockSpec((1, tv), lambda j, i: (0, j)),   # bias (f32)
            ],
            out_specs=pl.BlockSpec((tn, tv), lambda j, i: (i, j)),
        ),
        compiler_params=pltpu.CompilerParams(
            dimension_semantics=("parallel", "parallel"),
            vmem_limit_bytes=VMEM_LIMIT_BYTES),
        cost_estimate=pl.CostEstimate(
            flops=2 * N * K * V,
            transcendentals=0,
            bytes_accessed=in_bytes * (N * K + K * V) + out_bytes * N * V + 4 * V),
    )(x_2d, w_t, b_2d)


# -----------------------------------------------------------------------------
# Recurrence kernel: consumes precomputed gates_x[t] = x_t @ W_ih^T + b and only
# does gates = gates_x[t] + h @ W_hh^T on the serial critical path.  Processes
# `chunk` timesteps per grid step; h/c live in the resident hT_ref/cT_ref output
# blocks (constant index_map across the serial grid).
# -----------------------------------------------------------------------------
def lstm_recurrence_kernel(gx_ref, whh_ref, h0_ref, c0_ref,
                           y_ref, hT_ref, cT_ref,
                           *, chunk, hidden, seq_len, masked):
    @pl.when(pl.program_id(0) == 0)
    def _():
        hT_ref[...] = h0_ref[...]
        cT_ref[...] = c0_ref[...]

    whh = whh_ref[...]                 # (Hp, 4Hp) bf16, grid-invariant (DMA'd once)
    H = hidden
    t_base = pl.program_id(0) * chunk

    def step(i, carry):
        h = hT_ref[...]                # (Bp, Hp) f32 carried state
        c = cT_ref[...]
        gates = gx_ref[i].astype(jnp.float32) + jnp.dot(
            h.astype(MATMUL_DTYPE), whh, preferred_element_type=jnp.float32)
        # Gate math stays f32 (v5e VPU/EUP have no bf16 path); slices are lane-aligned
        # because hidden is padded to a multiple of 128.
        i_g = jax.nn.sigmoid(gates[:, 0 * H:1 * H])
        f_g = jax.nn.sigmoid(gates[:, 1 * H:2 * H])
        g_g = jnp.tanh(gates[:, 2 * H:3 * H])
        o_g = jax.nn.sigmoid(gates[:, 3 * H:4 * H])
        c_new = f_g * c + i_g * g_g
        h_new = o_g * jnp.tanh(c_new)
        if masked:                     # static flag: only when T was padded
            valid = (t_base + i) < seq_len
            c_new = jnp.where(valid, c_new, c)
            h_new = jnp.where(valid, h_new, h)
        hT_ref[...] = h_new
        cT_ref[...] = c_new
        y_ref[i] = h_new.astype(y_ref.dtype)
        return carry

    lax.fori_loop(0, chunk, step, 0, unroll=True)


def run_lstm_recurrence(gates_x, whh_t, h0, c0, *, chunk, seq_len):
    """gates_x: (Tp, Bp, 4Hp) time-major (already includes bias + input projection).
    Returns (y (Tp, Bp, Hp) ACT_DTYPE, h_T (Bp, Hp) f32, c_T (Bp, Hp) f32)."""
    Tp, B, G = gates_x.shape
    H = h0.shape[-1]
    masked = Tp != seq_len
    kernel = functools.partial(lstm_recurrence_kernel, chunk=chunk, hidden=H,
                               seq_len=seq_len, masked=masked)
    whh_t = whh_t.astype(MATMUL_DTYPE)
    # TODO(synk): for very large H (bf16 W_hh no longer VMEM-resident on v7x) add a
    # 4H-column grid axis (per-gate accumulation) or single-buffer the invariant weight,
    # and use pltpu.matmul_push_rhs to keep W_hh in MXU weight registers across the chunk
    # instead of re-streaming it every timestep; for B >= 16 add a leading "parallel"
    # batch-tile axis so both v7x TensorCores run independent sub-batch recurrences.
    act_bytes = np.dtype(ACT_DTYPE).itemsize
    return pl.pallas_call(
        kernel,
        out_shape=(jax.ShapeDtypeStruct((Tp, B, H), ACT_DTYPE),
                   jax.ShapeDtypeStruct((B, H), jnp.float32),
                   jax.ShapeDtypeStruct((B, H), jnp.float32)),
        grid_spec=pltpu.PrefetchScalarGridSpec(
            num_scalar_prefetch=0,
            grid=(Tp // chunk,),
            in_specs=[
                pl.BlockSpec((chunk, B, G), lambda t: (t, 0, 0)),  # precomputed x-gates chunk
                pl.BlockSpec((H, G), lambda t: (0, 0)),            # W_hh^T (grid-invariant)
                pl.BlockSpec((B, H), lambda t: (0, 0)),            # h0
                pl.BlockSpec((B, H), lambda t: (0, 0)),            # c0
            ],
            out_specs=[
                pl.BlockSpec((chunk, B, H), lambda t: (t, 0, 0)),  # per-step hidden states
                pl.BlockSpec((B, H), lambda t: (0, 0)),            # resident h carry -> h_T
                pl.BlockSpec((B, H), lambda t: (0, 0)),            # resident c carry -> c_T
            ],
        ),
        compiler_params=pltpu.CompilerParams(
            dimension_semantics=("arbitrary",),                    # recurrence is sequential
            vmem_limit_bytes=VMEM_LIMIT_BYTES),
        cost_estimate=pl.CostEstimate(
            flops=2 * Tp * B * H * G,
            transcendentals=5 * Tp * B * H,
            bytes_accessed=(act_bytes * (Tp * B * G + Tp * B * H)
                            + np.dtype(MATMUL_DTYPE).itemsize * H * G
                            + 4 * 4 * B * H)),
    )(gates_x, whh_t, h0, c0)


# -----------------------------------------------------------------------------
# Full LSTMDecoder forward (operates on padded/prepared kernel params).
# -----------------------------------------------------------------------------
def lstm_decoder_forward(params, input_seq, hidden, *, chunk_target=16):
    """input_seq: (B, T, E); hidden = (h0, c0) each (L, B, H).
    Returns (logits (B, T, V) f32, (h_T, c_T) each (L, B, H) f32)."""
    h0_all, c0_all = hidden
    B, T, _ = input_seq.shape
    L, _, H = h0_all.shape
    Hp = params["hidden_dim_padded"]
    V = params["vocab_size"]
    Vp = params["vocab_size_padded"]

    Bp = _round_up(B, 8)                                  # dense sublanes
    chunk = chunk_target if T >= chunk_target else T
    Tp = _round_up(T, chunk)                              # no degenerate Tc=1 grids

    # One transpose to time-major; all LSTM layers then stay time-major.  Zero-pad batch
    # and time; hidden padding is baked into the per-gate padded weights, so padded lanes
    # stay exactly 0 through the recurrence.
    x = jnp.transpose(input_seq, (1, 0, 2))               # (T, B, E)
    x = jnp.pad(x, ((0, Tp - T), (0, Bp - B), (0, 0)))    # (Tp, Bp, E)
    h0p = jnp.pad(h0_all, ((0, 0), (0, Bp - B), (0, Hp - H)))
    c0p = jnp.pad(c0_all, ((0, 0), (0, Bp - B), (0, Hp - H)))

    h_finals, c_finals = [], []
    for layer in range(L):
        p = params["lstm"][layer]
        in_dim = x.shape[-1]
        # Hoisted input projection: one fully parallel matmul over all Tp*Bp rows (bf16 out).
        gx = run_linear(x.reshape(Tp * Bp, in_dim), p["wih_t"], p["bias"],
                        out_dtype=ACT_DTYPE)
        gx = gx.reshape(Tp, Bp, 4 * Hp)
        # Serial recurrence: only h @ W_hh^T + gate math remains on the critical path.
        # TODO(synk): fuse the next layer's input projection into the chunk epilogue to skip
        # one (T,B,H) HBM round-trip per layer.
        x, h_T, c_T = run_lstm_recurrence(gx, p["whh_t"], h0p[layer], c0p[layer],
                                          chunk=chunk, seq_len=T)
        h_finals.append(h_T[:B, :H])
        c_finals.append(c_T[:B, :H])

    # Batch-major BEFORE the vocab projection: transpose moves H-wide hidden states, not
    # V-wide logits, and the projection output is already (B, T, V)-ordered.
    xb = jnp.transpose(x, (1, 0, 2)).reshape(Bp * Tp, Hp)
    logits_p = run_linear(xb, params["out"]["w_t"], params["out"]["b"],
                          out_dtype=jnp.float32)
    logits = logits_p.reshape(Bp, Tp, Vp)[:B, :T, :V]
    return logits, (jnp.stack(h_finals, 0), jnp.stack(c_finals, 0))


# -----------------------------------------------------------------------------
# Parameter handling: raw PyTorch-layout params + padded/transposed kernel params.
# -----------------------------------------------------------------------------
def init_raw_params(key, embedding_dim, hidden_dim, num_layers, vocab_size):
    """PyTorch-style uniform(-1/sqrt(H), 1/sqrt(H)) init, PyTorch layouts."""
    k = 1.0 / np.sqrt(hidden_dim)
    params = {"lstm": [], "out": {}}
    for layer in range(num_layers):
        in_dim = embedding_dim if layer == 0 else hidden_dim
        key, k1, k2, k3, k4 = jax.random.split(key, 5)
        params["lstm"].append({
            "w_ih": jax.random.uniform(k1, (4 * hidden_dim, in_dim),
                                       minval=-k, maxval=k, dtype=jnp.float32),
            "w_hh": jax.random.uniform(k2, (4 * hidden_dim, hidden_dim),
                                       minval=-k, maxval=k, dtype=jnp.float32),
            "b_ih": jax.random.uniform(k3, (4 * hidden_dim,),
                                       minval=-k, maxval=k, dtype=jnp.float32),
            "b_hh": jax.random.uniform(k4, (4 * hidden_dim,),
                                       minval=-k, maxval=k, dtype=jnp.float32),
        })
    key, k1, k2 = jax.random.split(key, 3)
    params["out"]["w"] = jax.random.uniform(k1, (vocab_size, hidden_dim),
                                            minval=-k, maxval=k, dtype=jnp.float32)
    params["out"]["b"] = jax.random.uniform(k2, (vocab_size,),
                                            minval=-k, maxval=k, dtype=jnp.float32)
    return params


def prepare_kernel_params(raw, embedding_dim, hidden_dim, num_layers, vocab_size):
    """Pad hidden per-gate to a multiple of 128 lanes, pad vocab to a multiple of 128,
    transpose for (row, col) matmuls, and cast weights to the MXU dtype."""
    H = hidden_dim
    Hp = _round_up(H, 128)
    V = vocab_size
    Vp = _round_up(V, 128)
    kp = {"lstm": [], "out": {}, "hidden_dim": H, "hidden_dim_padded": Hp,
          "vocab_size": V, "vocab_size_padded": Vp}
    for layer in range(num_layers):
        lw = raw["lstm"][layer]
        in_dim = embedding_dim if layer == 0 else H
        in_dim_p = embedding_dim if layer == 0 else Hp
        w_ih = lw["w_ih"].reshape(4, H, in_dim)
        w_hh = lw["w_hh"].reshape(4, H, H)
        b = (lw["b_ih"] + lw["b_hh"]).reshape(4, H)
        w_ih_p = jnp.zeros((4, Hp, in_dim_p), jnp.float32).at[:, :H, :in_dim].set(w_ih)
        w_hh_p = jnp.zeros((4, Hp, Hp), jnp.float32).at[:, :H, :H].set(w_hh)
        b_p = jnp.zeros((4, Hp), jnp.float32).at[:, :H].set(b)
        kp["lstm"].append({
            "wih_t": jnp.transpose(w_ih_p.reshape(4 * Hp, in_dim_p)).astype(MATMUL_DTYPE),
            "whh_t": jnp.transpose(w_hh_p.reshape(4 * Hp, Hp)).astype(MATMUL_DTYPE),
            "bias": b_p.reshape(1, 4 * Hp),                  # bias stays f32
        })
    w_out_p = jnp.zeros((Vp, Hp), jnp.float32).at[:V, :H].set(raw["out"]["w"])
    b_out_p = jnp.zeros((Vp,), jnp.float32).at[:V].set(raw["out"]["b"])
    kp["out"]["w_t"] = jnp.transpose(w_out_p).astype(MATMUL_DTYPE)   # (Hp, Vp)
    kp["out"]["b"] = b_out_p.reshape(1, Vp)
    return kp


# -----------------------------------------------------------------------------
# Pure-JAX reference (mirrors torch.nn.LSTM semantics, f32) for correctness check.
# -----------------------------------------------------------------------------
def reference_forward(raw, input_seq, hidden):
    h0_all, c0_all = hidden
    B, T, _ = input_seq.shape
    L, _, H = h0_all.shape
    x = input_seq
    h_finals, c_finals = [], []
    for layer in range(L):
        p = raw["lstm"][layer]
        h = h0_all[layer]
        c = c0_all[layer]
        bias = p["b_ih"] + p["b_hh"]
        ys = []
        for t in range(T):
            gates = x[:, t, :] @ p["w_ih"].T + h @ p["w_hh"].T + bias
            i = jax.nn.sigmoid(gates[:, 0 * H:1 * H])
            f = jax.nn.sigmoid(gates[:, 1 * H:2 * H])
            g = jnp.tanh(gates[:, 2 * H:3 * H])
            o = jax.nn.sigmoid(gates[:, 3 * H:4 * H])
            c = f * c + i * g
            h = o * jnp.tanh(c)
            ys.append(h)
        x = jnp.stack(ys, axis=1)
        h_finals.append(h)
        c_finals.append(c)
    logits = x @ raw["out"]["w"].T + raw["out"]["b"]
    return logits, (jnp.stack(h_finals, 0), jnp.stack(c_finals, 0))


if __name__ == "__main__":
    # Small shapes consistent with the module's forward.
    B, T = 2, 8
    embedding_dim, hidden_dim, num_layers, vocab_size = 32, 32, 2, 128

    key = jax.random.PRNGKey(0)
    key, kx, kh, kc, kp = jax.random.split(key, 5)

    input_seq = jax.random.normal(kx, (B, T, embedding_dim), dtype=jnp.float32)
    h0 = jax.random.normal(kh, (num_layers, B, hidden_dim), dtype=jnp.float32)
    c0 = jax.random.normal(kc, (num_layers, B, hidden_dim), dtype=jnp.float32)

    raw_params = init_raw_params(kp, embedding_dim, hidden_dim, num_layers, vocab_size)
    kernel_params = prepare_kernel_params(raw_params, embedding_dim, hidden_dim,
                                          num_layers, vocab_size)

    fwd = jax.jit(functools.partial(lstm_decoder_forward, kernel_params))
    logits, (h_T, c_T) = fwd(input_seq, (h0, c0))
    jax.block_until_ready((logits, h_T, c_T))

    # Verify against a pure-JAX f32 reference of the PyTorch semantics.
    tol = 1e-5 if MATMUL_DTYPE == jnp.float32 else 3e-2
    ref_logits, (ref_h, ref_c) = reference_forward(raw_params, input_seq, (h0, c0))
    np.testing.assert_allclose(np.asarray(logits), np.asarray(ref_logits),
                               rtol=tol, atol=tol)
    np.testing.assert_allclose(np.asarray(h_T), np.asarray(ref_h), rtol=tol, atol=tol)
    np.testing.assert_allclose(np.asarray(c_T), np.asarray(ref_c), rtol=tol, atol=tol)

    assert logits.shape == (B, T, vocab_size)
    assert h_T.shape == (num_layers, B, hidden_dim)
    assert c_T.shape == (num_layers, B, hidden_dim)

    print("KERNEL_OK")
</pallas_src>

<mosaic_0001>
module attributes {stable_mosaic.version = 11 : i64} {
  func.func @linear_kernel(%arg0: i32, %arg1: i32, %arg2: memref<64x32xbf16, #tpu.memory_space<vmem>>, %arg3: memref<32x512xbf16, #tpu.memory_space<vmem>>, %arg4: memref<1x512xf32, #tpu.memory_space<vmem>>, %arg5: memref<64x512xbf16, #tpu.memory_space<vmem>>) attributes {dimension_semantics = [#tpu.dimension_semantics<parallel>, #tpu.dimension_semantics<parallel>], iteration_bounds = array<i64: 1, 1>, scalar_prefetch = 0 : i64, scratch_operands = 0 : i64, tpu.core_type = #tpu.core_type<tc>, window_params = [{transform_indices = @transform_0, window_bounds = array<i64: 64, 32>}, {transform_indices = @transform_1, window_bounds = array<i64: 32, 512>}, {transform_indices = @transform_2, window_bounds = array<i64: 1, 512>}, {transform_indices = @transform_3, window_bounds = array<i64: 64, 512>}]} {
    %c0 = arith.constant 0 : index
    %c0_0 = arith.constant 0 : index
    %0 = vector.load %arg2[%c0, %c0_0] : memref<64x32xbf16, #tpu.memory_space<vmem>>, vector<64x32xbf16>
    %c0_1 = arith.constant 0 : index
    %c0_2 = arith.constant 0 : index
    %1 = vector.load %arg3[%c0_1, %c0_2] : memref<32x512xbf16, #tpu.memory_space<vmem>>, vector<32x512xbf16>
    %cst = arith.constant dense<0.000000e+00> : vector<64x512xf32>
    %2 = tpu.matmul %0, %1, %cst {dimension_numbers = #tpu.dot_dimension_numbers<[1], [0], [0], [1], [0, 0, 1, 1], [], []>} : vector<64x32xbf16>, vector<32x512xbf16>, vector<64x512xf32> -> vector<64x512xf32>
    %c0_3 = arith.constant 0 : index
    %c0_4 = arith.constant 0 : index
    %3 = vector.load %arg4[%c0_3, %c0_4] : memref<1x512xf32, #tpu.memory_space<vmem>>, vector<1x512xf32>
    %4 = vector.broadcast %3 : vector<1x512xf32> to vector<64x512xf32>
    %5 = arith.addf %2, %4 : vector<64x512xf32>
    %6 = arith.truncf %5 : vector<64x512xf32> to vector<64x512xbf16>
    %c0_5 = arith.constant 0 : index
    %c0_6 = arith.constant 0 : index
    %7 = vector.load %arg5[%c0_5, %c0_6] : memref<64x512xbf16, #tpu.memory_space<vmem>>, vector<64x512xbf16>
    tpu.vector_store %arg5[%c0_5, %c0_6], %6 {strides = array<i32>} : memref<64x512xbf16, #tpu.memory_space<vmem>>, vector<64x512xbf16>,
    return
  }
  func.func @transform_0(%arg0: i32, %arg1: i32) -> (i32, i32) {
    %c0_i32 = arith.constant 0 : i32
    %c0_i32_0 = arith.constant 0 : i32
    return %arg1, %c0_i32 : i32, i32
  }
  func.func @transform_1(%arg0: i32, %arg1: i32) -> (i32, i32) {
    %c0_i32 = arith.constant 0 : i32
    %c0_i32_0 = arith.constant 0 : i32
    return %c0_i32, %arg0 : i32, i32
  }
  func.func @transform_2(%arg0: i32, %arg1: i32) -> (i32, i32) {
    %c0_i32 = arith.constant 0 : i32
    %c0_i32_0 = arith.constant 0 : i32
    return %c0_i32, %arg0 : i32, i32
  }
  func.func @transform_3(%arg0: i32, %arg1: i32) -> (i32, i32) {
    %c0_i32 = arith.constant 0 : i32
    return %arg1, %arg0 : i32, i32
  }
}

module attributes {stable_mosaic.version = 11 : i64} {
  func.func @linear_kernel(%arg0: i32, %arg1: i32, %arg2: memref<64x128xbf16, #tpu.memory_space<vmem>>, %arg3: memref<128x512xbf16, #tpu.memory_space<vmem>>, %arg4: memref<1x512xf32, #tpu.memory_space<vmem>>, %arg5: memref<64x512xbf16, #tpu.memory_space<vmem>>) attributes {dimension_semantics = [#tpu.dimension_semantics<parallel>, #tpu.dimension_semantics<parallel>], iteration_bounds = array<i64: 1, 1>, scalar_prefetch = 0 : i64, scratch_operands = 0 : i64, tpu.core_type = #tpu.core_type<tc>, window_params = [{transform_indices = @transform_0, window_bounds = array<i64: 64, 128>}, {transform_indices = @transform_1, window_bounds = array<i64: 128, 512>}, {transform_indices = @transform_2, window_bounds = array<i64: 1, 512>}, {transform_indices = @transform_3, window_bounds = array<i64: 64, 512>}]} {
    %c0 = arith.constant 0 : index
    %c0_0 = arith.constant 0 : index
    %0 = vector.load %arg2[%c0, %c0_0] : memref<64x128xbf16, #tpu.memory_space<vmem>>, vector<64x128xbf16>
    %c0_1 = arith.constant 0 : index
    %c0_2 = arith.constant 0 : index
    %1 = vector.load %arg3[%c0_1, %c0_2] : memref<128x512xbf16, #tpu.memory_space<vmem>>, vector<128x512xbf16>
    %cst = arith.constant dense<0.000000e+00> : vector<64x512xf32>
    %2 = tpu.matmul %0, %1, %cst {dimension_numbers = #tpu.dot_dimension_numbers<[1], [0], [0], [1], [0, 0, 1, 1], [], []>} : vector<64x128xbf16>, vector<128x512xbf16>, vector<64x512xf32> -> vector<64x512xf32>
    %c0_3 = arith.constant 0 : index
    %c0_4 = arith.constant 0 : index
    %3 = vector.load %arg4[%c0_3, %c0_4] : memref<1x512xf32, #tpu.memory_space<vmem>>, vector<1x512xf32>
    %4 = vector.broadcast %3 : vector<1x512xf32> to vector<64x512xf32>
    %5 = arith.addf %2, %4 : vector<64x512xf32>
    %6 = arith.truncf %5 : vector<64x512xf32> to vector<64x512xbf16>
    %c0_5 = arith.constant 0 : index
    %c0_6 = arith.constant 0 : index
    %7 = vector.load %arg5[%c0_5, %c0_6] : memref<64x512xbf16, #tpu.memory_space<vmem>>, vector<64x512xbf16>
    tpu.vector_store %arg5[%c0_5, %c0_6], %6 {strides = array<i32>} : memref<64x512xbf16, #tpu.memory_space<vmem>>, vector<64x512xbf16>,
    return
  }
  func.func @transform_0(%arg0: i32, %arg1: i32) -> (i32, i32) {
    %c0_i32 = arith.constant 0 : i32
    %c0_i32_0 = arith.constant 0 : i32
    return %arg1, %c0_i32 : i32, i32
  }
  func.func @transform_1(%arg0: i32, %arg1: i32) -> (i32, i32) {
    %c0_i32 = arith.constant 0 : i32
    %c0_i32_0 = arith.constant 0 : i32
    return %c0_i32, %arg0 : i32, i32
  }
  func.func @transform_2(%arg0: i32, %arg1: i32) -> (i32, i32) {
    %c0_i32 = arith.constant 0 : i32
    %c0_i32_0 = arith.constant 0 : i32
    return %c0_i32, %arg0 : i32, i32
  }
  func.func @transform_3(%arg0: i32, %arg1: i32) -> (i32, i32) {
    %c0_i32 = arith.constant 0 : i32
    return %arg1, %arg0 : i32, i32
  }
}

module attributes {stable_mosaic.version = 11 : i64} {
  func.func @lstm_recurrence_kernel(%arg0: i32, %arg1: memref<8x8x512xbf16, #tpu.memory_space<vmem>>, %arg2: memref<128x512xbf16, #tpu.memory_space<vmem>>, %arg3: memref<8x128xf32, #tpu.memory_space<vmem>>, %arg4: memref<8x128xf32, #tpu.memory_space<vmem>>, %arg5: memref<8x8x128xbf16, #tpu.memory_space<vmem>>, %arg6: memref<8x128xf32, #tpu.memory_space<vmem>>, %arg7: memref<8x128xf32, #tpu.memory_space<vmem>>) attributes {dimension_semantics = [#tpu.dimension_semantics<arbitrary>], iteration_bounds = array<i64: 1>, scalar_prefetch = 0 : i64, scratch_operands = 0 : i64, tpu.core_type = #tpu.core_type<tc>, window_params = [{transform_indices = @transform_0, window_bounds = array<i64: 8, 8, 512>}, {pipeline_mode = #tpu.pipeline_mode<synchronous>, transform_indices = @transform_1, window_bounds = array<i64: 128, 512>}, {pipeline_mode = #tpu.pipeline_mode<synchronous>, transform_indices = @transform_2, window_bounds = array<i64: 8, 128>}, {pipeline_mode = #tpu.pipeline_mode<synchronous>, transform_indices = @transform_3, window_bounds = array<i64: 8, 128>}, {transform_indices = @transform_4, window_bounds = array<i64: 8, 8, 128>}, {pipeline_mode = #tpu.pipeline_mode<synchronous>, transform_indices = @transform_5, window_bounds = array<i64: 8, 128>}, {pipeline_mode = #tpu.pipeline_mode<synchronous>, transform_indices = @transform_6, window_bounds = array<i64: 8, 128>}]} {
    %c0_i32 = arith.constant 0 : i32
    %0 = arith.cmpi eq, %arg0, %c0_i32 : i32
    %1 = arith.extui %0 : i1 to i32
    %c0_i32_0 = arith.constant 0 : i32
    %2 = arith.cmpi ne, %1, %c0_i32_0 : i32
    scf.if %2 {
      %c0_130 = arith.constant 0 : index
      %c0_131 = arith.constant 0 : index
      %332 = vector.load %arg3[%c0_130, %c0_131] : memref<8x128xf32, #tpu.memory_space<vmem>>, vector<8x128xf32>
      %c0_132 = arith.constant 0 : index
      %c0_133 = arith.constant 0 : index
      %333 = vector.load %arg6[%c0_132, %c0_133] : memref<8x128xf32, #tpu.memory_space<vmem>>, vector<8x128xf32>
      tpu.vector_store %arg6[%c0_132, %c0_133], %332 {strides = array<i32>} : memref<8x128xf32, #tpu.memory_space<vmem>>, vector<8x128xf32>,
      %c0_134 = arith.constant 0 : index
      %c0_135 = arith.constant 0 : index
      %334 = vector.load %arg4[%c0_134, %c0_135] : memref<8x128xf32, #tpu.memory_space<vmem>>, vector<8x128xf32>
      %c0_136 = arith.constant 0 : index
      %c0_137 = arith.constant 0 : index
      %335 = vector.load %arg7[%c0_136, %c0_137] : memref<8x128xf32, #tpu.memory_space<vmem>>, vector<8x128xf32>
      tpu.vector_store %arg7[%c0_136, %c0_137], %334 {strides = array<i32>} : memref<8x128xf32, #tpu.memory_space<vmem>>, vector<8x128xf32>,
    } else {
    }
    %c0 = arith.constant 0 : index
    %c0_1 = arith.constant 0 : index
    %3 = vector.load %arg2[%c0, %c0_1] : memref<128x512xbf16, #tpu.memory_space<vmem>>, vector<128x512xbf16>
    %c0_i32_2 = arith.constant 0 : i32
    %c0_3 = arith.constant 0 : index
    %c0_4 = arith.constant 0 : index
    %4 = vector.load %arg6[%c0_3, %c0_4] : memref<8x128xf32, #tpu.memory_space<vmem>>, vector<8x128xf32>
    %c0_5 = arith.constant 0 : index
    %c0_6 = arith.constant 0 : index
    %5 = vector.load %arg7[%c0_5, %c0_6] : memref<8x128xf32, #tpu.memory_space<vmem>>, vector<8x128xf32>
    %6 = arith.index_cast %c0_i32_2 : i32 to index
    %c0_7 = arith.constant 0 : index
    %c0_8 = arith.constant 0 : index
    %7 = vector.load %arg1[%6, %c0_7, %c0_8] : memref<8x8x512xbf16, #tpu.memory_space<vmem>>, vector<1x8x512xbf16>
    %8 = vector.shape_cast %7 : vector<1x8x512xbf16> to vector<8x512xbf16>
    %9 = arith.extf %8 : vector<8x512xbf16> to vector<8x512xf32>
    %10 = arith.truncf %4 : vector<8x128xf32> to vector<8x128xbf16>
    %cst = arith.constant dense<0.000000e+00> : vector<8x512xf32>
    %11 = tpu.matmul %10, %3, %cst {dimension_numbers = #tpu.dot_dimension_numbers<[1], [0], [0], [1], [0, 0, 1, 1], [], []>} : vector<8x128xbf16>, vector<128x512xbf16>, vector<8x512xf32> -> vector<8x512xf32>
    %12 = arith.addf %9, %11 : vector<8x512xf32>
    %13 = vector.extract_strided_slice %12 {offsets = [0, 0], sizes = [8, 128], strides = [1, 1]} : vector<8x512xf32> to vector<8x128xf32>
    %14 = arith.negf %13 : vector<8x128xf32>
    %15 = math.exp %14 : vector<8x128xf32>
    %cst_9 = arith.constant 1.000000e+00 : f32
    %16 = vector.broadcast %cst_9 : f32 to vector<8x128xf32>
    %17 = arith.addf %16, %15 : vector<8x128xf32>
    %18 = arith.divf %16, %17 : vector<8x128xf32>
    %19 = vector.extract_strided_slice %12 {offsets = [0, 128], sizes = [8, 128], strides = [1, 1]} : vector<8x512xf32> to vector<8x128xf32>
    %20 = arith.negf %19 : vector<8x128xf32>
    %21 = math.exp %20 : vector<8x128xf32>
    %cst_10 = arith.constant 1.000000e+00 : f32
    %22 = vector.broadcast %cst_10 : f32 to vector<8x128xf32>
    %23 = arith.addf %22, %21 : vector<8x128xf32>
    %24 = arith.divf %22, %23 : vector<8x128xf32>
    %25 = vector.extract_strided_slice %12 {offsets = [0, 256], sizes = [8, 128], strides = [1, 1]} : vector<8x512xf32> to vector<8x128xf32>
    %26 = math.tanh %25 : vector<8x128xf32>
    %27 = vector.extract_strided_slice %12 {offsets = [0, 384], sizes = [8, 128], strides = [1, 1]} : vector<8x512xf32> to vector<8x128xf32>
    %28 = arith.negf %27 : vector<8x128xf32>
    %29 = math.exp %28 : vector<8x128xf32>
    %cst_11 = arith.constant 1.000000e+00 : f32
    %30 = vector.broadcast %cst_11 : f32 to vector<8x128xf32>
    %31 = arith.addf %30, %29 : vector<8x128xf32>
    %32 = arith.divf %30, %31 : vector<8x128xf32>
    %33 = arith.mulf %24, %5 : vector<8x128xf32>
    %34 = arith.mulf %18, %26 : vector<8x128xf32>
    %35 = arith.addf %33, %34 : vector<8x128xf32>
    %36 = math.tanh %35 : vector<8x128xf32>
    %37 = arith.mulf %32, %36 : vector<8x128xf32>
    %c0_12 = arith.constant 0 : index
    %c0_13 = arith.constant 0 : index
    %38 = vector.load %arg6[%c0_12, %c0_13] : memref<8x128xf32, #tpu.memory_space<vmem>>, vector<8x128xf32>
    tpu.vector_store %arg6[%c0_12, %c0_13], %37 {strides = array<i32>} : memref<8x128xf32, #tpu.memory_space<vmem>>, vector<8x128xf32>,
    %c0_14 = arith.constant 0 : index
    %c0_15 = arith.constant 0 : index
    %39 = vector.load %arg7[%c0_14, %c0_15] : memref<8x128xf32, #tpu.memory_space<vmem>>, vector<8x128xf32>
    tpu.vector_store %arg7[%c0_14, %c0_15], %35 {strides = array<i32>} : memref<8x128xf32, #tpu.memory_space<vmem>>, vector<8x128xf32>,
    %40 = arith.truncf %37 : vector<8x128xf32> to vector<8x128xbf16>
    %41 = arith.index_cast %c0_i32_2 : i32 to index
    %c0_16 = arith.constant 0 : index
    %c0_17 = arith.constant 0 : index
    %42 = vector.load %arg5[%41, %c0_16, %c0_17] : memref<8x8x128xbf16, #tpu.memory_space<vmem>>, vector<1x8x128xbf16>
    %43 = vector.shape_cast %42 : vector<1x8x128xbf16> to vector<8x128xbf16>
    %44 = vector.shape_cast %40 : vector<8x128xbf16> to vector<1x8x128xbf16>
    tpu.vector_store %arg5[%41, %c0_16, %c0_17], %44 {strides = array<i32>} : memref<8x8x128xbf16, #tpu.memory_space<vmem>>, vector<1x8x128xbf16>,
    %c1_i32 = arith.constant 1 : i32
    %c0_18 = arith.constant 0 : index
    %c0_19 = arith.constant 0 : index
    %45 = vector.load %arg6[%c0_18, %c0_19] : memref<8x128xf32, #tpu.memory_space<vmem>>, vector<8x128xf32>
    %c0_20 = arith.constant 0 : index
    %c0_21 = arith.constant 0 : index
    %46 = vector.load %arg7[%c0_20, %c0_21] : memref<8x128xf32, #tpu.memory_space<vmem>>, vector<8x128xf32>
    %47 = arith.index_cast %c1_i32 : i32 to index
    %c0_22 = arith.constant 0 : index
    %c0_23 = arith.constant 0 : index
    %48 = vector.load %arg1[%47, %c0_22, %c0_23] : memref<8x8x512xbf16, #tpu.memory_space<vmem>>, vector<1x8x512xbf16>
    %49 = vector.shape_cast %48 : vector<1x8x512xbf16> to vector<8x512xbf16>
    %50 = arith.extf %49 : vector<8x512xbf16> to vector<8x512xf32>
    %51 = arith.truncf %45 : vector<8x128xf32> to vector<8x128xbf16>
    %cst_24 = arith.constant dense<0.000000e+00> : vector<8x512xf32>
    %52 = tpu.matmul %51, %3, %cst_24 {dimension_numbers = #tpu.dot_dimension_numbers<[1], [0], [0], [1], [0, 0, 1, 1], [], []>} : vector<8x128xbf16>, vector<128x512xbf16>, vector<8x512xf32> -> vector<8x512xf32>
    %53 = arith.addf %50, %52 : vector<8x512xf32>
    %54 = vector.extract_strided_slice %53 {offsets = [0, 0], sizes = [8, 128], strides = [1, 1]} : vector<8x512xf32> to vector<8x128xf32>
    %55 = arith.negf %54 : vector<8x128xf32>
    %56 = math.exp %55 : vector<8x128xf32>
    %cst_25 = arith.constant 1.000000e+00 : f32
    %57 = vector.broadcast %cst_25 : f32 to vector<8x128xf32>
    %58 = arith.addf %57, %56 : vector<8x128xf32>
    %59 = arith.divf %57, %58 : vector<8x128xf32>
    %60 = vector.extract_strided_slice %53 {offsets = [0, 128], sizes = [8, 128], strides = [1, 1]} : vector<8x512xf32> to vector<8x128xf32>
    %61 = arith.negf %60 : vector<8x128xf32>
    %62 = math.exp %61 : vector<8x128xf32>
    %cst_26 = arith.constant 1.000000e+00 : f32
    %63 = vector.broadcast %cst_26 : f32 to vector<8x128xf32>
    %64 = arith.addf %63, %62 : vector<8x128xf32>
    %65 = arith.divf %63, %64 : vector<8x128xf32>
    %66 = vector.extract_strided_slice %53 {offsets = [0, 256], sizes = [8, 128], strides = [1, 1]} : vector<8x512xf32> to vector<8x128xf32>
    %67 = math.tanh %66 : vector<8x128xf32>
    %68 = vector.extract_strided_slice %53 {offsets = [0, 384], sizes = [8, 128], strides = [1, 1]} : vector<8x512xf32> to vector<8x128xf32>
    %69 = arith.negf %68 : vector<8x128xf32>
    %70 = math.exp %69 : vector<8x128xf32>
    %cst_27 = arith.constant 1.000000e+00 : f32
    %71 = vector.broadcast %cst_27 : f32 to vector<8x128xf32>
    %72 = arith.addf %71, %70 : vector<8x128xf32>
    %73 = arith.divf %71, %72 : vector<8x128xf32>
    %74 = arith.mulf %65, %46 : vector<8x128xf32>
    %75 = arith.mulf %59, %67 : vector<8x128xf32>
    %76 = arith.addf %74, %75 : vector<8x128xf32>
    %77 = math.tanh %76 : vector<8x128xf32>
    %78 = arith.mulf %73, %77 : vector<8x128xf32>
    %c0_28 = arith.constant 0 : index
    %c0_29 = arith.constant 0 : index
    %79 = vector.load %arg6[%c0_28, %c0_29] : memref<8x128xf32, #tpu.memory_space<vmem>>, vector<8x128xf32>
    tpu.vector_store %arg6[%c0_28, %c0_29], %78 {strides = array<i32>} : memref<8x128xf32, #tpu.memory_space<vmem>>, vector<8x128xf32>,
    %c0_30 = arith.constant 0 : index
    %c0_31 = arith.constant 0 : index
    %80 = vector.load %arg7[%c0_30, %c0_31] : memref<8x128xf32, #tpu.memory_space<vmem>>, vector<8x128xf32>
    tpu.vector_store %arg7[%c0_30, %c0_31], %76 {strides = array<i32>} : memref<8x128xf32, #tpu.memory_space<vmem>>, vector<8x128xf32>,
    %81 = arith.truncf %78 : vector<8x128xf32> to vector<8x128xbf16>
    %82 = arith.index_cast %c1_i32 : i32 to index
    %c0_32 = arith.constant 0 : index
    %c0_33 = arith.constant 0 : index
    %83 = vector.load %arg5[%82, %c0_32, %c0_33] : memref<8x8x128xbf16, #tpu.memory_space<vmem>>, vector<1x8x128xbf16>
    %84 = vector.shape_cast %83 : vector<1x8x128xbf16> to vector<8x128xbf16>
    %85 = vector.shape_cast %81 : vector<8x128xbf16> to vector<1x8x128xbf16>
    tpu.vector_store %arg5[%82, %c0_32, %c0_33], %85 {strides = array<i32>} : memref<8x8x128xbf16, #tpu.memory_space<vmem>>, vector<1x8x128xbf16>,
    %c2_i32 = arith.constant 2 : i32
    %c0_34 = arith.constant 0 : index
    %c0_35 = arith.constant 0 : index
    %86 = vector.load %arg6[%c0_34, %c0_35] : memref<8x128xf32, #tpu.memory_space<vmem>>, vector<8x128xf32>
    %c0_36 = arith.constant 0 : index
    %c0_37 = arith.constant 0 : index
    %87 = vector.load %arg7[%c0_36, %c0_37] : memref<8x128xf32, #tpu.memory_space<vmem>>, vector<8x128xf32>
    %88 = arith.index_cast %c2_i32 : i32 to index
    %c0_38 = arith.constant 0 : index
    %c0_39 = arith.constant 0 : index
    %89 = vector.load %arg1[%88, %c0_38, %c0_39] : memref<8x8x512xbf16, #tpu.memory_space<vmem>>, vector<1x8x512xbf16>
    %90 = vector.shape_cast %89 : vector<1x8x512xbf16> to vector<8x512xbf16>
    %91 = arith.extf %90 : vector<8x512xbf16> to vector<8x512xf32>
    %92 = arith.truncf %86 : vector<8x128xf32> to vector<8x128xbf16>
    %cst_40 = arith.constant dense<0.000000e+00> : vector<8x512xf32>
    %93 = tpu.matmul %92, %3, %cst_40 {dimension_numbers = #tpu.dot_dimension_numbers<[1], [0], [0], [1], [0, 0, 1, 1], [], []>} : vector<8x128xbf16>, vector<128x512xbf16>, vector<8x512xf32> -> vector<8x512xf32>
    %94 = arith.addf %91, %93 : vector<8x512xf32>
    %95 = vector.extract_strided_slice %94 {offsets = [0, 0], sizes = [8, 128], strides = [1, 1]} : vector<8x512xf32> to vector<8x128xf32>
    %96 = arith.negf %95 : vector<8x128xf32>
    %97 = math.exp %96 : vector<8x128xf32>
    %cst_41 = arith.constant 1.000000e+00 : f32
    %98 = vector.broadcast %cst_41 : f32 to vector<8x128xf32>
    %99 = arith.addf %98, %97 : vector<8x128xf32>
    %100 = arith.divf %98, %99 : vector<8x128xf32>
    %101 = vector.extract_strided_slice %94 {offsets = [0, 128], sizes = [8, 128], strides = [1, 1]} : vector<8x512xf32> to vector<8x128xf32>
    %102 = arith.negf %101 : vector<8x128xf32>
    %103 = math.exp %102 : vector<8x128xf32>
    %cst_42 = arith.constant 1.000000e+00 : f32
    %104 = vector.broadcast %cst_42 : f32 to vector<8x128xf32>
    %105 = arith.addf %104, %103 : vector<8x128xf32>
    %106 = arith.divf %104, %105 : vector<8x128xf32>
    %107 = vector.extract_strided_slice %94 {offsets = [0, 256], sizes = [8, 128], strides = [1, 1]} : vector<8x512xf32> to vector<8x128xf32>
    %108 = math.tanh %107 : vector<8x128xf32>
    %109 = vector.extract_strided_slice %94 {offsets = [0, 384], sizes = [8, 128], strides = [1, 1]} : vector<8x512xf32> to vector<8x128xf32>
    %110 = arith.negf %109 : vector<8x128xf32>
    %111 = math.exp %110 : vector<8x128xf32>
    %cst_43 = arith.constant 1.000000e+00 : f32
    %112 = vector.broadcast %cst_43 : f32 to vector<8x128xf32>
    %113 = arith.addf %112, %111 : vector<8x128xf32>
    %114 = arith.divf %112, %113 : vector<8x128xf32>
    %115 = arith.mulf %106, %87 : vector<8x128xf32>
    %116 = arith.mulf %100, %108 : vector<8x128xf32>
    %117 = arith.addf %115, %116 : vector<8x128xf32>
    %118 = math.tanh %117 : vector<8x128xf32>
    %119 = arith.mulf %114, %118 : vector<8x128xf32>
    %c0_44 = arith.constant 0 : index
    %c0_45 = arith.constant 0 : index
    %120 = vector.load %arg6[%c0_44, %c0_45] : memref<8x128xf32, #tpu.memory_space<vmem>>, vector<8x128xf32>
    tpu.vector_store %arg6[%c0_44, %c0_45], %119 {strides = array<i32>} : memref<8x128xf32, #tpu.memory_space<vmem>>, vector<8x128xf32>,
    %c0_46 = arith.constant 0 : index
    %c0_47 = arith.constant 0 : index
    %121 = vector.load %arg7[%c0_46, %c0_47] : memref<8x128xf32, #tpu.memory_space<vmem>>, vector<8x128xf32>
    tpu.vector_store %arg7[%c0_46, %c0_47], %117 {strides = array<i32>} : memref<8x128xf32, #tpu.memory_space<vmem>>, vector<8x128xf32>,
    %122 = arith.truncf %119 : vector<8x128xf32> to vector<8x128xbf16>
    %123 = arith.index_cast %c2_i32 : i32 to index
    %c0_48 = arith.constant 0 : index
    %c0_49 = arith.constant 0 : index
    %124 = vector.load %arg5[%123, %c0_48, %c0_49] : memref<8x8x128xbf16, #tpu.memory_space<vmem>>, vector<1x8x128xbf16>
    %125 = vector.shape_cast %124 : vector<1x8x128xbf16> to vector<8x128xbf16>
    %126 = vector.shape_cast %122 : vector<8x128xbf16> to vector<1x8x128xbf16>
    tpu.vector_store %arg5[%123, %c0_48, %c0_49], %126 {strides = array<i32>} : memref<8x8x128xbf16, #tpu.memory_space<vmem>>, vector<1x8x128xbf16>,
    %c3_i32 = arith.constant 3 : i32
    %c0_50 = arith.constant 0 : index
    %c0_51 = arith.constant 0 : index
    %127 = vector.load %arg6[%c0_50, %c0_51] : memref<8x128xf32, #tpu.memory_space<vmem>>, vector<8x128xf32>
    %c0_52 = arith.constant 0 : index
    %c0_53 = arith.constant 0 : index
    %128 = vector.load %arg7[%c0_52, %c0_53] : memref<8x128xf32, #tpu.memory_space<vmem>>, vector<8x128xf32>
    %129 = arith.index_cast %c3_i32 : i32 to index
    %c0_54 = arith.constant 0 : index
    %c0_55 = arith.constant 0 : index
    %130 = vector.load %arg1[%129, %c0_54, %c0_55] : memref<8x8x512xbf16, #tpu.memory_space<vmem>>, vector<1x8x512xbf16>
    %131 = vector.shape_cast %130 : vector<1x8x512xbf16> to vector<8x512xbf16>
    %132 = arith.extf %131 : vector<8x512xbf16> to vector<8x512xf32>
    %133 = arith.truncf %127 : vector<8x128xf32> to vector<8x128xbf16>
    %cst_56 = arith.constant dense<0.000000e+00> : vector<8x512xf32>
    %134 = tpu.matmul %133, %3, %cst_56 {dimension_numbers = #tpu.dot_dimension_numbers<[1], [0], [0], [1], [0, 0, 1, 1], [], []>} : vector<8x128xbf16>, vector<128x512xbf16>, vector<8x512xf32> -> vector<8x512xf32>
    %135 = arith.addf %132, %134 : vector<8x512xf32>
    %136 = vector.extract_strided_slice %135 {offsets = [0, 0], sizes = [8, 128], strides = [1, 1]} : vector<8x512xf32> to vector<8x128xf32>
    %137 = arith.negf %136 : vector<8x128xf32>
    %138 = math.exp %137 : vector<8x128xf32>
    %cst_57 = arith.constant 1.000000e+00 : f32
    %139 = vector.broadcast %cst_57 : f32 to vector<8x128xf32>
    %140 = arith.addf %139, %138 : vector<8x128xf32>
    %141 = arith.divf %139, %140 : vector<8x128xf32>
    %142 = vector.extract_strided_slice %135 {offsets = [0, 128], sizes = [8, 128], strides = [1, 1]} : vector<8x512xf32> to vector<8x128xf32>
    %143 = arith.negf %142 : vector<8x128xf32>
    %144 = math.exp %143 : vector<8x128xf32>
    %cst_58 = arith.constant 1.000000e+00 : f32
    %145 = vector.broadcast %cst_58 : f32 to vector<8x128xf32>
    %146 = arith.addf %145, %144 : vector<8x128xf32>
    %147 = arith.divf %145, %146 : vector<8x128xf32>
    %148 = vector.extract_strided_slice %135 {offsets = [0, 256], sizes = [8, 128], strides = [1, 1]} : vector<8x512xf32> to vector<8x128xf32>
    %149 = math.tanh %148 : vector<8x128xf32>
    %150 = vector.extract_strided_slice %135 {offsets = [0, 384], sizes = [8, 128], strides = [1, 1]} : vector<8x512xf32> to vector<8x128xf32>
    %151 = arith.negf %150 : vector<8x128xf32>
    %152 = math.exp %151 : vector<8x128xf32>
    %cst_59 = arith.constant 1.000000e+00 : f32
    %153 = vector.broadcast %cst_59 : f32 to vector<8x128xf32>
    %154 = arith.addf %153, %152 : vector<8x128xf32>
    %155 = arith.divf %153, %154 : vector<8x128xf32>
    %156 = arith.mulf %147, %128 : vector<8x128xf32>
    %157 = arith.mulf %141, %149 : vector<8x128xf32>
    %158 = arith.addf %156, %157 : vector<8x128xf32>
    %159 = math.tanh %158 : vector<8x128xf32>
    %160 = arith.mulf %155, %159 : vector<8x128xf32>
    %c0_60 = arith.constant 0 : index
    %c0_61 = arith.constant 0 : index
    %161 = vector.load %arg6[%c0_60, %c0_61] : memref<8x128xf32, #tpu.memory_space<vmem>>, vector<8x128xf32>
    tpu.vector_store %arg6[%c0_60, %c0_61], %160 {strides = array<i32>} : memref<8x128xf32, #tpu.memory_space<vmem>>, vector<8x128xf32>,
    %c0_62 = arith.constant 0 : index
    %c0_63 = arith.constant 0 : index
    %162 = vector.load %arg7[%c0_62, %c0_63] : memref<8x128xf32, #tpu.memory_space<vmem>>, vector<8x128xf32>
    tpu.vector_store %arg7[%c0_62, %c0_63], %158 {strides = array<i32>} : memref<8x128xf32, #tpu.memory_space<vmem>>, vector<8x128xf32>,
    %163 = arith.truncf %160 : vector<8x128xf32> to vector<8x128xbf16>
    %164 = arith.index_cast %c3_i32 : i32 to index
    %c0_64 = arith.constant 0 : index
    %c0_65 = arith.constant 0 : index
    %165 = vector.load %arg5[%164, %c0_64, %c0_65] : memref<8x8x128xbf16, #tpu.memory_space<vmem>>, vector<1x8x128xbf16>
    %166 = vector.shape_cast %165 : vector<1x8x128xbf16> to vector<8x128xbf16>
    %167 = vector.shape_cast %163 : vector<8x128xbf16> to vector<1x8x128xbf16>
    tpu.vector_store %arg5[%164, %c0_64, %c0_65], %167 {strides = array<i32>} : memref<8x8x128xbf16, #tpu.memory_space<vmem>>, vector<1x8x128xbf16>,
    %c4_i32 = arith.constant 4 : i32
    %c0_66 = arith.constant 0 : index
    %c0_67 = arith.constant 0 : index
    %168 = vector.load %arg6[%c0_66, %c0_67] : memref<8x128xf32, #tpu.memory_space<vmem>>, vector<8x128xf32>
    %c0_68 = arith.constant 0 : index
    %c0_69 = arith.constant 0 : index
    %169 = vector.load %arg7[%c0_68, %c0_69] : memref<8x128xf32, #tpu.memory_space<vmem>>, vector<8x128xf32>
    %170 = arith.index_cast %c4_i32 : i32 to index
    %c0_70 = arith.constant 0 : index
    %c0_71 = arith.constant 0 : index
    %171 = vector.load %arg1[%170, %c0_70, %c0_71] : memref<8x8x512xbf16, #tpu.memory_space<vmem>>, vector<1x8x512xbf16>
    %172 = vector.shape_cast %171 : vector<1x8x512xbf16> to vector<8x512xbf16>
    %173 = arith.extf %172 : vector<8x512xbf16> to vector<8x512xf32>
    %174 = arith.truncf %168 : vector<8x128xf32> to vector<8x128xbf16>
    %cst_72 = arith.constant dense<0.000000e+00> : vector<8x512xf32>
    %175 = tpu.matmul %174, %3, %cst_72 {dimension_numbers = #tpu.dot_dimension_numbers<[1], [0], [0], [1], [0, 0, 1, 1], [], []>} : vector<8x128xbf16>, vector<128x512xbf16>, vector<8x512xf32> -> vector<8x512xf32>
    %176 = arith.addf %173, %175 : vector<8x512xf32>
    %177 = vector.extract_strided_slice %176 {offsets = [0, 0], sizes = [8, 128], strides = [1, 1]} : vector<8x512xf32> to vector<8x128xf32>
    %178 = arith.negf %177 : vector<8x128xf32>
    %179 = math.exp %178 : vector<8x128xf32>
    %cst_73 = arith.constant 1.000000e+00 : f32
    %180 = vector.broadcast %cst_73 : f32 to vector<8x128xf32>
    %181 = arith.addf %180, %179 : vector<8x128xf32>
    %182 = arith.divf %180, %181 : vector<8x128xf32>
    %183 = vector.extract_strided_slice %176 {offsets = [0, 128], sizes = [8, 128], strides = [1, 1]} : vector<8x512xf32> to vector<8x128xf32>
    %184 = arith.negf %183 : vector<8x128xf32>
    %185 = math.exp %184 : vector<8x128xf32>
    %cst_74 = arith.constant 1.000000e+00 : f32
    %186 = vector.broadcast %cst_74 : f32 to vector<8x128xf32>
    %187 = arith.addf %186, %185 : vector<8x128xf32>
    %188 = arith.divf %186, %187 : vector<8x128xf32>
    %189 = vector.extract_strided_slice %176 {offsets = [0, 256], sizes = [8, 128], strides = [1, 1]} : vector<8x512xf32> to vector<8x128xf32>
    %190 = math.tanh %189 : vector<8x128xf32>
    %191 = vector.extract_strided_slice %176 {offsets = [0, 384], sizes = [8, 128], strides = [1, 1]} : vector<8x512xf32> to vector<8x128xf32>
    %192 = arith.negf %191 : vector<8x128xf32>
    %193 = math.exp %192 : vector<8x128xf32>
    %cst_75 = arith.constant 1.000000e+00 : f32
    %194 = vector.broadcast %cst_75 : f32 to vector<8x128xf32>
    %195 = arith.addf %194, %193 : vector<8x128xf32>
    %196 = arith.divf %194, %195 : vector<8x128xf32>
    %197 = arith.mulf %188, %169 : vector<8x128xf32>
    %198 = arith.mulf %182, %190 : vector<8x128xf32>
    %199 = arith.addf %197, %198 : vector<8x128xf32>
    %200 = math.tanh %199 : vector<8x128xf32>
    %201 = arith.mulf %196, %200 : vector<8x128xf32>
    %c0_76 = arith.constant 0 : index
    %c0_77 = arith.constant 0 : index
    %202 = vector.load %arg6[%c0_76, %c0_77] : memref<8x128xf32, #tpu.memory_space<vmem>>, vector<8x128xf32>
    tpu.vector_store %arg6[%c0_76, %c0_77], %201 {strides = array<i32>} : memref<8x128xf32, #tpu.memory_space<vmem>>, vector<8x128xf32>,
    %c0_78 = arith.constant 0 : index
    %c0_79 = arith.constant 0 : index
    %203 = vector.load %arg7[%c0_78, %c0_79] : memref<8x128xf32, #tpu.memory_space<vmem>>, vector<8x128xf32>
    tpu.vector_store %arg7[%c0_78, %c0_79], %199 {strides = array<i32>} : memref<8x128xf32, #tpu.memory_space<vmem>>, vector<8x128xf32>,
    %204 = arith.truncf %201 : vector<8x128xf32> to vector<8x128xbf16>
    %205 = arith.index_cast %c4_i32 : i32 to index
    %c0_80 = arith.constant 0 : index
    %c0_81 = arith.constant 0 : index
    %206 = vector.load %arg5[%205, %c0_80, %c0_81] : memref<8x8x128xbf16, #tpu.memory_space<vmem>>, vector<1x8x128xbf16>
    %207 = vector.shape_cast %206 : vector<1x8x128xbf16> to vector<8x128xbf16>
    %208 = vector.shape_cast %204 : vector<8x128xbf16> to vector<1x8x128xbf16>
    tpu.vector_store %arg5[%205, %c0_80, %c0_81], %208 {strides = array<i32>} : memref<8x8x128xbf16, #tpu.memory_space<vmem>>, vector<1x8x128xbf16>,
    %c5_i32 = arith.constant 5 : i32
    %c0_82 = arith.constant 0 : index
    %c0_83 = arith.constant 0 : index
    %209 = vector.load %arg6[%c0_82, %c0_83] : memref<8x128xf32, #tpu.memory_space<vmem>>, vector<8x128xf32>
    %c0_84 = arith.constant 0 : index
    %c0_85 = arith.constant 0 : index
    %210 = vector.load %arg7[%c0_84, %c0_85] : memref<8x128xf32, #tpu.memory_space<vmem>>, vector<8x128xf32>
    %211 = arith.index_cast %c5_i32 : i32 to index
    %c0_86 = arith.constant 0 : index
    %c0_87 = arith.constant 0 : index
    %212 = vector.load %arg1[%211, %c0_86, %c0_87] : memref<8x8x512xbf16, #tpu.memory_space<vmem>>, vector<1x8x512xbf16>
    %213 = vector.shape_cast %212 : vector<1x8x512xbf16> to vector<8x512xbf16>
    %214 = arith.extf %213 : vector<8x512xbf16> to vector<8x512xf32>
    %215 = arith.truncf %209 : vector<8x128xf32> to vector<8x128xbf16>
    %cst_88 = arith.constant dense<0.000000e+00> : vector<8x512xf32>
    %216 = tpu.matmul %215, %3, %cst_88 {dimension_numbers = #tpu.dot_dimension_numbers<[1], [0], [0], [1], [0, 0, 1, 1], [], []>} : vector<8x128xbf16>, vector<128x512xbf16>, vector<8x512xf32> -> vector<8x512xf32>
    %217 = arith.addf %214, %216 : vector<8x512xf32>
    %218 = vector.extract_strided_slice %217 {offsets = [0, 0], sizes = [8, 128], strides = [1, 1]} : vector<8x512xf32> to vector<8x128xf32>
    %219 = arith.negf %218 : vector<8x128xf32>
    %220 = math.exp %219 : vector<8x128xf32>
    %cst_89 = arith.constant 1.000000e+00 : f32
    %221 = vector.broadcast %cst_89 : f32 to vector<8x128xf32>
    %222 = arith.addf %221, %220 : vector<8x128xf32>
    %223 = arith.divf %221, %222 : vector<8x128xf32>
    %224 = vector.extract_strided_slice %217 {offsets = [0, 128], sizes = [8, 128], strides = [1, 1]} : vector<8x512xf32> to vector<8x128xf32>
    %225 = arith.negf %224 : vector<8x128xf32>
    %226 = math.exp %225 : vector<8x128xf32>
    %cst_90 = arith.constant 1.000000e+00 : f32
    %227 = vector.broadcast %cst_90 : f32 to vector<8x128xf32>
    %228 = arith.addf %227, %226 : vector<8x128xf32>
    %229 = arith.divf %227, %228 : vector<8x128xf32>
    %230 = vector.extract_strided_slice %217 {offsets = [0, 256], sizes = [8, 128], strides = [1, 1]} : vector<8x512xf32> to vector<8x128xf32>
    %231 = math.tanh %230 : vector<8x128xf32>
    %232 = vector.extract_strided_slice %217 {offsets = [0, 384], sizes = [8, 128], strides = [1, 1]} : vector<8x512xf32> to vector<8x128xf32>
    %233 = arith.negf %232 : vector<8x128xf32>
    %234 = math.exp %233 : vector<8x128xf32>
    %cst_91 = arith.constant 1.000000e+00 : f32
    %235 = vector.broadcast %cst_91 : f32 to vector<8x128xf32>
    %236 = arith.addf %235, %234 : vector<8x128xf32>
    %237 = arith.divf %235, %236 : vector<8x128xf32>
    %238 = arith.mulf %229, %210 : vector<8x128xf32>
    %239 = arith.mulf %223, %231 : vector<8x128xf32>
    %240 = arith.addf %238, %239 : vector<8x128xf32>
    %241 = math.tanh %240 : vector<8x128xf32>
    %242 = arith.mulf %237, %241 : vector<8x128xf32>
    %c0_92 = arith.constant 0 : index
    %c0_93 = arith.constant 0 : index
    %243 = vector.load %arg6[%c0_92, %c0_93] : memref<8x128xf32, #tpu.memory_space<vmem>>, vector<8x128xf32>
    tpu.vector_store %arg6[%c0_92, %c0_93], %242 {strides = array<i32>} : memref<8x128xf32, #tpu.memory_space<vmem>>, vector<8x128xf32>,
    %c0_94 = arith.constant 0 : index
    %c0_95 = arith.constant 0 : index
    %244 = vector.load %arg7[%c0_94, %c0_95] : memref<8x128xf32, #tpu.memory_space<vmem>>, vector<8x128xf32>
    tpu.vector_store %arg7[%c0_94, %c0_95], %240 {strides = array<i32>} : memref<8x128xf32, #tpu.memory_space<vmem>>, vector<8x128xf32>,
    %245 = arith.truncf %242 : vector<8x128xf32> to vector<8x128xbf16>
    %246 = arith.index_cast %c5_i32 : i32 to index
    %c0_96 = arith.constant 0 : index
    %c0_97 = arith.constant 0 : index
    %247 = vector.load %arg5[%246, %c0_96, %c0_97] : memref<8x8x128xbf16, #tpu.memory_space<vmem>>, vector<1x8x128xbf16>
    %248 = vector.shape_cast %247 : vector<1x8x128xbf16> to vector<8x128xbf16>
    %249 = vector.shape_cast %245 : vector<8x128xbf16> to vector<1x8x128xbf16>
    tpu.vector_store %arg5[%246, %c0_96, %c0_97], %249 {strides = array<i32>} : memref<8x8x128xbf16, #tpu.memory_space<vmem>>, vector<1x8x128xbf16>,
    %c6_i32 = arith.constant 6 : i32
    %c0_98 = arith.constant 0 : index
    %c0_99 = arith.constant 0 : index
    %250 = vector.load %arg6[%c0_98, %c0_99] : memref<8x128xf32, #tpu.memory_space<vmem>>, vector<8x128xf32>
    %c0_100 = arith.constant 0 : index
    %c0_101 = arith.constant 0 : index
    %251 = vector.load %arg7[%c0_100, %c0_101] : memref<8x128xf32, #tpu.memory_space<vmem>>, vector<8x128xf32>
    %252 = arith.index_cast %c6_i32 : i32 to index
    %c0_102 = arith.constant 0 : index
    %c0_103 = arith.constant 0 : index
    %253 = vector.load %arg1[%252, %c0_102, %c0_103] : memref<8x8x512xbf16, #tpu.memory_space<vmem>>, vector<1x8x512xbf16>
    %254 = vector.shape_cast %253 : vector<1x8x512xbf16> to vector<8x512xbf16>
    %255 = arith.extf %254 : vector<8x512xbf16> to vector<8x512xf32>
    %256 = arith.truncf %250 : vector<8x128xf32> to vector<8x128xbf16>
    %cst_104 = arith.constant dense<0.000000e+00> : vector<8x512xf32>
    %257 = tpu.matmul %256, %3, %cst_104 {dimension_numbers = #tpu.dot_dimension_numbers<[1], [0], [0], [1], [0, 0, 1, 1], [], []>} : vector<8x128xbf16>, vector<128x512xbf16>, vector<8x512xf32> -> vector<8x512xf32>
    %258 = arith.addf %255, %257 : vector<8x512xf32>
    %259 = vector.extract_strided_slice %258 {offsets = [0, 0], sizes = [8, 128], strides = [1, 1]} : vector<8x512xf32> to vector<8x128xf32>
    %260 = arith.negf %259 : vector<8x128xf32>
    %261 = math.exp %260 : vector<8x128xf32>
    %cst_105 = arith.constant 1.000000e+00 : f32
    %262 = vector.broadcast %cst_105 : f32 to vector<8x128xf32>
    %263 = arith.addf %262, %261 : vector<8x128xf32>
    %264 = arith.divf %262, %263 : vector<8x128xf32>
    %265 = vector.extract_strided_slice %258 {offsets = [0, 128], sizes = [8, 128], strides = [1, 1]} : vector<8x512xf32> to vector<8x128xf32>
    %266 = arith.negf %265 : vector<8x128xf32>
    %267 = math.exp %266 : vector<8x128xf32>
    %cst_106 = arith.constant 1.000000e+00 : f32
    %268 = vector.broadcast %cst_106 : f32 to vector<8x128xf32>
    %269 = arith.addf %268, %267 : vector<8x128xf32>
    %270 = arith.divf %268, %269 : vector<8x128xf32>
    %271 = vector.extract_strided_slice %258 {offsets = [0, 256], sizes = [8, 128], strides = [1, 1]} : vector<8x512xf32> to vector<8x128xf32>
    %272 = math.tanh %271 : vector<8x128xf32>
    %273 = vector.extract_strided_slice %258 {offsets = [0, 384], sizes = [8, 128], strides = [1, 1]} : vector<8x512xf32> to vector<8x128xf32>
    %274 = arith.negf %273 : vector<8x128xf32>
    %275 = math.exp %274 : vector<8x128xf32>
    %cst_107 = arith.constant 1.000000e+00 : f32
    %276 = vector.broadcast %cst_107 : f32 to vector<8x128xf32>
    %277 = arith.addf %276, %275 : vector<8x128xf32>
    %278 = arith.divf %276, %277 : vector<8x128xf32>
    %279 = arith.mulf %270, %251 : vector<8x128xf32>
    %280 = arith.mulf %264, %272 : vector<8x128xf32>
    %281 = arith.addf %279, %280 : vector<8x128xf32>
    %282 = math.tanh %281 : vector<8x128xf32>
    %283 = arith.mulf %278, %282 : vector<8x128xf32>
    %c0_108 = arith.constant 0 : index
    %c0_109 = arith.constant 0 : index
    %284 = vector.load %arg6[%c0_108, %c0_109] : memref<8x128xf32, #tpu.memory_space<vmem>>, vector<8x128xf32>
    tpu.vector_store %arg6[%c0_108, %c0_109], %283 {strides = array<i32>} : memref<8x128xf32, #tpu.memory_space<vmem>>, vector<8x128xf32>,
    %c0_110 = arith.constant 0 : index
    %c0_111 = arith.constant 0 : index
    %285 = vector.load %arg7[%c0_110, %c0_111] : memref<8x128xf32, #tpu.memory_space<vmem>>, vector<8x128xf32>
    tpu.vector_store %arg7[%c0_110, %c0_111], %281 {strides = array<i32>} : memref<8x128xf32, #tpu.memory_space<vmem>>, vector<8x128xf32>,
    %286 = arith.truncf %283 : vector<8x128xf32> to vector<8x128xbf16>
    %287 = arith.index_cast %c6_i32 : i32 to index
    %c0_112 = arith.constant 0 : index
    %c0_113 = arith.constant 0 : index
    %288 = vector.load %arg5[%287, %c0_112, %c0_113] : memref<8x8x128xbf16, #tpu.memory_space<vmem>>, vector<1x8x128xbf16>
    %289 = vector.shape_cast %288 : vector<1x8x128xbf16> to vector<8x128xbf16>
    %290 = vector.shape_cast %286 : vector<8x128xbf16> to vector<1x8x128xbf16>
    tpu.vector_store %arg5[%287, %c0_112, %c0_113], %290 {strides = array<i32>} : memref<8x8x128xbf16, #tpu.memory_space<vmem>>, vector<1x8x128xbf16>,
    %c7_i32 = arith.constant 7 : i32
    %c0_114 = arith.constant 0 : index
    %c0_115 = arith.constant 0 : index
    %291 = vector.load %arg6[%c0_114, %c0_115] : memref<8x128xf32, #tpu.memory_space<vmem>>, vector<8x128xf32>
    %c0_116 = arith.constant 0 : index
    %c0_117 = arith.constant 0 : index
    %292 = vector.load %arg7[%c0_116, %c0_117] : memref<8x128xf32, #tpu.memory_space<vmem>>, vector<8x128xf32>
    %293 = arith.index_cast %c7_i32 : i32 to index
    %c0_118 = arith.constant 0 : index
    %c0_119 = arith.constant 0 : index
    %294 = vector.load %arg1[%293, %c0_118, %c0_119] : memref<8x8x512xbf16, #tpu.memory_space<vmem>>, vector<1x8x512xbf16>
    %295 = vector.shape_cast %294 : vector<1x8x512xbf16> to vector<8x512xbf16>
    %296 = arith.extf %295 : vector<8x512xbf16> to vector<8x512xf32>
    %297 = arith.truncf %291 : vector<8x128xf32> to vector<8x128xbf16>
    %cst_120 = arith.constant dense<0.000000e+00> : vector<8x512xf32>
    %298 = tpu.matmul %297, %3, %cst_120 {dimension_numbers = #tpu.dot_dimension_numbers<[1], [0], [0], [1], [0, 0, 1, 1], [], []>} : vector<8x128xbf16>, vector<128x512xbf16>, vector<8x512xf32> -> vector<8x512xf32>
    %299 = arith.addf %296, %298 : vector<8x512xf32>
    %300 = vector.extract_strided_slice %299 {offsets = [0, 0], sizes = [8, 128], strides = [1, 1]} : vector<8x512xf32> to vector<8x128xf32>
    %301 = arith.negf %300 : vector<8x128xf32>
    %302 = math.exp %301 : vector<8x128xf32>
    %cst_121 = arith.constant 1.000000e+00 : f32
    %303 = vector.broadcast %cst_121 : f32 to vector<8x128xf32>
    %304 = arith.addf %303, %302 : vector<8x128xf32>
    %305 = arith.divf %303, %304 : vector<8x128xf32>
    %306 = vector.extract_strided_slice %299 {offsets = [0, 128], sizes = [8, 128], strides = [1, 1]} : vector<8x512xf32> to vector<8x128xf32>
    %307 = arith.negf %306 : vector<8x128xf32>
    %308 = math.exp %307 : vector<8x128xf32>
    %cst_122 = arith.constant 1.000000e+00 : f32
    %309 = vector.broadcast %cst_122 : f32 to vector<8x128xf32>
    %310 = arith.addf %309, %308 : vector<8x128xf32>
    %311 = arith.divf %309, %310 : vector<8x128xf32>
    %312 = vector.extract_strided_slice %299 {offsets = [0, 256], sizes = [8, 128], strides = [1, 1]} : vector<8x512xf32> to vector<8x128xf32>
    %313 = math.tanh %312 : vector<8x128xf32>
    %314 = vector.extract_strided_slice %299 {offsets = [0, 384], sizes = [8, 128], strides = [1, 1]} : vector<8x512xf32> to vector<8x128xf32>
    %315 = arith.negf %314 : vector<8x128xf32>
    %316 = math.exp %315 : vector<8x128xf32>
    %cst_123 = arith.constant 1.000000e+00 : f32
    %317 = vector.broadcast %cst_123 : f32 to vector<8x128xf32>
    %318 = arith.addf %317, %316 : vector<8x128xf32>
    %319 = arith.divf %317, %318 : vector<8x128xf32>
    %320 = arith.mulf %311, %292 : vector<8x128xf32>
    %321 = arith.mulf %305, %313 : vector<8x128xf32>
    %322 = arith.addf %320, %321 : vector<8x128xf32>
    %323 = math.tanh %322 : vector<8x128xf32>
    %324 = arith.mulf %319, %323 : vector<8x128xf32>
    %c0_124 = arith.constant 0 : index
    %c0_125 = arith.constant 0 : index
    %325 = vector.load %arg6[%c0_124, %c0_125] : memref<8x128xf32, #tpu.memory_space<vmem>>, vector<8x128xf32>
    tpu.vector_store %arg6[%c0_124, %c0_125], %324 {strides = array<i32>} : memref<8x128xf32, #tpu.memory_space<vmem>>, vector<8x128xf32>,
    %c0_126 = arith.constant 0 : index
    %c0_127 = arith.constant 0 : index
    %326 = vector.load %arg7[%c0_126, %c0_127] : memref<8x128xf32, #tpu.memory_space<vmem>>, vector<8x128xf32>
    tpu.vector_store %arg7[%c0_126, %c0_127], %322 {strides = array<i32>} : memref<8x128xf32, #tpu.memory_space<vmem>>, vector<8x128xf32>,
    %327 = arith.truncf %324 : vector<8x128xf32> to vector<8x128xbf16>
    %328 = arith.index_cast %c7_i32 : i32 to index
    %c0_128 = arith.constant 0 : index
    %c0_129 = arith.constant 0 : index
    %329 = vector.load %arg5[%328, %c0_128, %c0_129] : memref<8x8x128xbf16, #tpu.memory_space<vmem>>, vector<1x8x128xbf16>
    %330 = vector.shape_cast %329 : vector<1x8x128xbf16> to vector<8x128xbf16>
    %331 = vector.shape_cast %327 : vector<8x128xbf16> to vector<1x8x128xbf16>
    tpu.vector_store %arg5[%328, %c0_128, %c0_129], %331 {strides = array<i32>} : memref<8x8x128xbf16, #tpu.memory_space<vmem>>, vector<1x8x128xbf16>,
    %c8_i32 = arith.constant 8 : i32
    return
  }
  func.func @transform_0(%arg0: i32) -> (i32, i32, i32) {
    %c0_i32 = arith.constant 0 : i32
    %c0_i32_0 = arith.constant 0 : i32
    %c0_i32_1 = arith.constant 0 : i32
    return %arg0, %c0_i32, %c0_i32_0 : i32, i32, i32
  }
  func.func @transform_1(%arg0: i32) -> (i32, i32) {
    %c0_i32 = arith.constant 0 : i32
    %c0_i32_0 = arith.constant 0 : i32
    %c0_i32_1 = arith.constant 0 : i32
    return %c0_i32, %c0_i32_0 : i32, i32
  }
  func.func @transform_2(%arg0: i32) -> (i32, i32) {
    %c0_i32 = arith.constant 0 : i32
    %c0_i32_0 = arith.constant 0 : i32
    %c0_i32_1 = arith.constant 0 : i32
    return %c0_i32, %c0_i32_0 : i32, i32
  }
  func.func @transform_3(%arg0: i32) -> (i32, i32) {
    %c0_i32 = arith.constant 0 : i32
    %c0_i32_0 = arith.constant 0 : i32
    %c0_i32_1 = arith.constant 0 : i32
    return %c0_i32, %c0_i32_0 : i32, i32
  }
  func.func @transform_4(%arg0: i32) -> (i32, i32, i32) {
    %c0_i32 = arith.constant 0 : i32
    %c0_i32_0 = arith.constant 0 : i32
    %c0_i32_1 = arith.constant 0 : i32
    return %arg0, %c0_i32, %c0_i32_0 : i32, i32, i32
  }
  func.func @transform_5(%arg0: i32) -> (i32, i32) {
    %c0_i32 = arith.constant 0 : i32
    %c0_i32_0 = arith.constant 0 : i32
    %c0_i32_1 = arith.constant 0 : i32
    return %c0_i32, %c0_i32_0 : i32, i32
  }
  func.func @transform_6(%arg0: i32) -> (i32, i32) {
    %c0_i32 = arith.constant 0 : i32
    %c0_i32_0 = arith.constant 0 : i32
    %c0_i32_1 = arith.constant 0 : i32
    return %c0_i32, %c0_i32_0 : i32, i32
  }
}

module attributes {stable_mosaic.version = 11 : i64} {
  func.func @linear_kernel(%arg0: i32, %arg1: i32, %arg2: memref<64x128xbf16, #tpu.memory_space<vmem>>, %arg3: memref<128x128xbf16, #tpu.memory_space<vmem>>, %arg4: memref<1x128xf32, #tpu.memory_space<vmem>>, %arg5: memref<64x128xf32, #tpu.memory_space<vmem>>) attributes {dimension_semantics = [#tpu.dimension_semantics<parallel>, #tpu.dimension_semantics<parallel>], iteration_bounds = array<i64: 1, 1>, scalar_prefetch = 0 : i64, scratch_operands = 0 : i64, tpu.core_type = #tpu.core_type<tc>, window_params = [{transform_indices = @transform_0, window_bounds = array<i64: 64, 128>}, {transform_indices = @transform_1, window_bounds = array<i64: 128, 128>}, {transform_indices = @transform_2, window_bounds = array<i64: 1, 128>}, {transform_indices = @transform_3, window_bounds = array<i64: 64, 128>}]} {
    %c0 = arith.constant 0 : index
    %c0_0 = arith.constant 0 : index
    %0 = vector.load %arg2[%c0, %c0_0] : memref<64x128xbf16, #tpu.memory_space<vmem>>, vector<64x128xbf16>
    %c0_1 = arith.constant 0 : index
    %c0_2 = arith.constant 0 : index
    %1 = vector.load %arg3[%c0_1, %c0_2] : memref<128x128xbf16, #tpu.memory_space<vmem>>, vector<128x128xbf16>
    %cst = arith.constant dense<0.000000e+00> : vector<64x128xf32>
    %2 = tpu.matmul %0, %1, %cst {dimension_numbers = #tpu.dot_dimension_numbers<[1], [0], [0], [1], [0, 0, 1, 1], [], []>} : vector<64x128xbf16>, vector<128x128xbf16>, vector<64x128xf32> -> vector<64x128xf32>
    %c0_3 = arith.constant 0 : index
    %c0_4 = arith.constant 0 : index
    %3 = vector.load %arg4[%c0_3, %c0_4] : memref<1x128xf32, #tpu.memory_space<vmem>>, vector<1x128xf32>
    %4 = vector.broadcast %3 : vector<1x128xf32> to vector<64x128xf32>
    %5 = arith.addf %2, %4 : vector<64x128xf32>
    %c0_5 = arith.constant 0 : index
    %c0_6 = arith.constant 0 : index
    %6 = vector.load %arg5[%c0_5, %c0_6] : memref<64x128xf32, #tpu.memory_space<vmem>>, vector<64x128xf32>
    tpu.vector_store %arg5[%c0_5, %c0_6], %5 {strides = array<i32>} : memref<64x128xf32, #tpu.memory_space<vmem>>, vector<64x128xf32>,
    return
  }
  func.func @transform_0(%arg0: i32, %arg1: i32) -> (i32, i32) {
    %c0_i32 = arith.constant 0 : i32
    %c0_i32_0 = arith.constant 0 : i32
    return %arg1, %c0_i32 : i32, i32
  }
  func.func @transform_1(%arg0: i32, %arg1: i32) -> (i32, i32) {
    %c0_i32 = arith.constant 0 : i32
    %c0_i32_0 = arith.constant 0 : i32
    return %c0_i32, %arg0 : i32, i32
  }
  func.func @transform_2(%arg0: i32, %arg1: i32) -> (i32, i32) {
    %c0_i32 = arith.constant 0 : i32
    %c0_i32_0 = arith.constant 0 : i32
    return %c0_i32, %arg0 : i32, i32
  }
  func.func @transform_3(%arg0: i32, %arg1: i32) -> (i32, i32) {
    %c0_i32 = arith.constant 0 : i32
    return %arg1, %arg0 : i32, i32
  }
}

</mosaic_0001>

<bundles_post_ra>
// kernel: lstm_decoder_forward.5
= control target key start
LH: loop header
LB: loop body
LE: loop exit
PB: predicated region body
PF: predicated region fallthrough
CT: control target
= control target key end

     0   :  { %vm101_vm0 = vcmask 261120   ;;  %s529_s1 = inlined_call_operand.vmem [shape: bf16[32,512], index: 1, kind: input, shape index: {}]   ;;  %s530_s0 = inlined_call_operand.vmem [shape: bf16[64,32], index: 0, kind: input, shape index: {}]   ;;  %s531_s2 = inlined_call_operand.vmem [shape: f32[1,512], index: 2, kind: input, shape index: {}]   ;;  %s532_s3 = inlined_call_operand.vmem [shape: bf16[64,512], index: 3, kind: output, shape index: {}]  }
   0x1   :  { %v300_v0 = vld [vmem:[%s529_s1 + $0x20] sm:$0xf]  ;;  %v340_v1 = vld [vmem:[%s529_s1 + $0x2c] sm:$0xf0]  ;;  %v338_v2 = vld [vmem:[%s529_s1 + $0x24] sm:$0xf] }
   0x2   :  { %v301_v3 = vor.u32 %v340_v1, %v300_v0  ;;  %v302_v4 = vld [vmem:[%s529_s1 + $0x30] sm:$0xf0]  ;;  %v308_v5 = vld [vmem:[%s529_s1 + $0x28] sm:$0xf]  ;;  %v341_v6 = vld [vmem:[%s529_s1 + $0x34] sm:$0xf0] }
   0x3   :  { %v305_v7 = vor.u32 %v338_v2, %v302_v4  ;;  %v309_v8 = vor.u32 %v341_v6, %v308_v5  ;;  %v339_v9 = vld [vmem:[%s529_s1 + $0x2c] sm:$0xf]  ;;  %v310_v10 = vld [vmem:[%s529_s1 + $0x38] sm:$0xf0]  ;;  %v284_v11 = vld [vmem:[%s529_s1] sm:$0xf] }
   0x4   :  { %120 = vmatpush.bf16.msra.mxu0 %v301_v3  ;;  %v313_v12 = vor.u32 %v339_v9, %v310_v10  ;;  %v336_v13 = vld [vmem:[%s529_s1 + $0xc] sm:$0xf0]  ;;  %v334_v14 = vld [vmem:[%s529_s1 + $0x4] sm:$0xf]  ;;  %v286_v15 = vld [vmem:[%s529_s1 + $0x10] sm:$0xf0] }
   0x5   :  { %149 = vmatpush.bf16.msra.mxu1 %v305_v7  ;;  %178 = vmatpush.bf16.msra.mxu2 %v309_v8  ;;  %v285_v16 = vor.u32 %v336_v13, %v284_v11  ;;  %v289_v17 = vor.u32 %v334_v14, %v286_v15  ;;  %v292_v18 = vld [vmem:[%s529_s1 + $0x8] sm:$0xf]  ;;  %v337_v19 = vld [vmem:[%s529_s1 + $0x14] sm:$0xf0]  ;;  %v335_v20 = vld [vmem:[%s529_s1 + $0xc] sm:$0xf] }
   0x6   :  { %207 = vmatpush.bf16.msra.mxu3 %v313_v12  ;;  %v293_v21 = vor.u32 %v337_v19, %v292_v18  ;;  %v294_v22 = vld [vmem:[%s529_s1 + $0x18] sm:$0xf0]  ;;  %v330_v24 = vld [vmem:[%s530_s0] sm:$0xff]  ;;  %v331_v25 = vld [vmem:[%s530_s0 + $0x8] sm:$0xff] }
   0x7   :  { %v297_v23 = vor.u32 %v335_v20, %v294_v22  ;;  %v332_v26 = vld [vmem:[%s530_s0 + $0x10] sm:$0xff]  ;;  %v333_v27 = vld [vmem:[%s530_s0 + $0x18] sm:$0xff]  ;;  %v31_v28 = vld [vmem:[%s531_s2] sm:$0xf] }
   0x8   :  { %121 = vmatpush.bf16.msra.mxu0 %v285_v16  ;;  %v441_v29 = vperm.slane %v31_v28, 0  ;;  %v443_v30 = vperm.slane %v31_v28, 1  ;;  %v447_v36 = vperm.slane %v31_v28, 2  ;;  %v449_v37 = vperm.slane %v31_v28, 3 }
   0x9   :  { %150 = vmatpush.bf16.msra.mxu1 %v289_v17  ;;  %179 = vmatpush.bf16.msra.mxu2 %v293_v21 }
   0xa   :  { %208 = vmatpush.bf16.msra.mxu3 %v297_v23 }
   0xb   :  { %314 = vmatmul.msk.bf16.vlgmr.msra.gmra.mxu0 %vm101_vm0, %v330_v24 }
   0xc   :  { %318 = vmatmul.msk.bf16.vlgmr.msra.gmra.mxu1 %vm101_vm0, %v330_v24  ;;  %322 = vmatmul.msk.bf16.vlgmr.msra.gmra.mxu2 %vm101_vm0, %v330_v24 }
   0xd   :  { %326 = vmatmul.msk.bf16.vlgmr.msra.gmra.mxu3 %vm101_vm0, %v330_v24 }
  0x1b   :  { %315 = vmatmul.msk.bf16.gmra.mxu0 %vm101_vm0, %v331_v25 }
  0x1c   :  { %319 = vmatmul.msk.bf16.gmra.mxu1 %vm101_vm0, %v331_v25  ;;  %323 = vmatmul.msk.bf16.gmra.mxu2 %vm101_vm0, %v331_v25 }
  0x1d   :  { %327 = vmatmul.msk.bf16.gmra.mxu3 %vm101_vm0, %v331_v25 }
  0x2b   :  { %316 = vmatmul.msk.bf16.gmra.mxu0 %vm101_vm0, %v332_v26 }
  0x2c   :  { %320 = vmatmul.msk.bf16.gmra.mxu1 %vm101_vm0, %v332_v26  ;;  %324 = vmatmul.msk.bf16.gmra.mxu2 %vm101_vm0, %v332_v26 }
  0x2d   :  { %328 = vmatmul.msk.bf16.gmra.mxu3 %vm101_vm0, %v332_v26 }
  0x3b   :  { %317 = vmatmul.msk.bf16.gmra.mxu0 %vm101_vm0, %v333_v27 }
  0x3c   :  { %321 = vmatmul.msk.bf16.gmra.mxu1 %vm101_vm0, %v333_v27  ;;  %325 = vmatmul.msk.bf16.gmra.mxu2 %vm101_vm0, %v333_v27 }
  0x3d   :  { %329 = vmatmul.msk.bf16.gmra.mxu3 %vm101_vm0, %v333_v27 }
  0x88   :  { %v123_v31 = vpop.f32.mrf.mxu0 }
  0x89   :  { %v124_v32 = vadd.f32 %v123_v31, %v441_v29  ;;  %v152_v33 = vpop.f32.mrf.mxu1 }
  0x8a   :  { %v153_v34 = vadd.f32 %v152_v33, %v443_v30 }
  0x8c   :  { %v230_v35 = vpack.c.bf16 %v153_v34, %v124_v32 }
  0x8e   :  { %246 = vst [vmem:[%s532_s3] sm:$0xff] %v230_v35 }
  0x8f   :  { %v181_v38 = vpop.f32.mrf.mxu2 }
  0x90   :  { %v182_v39 = vadd.f32 %v181_v38, %v447_v36  ;;  %v210_v40 = vpop.f32.mrf.mxu3  ;;  %v125_v41 = vpop.f32.mrf.mxu0 }
  0x91   :  { %v211_v42 = vadd.f32 %v210_v40, %v449_v37  ;;  %v126_v43 = vadd.f32 %v125_v41, %v441_v29  ;;  %v154_v44 = vpop.f32.mrf.mxu1 }
  0x92   :  { %v155_v45 = vadd.f32 %v154_v44, %v443_v30 }
  0x93   :  { %v231_v46 = vpack.c.bf16 %v211_v42, %v182_v39 }
  0x94   :  { %v232_v47 = vpack.c.bf16 %v155_v45, %v126_v43 }
  0x95   :  { %247 = vst [vmem:[%s532_s3 + $0x8] sm:$0xff] %v231_v46 }
  0x96   :  { %248 = vst [vmem:[%s532_s3 + $0x10] sm:$0xff] %v232_v47 }
  0x97   :  { %v183_v48 = vpop.f32.mrf.mxu2 }
  0x98   :  { %v184_v49 = vadd.f32 %v183_v48, %v447_v36  ;;  %v212_v50 = vpop.f32.mrf.mxu3  ;;  %v128_v51 = vpop.f32.mrf.mxu0 }
  0x99   :  { %v213_v52 = vadd.f32 %v212_v50, %v449_v37  ;;  %v129_v53 = vadd.f32 %v128_v51, %v441_v29  ;;  %v157_v54 = vpop.f32.mrf.mxu1 }
  0x9a   :  { %v158_v55 = vadd.f32 %v157_v54, %v443_v30 }
  0x9b   :  { %v233_v56 = vpack.c.bf16 %v213_v52, %v184_v49 }
  0x9c   :  { %v234_v57 = vpack.c.bf16 %v158_v55, %v129_v53 }
  0x9d   :  { %249 = vst [vmem:[%s532_s3 + $0x18] sm:$0xff] %v233_v56 }
  0x9e   :  { %250 = vst [vmem:[%s532_s3 + $0x20] sm:$0xff] %v234_v57 }
  0x9f   :  { %v186_v58 = vpop.f32.mrf.mxu2 }
  0xa0   :  { %v187_v59 = vadd.f32 %v186_v58, %v447_v36  ;;  %v215_v60 = vpop.f32.mrf.mxu3  ;;  %v130_v61 = vpop.f32.mrf.mxu0 }
  0xa1   :  { %v216_v62 = vadd.f32 %v215_v60, %v449_v37  ;;  %v131_v63 = vadd.f32 %v130_v61, %v441_v29  ;;  %v159_v0 = vpop.f32.mrf.mxu1 }
  0xa2   :  { %v160_v1 = vadd.f32 %v159_v0, %v443_v30 }
  0xa3   :  { %v235_v2 = vpack.c.bf16 %v216_v62, %v187_v59 }
  0xa4   :  { %v236_v3 = vpack.c.bf16 %v160_v1, %v131_v63 }
  0xa5   :  { %251 = vst [vmem:[%s532_s3 + $0x28] sm:$0xff] %v235_v2 }
  0xa6   :  { %252 = vst [vmem:[%s532_s3 + $0x30] sm:$0xff] %v236_v3 }
  0xa7   :  { %v188_v4 = vpop.f32.mrf.mxu2 }
  0xa8   :  { %v189_v5 = vadd.f32 %v188_v4, %v447_v36  ;;  %v217_v6 = vpop.f32.mrf.mxu3  ;;  %v133_v7 = vpop.f32.mrf.mxu0 }
  0xa9   :  { %v218_v8 = vadd.f32 %v217_v6, %v449_v37  ;;  %v134_v9 = vadd.f32 %v133_v7, %v441_v29  ;;  %v162_v10 = vpop.f32.mrf.mxu1 }
  0xaa   :  { %v163_v11 = vadd.f32 %v162_v10, %v443_v30 }
  0xab   :  { %v237_v12 = vpack.c.bf16 %v218_v8, %v189_v5 }
  0xac   :  { %v238_v13 = vpack.c.bf16 %v163_v11, %v134_v9 }
  0xad   :  { %253 = vst [vmem:[%s532_s3 + $0x38] sm:$0xff] %v237_v12 }
  0xae   :  { %254 = vst [vmem:[%s532_s3 + $0x40] sm:$0xff] %v238_v13 }
  0xaf   :  { %v191_v14 = vpop.f32.mrf.mxu2 }
  0xb0   :  { %v192_v15 = vadd.f32 %v191_v14, %v447_v36  ;;  %v220_v16 = vpop.f32.mrf.mxu3  ;;  %v135_v17 = vpop.f32.mrf.mxu0 }
  0xb1   :  { %v221_v18 = vadd.f32 %v220_v16, %v449_v37  ;;  %v136_v19 = vadd.f32 %v135_v17, %v441_v29  ;;  %v164_v20 = vpop.f32.mrf.mxu1 }
  0xb2   :  { %v165_v21 = vadd.f32 %v164_v20, %v443_v30 }
  0xb3   :  { %v239_v22 = vpack.c.bf16 %v221_v18, %v192_v15 }
  0xb4   :  { %v240_v23 = vpack.c.bf16 %v165_v21, %v136_v19 }
  0xb5   :  { %255 = vst [vmem:[%s532_s3 + $0x48] sm:$0xff] %v239_v22 }
  0xb6   :  { %256 = vst [vmem:[%s532_s3 + $0x50] sm:$0xff] %v240_v23 }
  0xb7   :  { %v193_v24 = vpop.f32.mrf.mxu2 }
  0xb8   :  { %v194_v25 = vadd.f32 %v193_v24, %v447_v36  ;;  %v222_v26 = vpop.f32.mrf.mxu3  ;;  %v138_v27 = vpop.f32.mrf.mxu0 }
  0xb9   :  { %v223_v28 = vadd.f32 %v222_v26, %v449_v37  ;;  %v139_v31 = vadd.f32 %v138_v27, %v441_v29  ;;  %v167_v32 = vpop.f32.mrf.mxu1 }
  0xba   :  { %v168_v33 = vadd.f32 %v167_v32, %v443_v30 }
  0xbb   :  { %v241_v34 = vpack.c.bf16 %v223_v28, %v194_v25 }
  0xbc   :  { %v242_v35 = vpack.c.bf16 %v168_v33, %v139_v31 }
  0xbd   :  { %257 = vst [vmem:[%s532_s3 + $0x58] sm:$0xff] %v241_v34 }
  0xbe   :  { %258 = vst [vmem:[%s532_s3 + $0x60] sm:$0xff] %v242_v35 }
  0xbf   :  { %v196_v38 = vpop.f32.mrf.mxu2 }
  0xc0   :  { %v197_v39 = vadd.f32 %v196_v38, %v447_v36  ;;  %v225_v40 = vpop.f32.mrf.mxu3  ;;  %v140_v41 = vpop.f32.mrf.mxu0 }
  0xc1   :  { %v226_v42 = vadd.f32 %v225_v40, %v449_v37  ;;  %v141_v43 = vadd.f32 %v140_v41, %v441_v29  ;;  %v169_v44 = vpop.f32.mrf.mxu1 }
  0xc2   :  { %v170_v45 = vadd.f32 %v169_v44, %v443_v30 }
  0xc3   :  { %v243_v46 = vpack.c.bf16 %v226_v42, %v197_v39 }
  0xc4   :  { %v244_v47 = vpack.c.bf16 %v170_v45, %v141_v43 }
  0xc5   :  { %259 = vst [vmem:[%s532_s3 + $0x68] sm:$0xff] %v243_v46 }
  0xc6   :  { %260 = vst [vmem:[%s532_s3 + $0x70] sm:$0xff] %v244_v47 }
  0xc7   :  { %v198_v48 = vpop.f32.mrf.mxu2 }
  0xc8   :  { %v199_v49 = vadd.f32 %v198_v48, %v447_v36  ;;  %v227_v50 = vpop.f32.mrf.mxu3 }
  0xc9   :  { %v228_v51 = vadd.f32 %v227_v50, %v449_v37 }
  0xcb   :  { %v245_v29 = vpack.c.bf16 %v228_v51, %v199_v49 }
  0xcd   :  { %261 = vst [vmem:[%s532_s3 + $0x78] sm:$0xff] %v245_v29 }

// kernel: lstm_decoder_forward.7
= control target key start
LH: loop header
LB: loop body
LE: loop exit
PB: predicated region body
PF: predicated region fallthrough
CT: control target
= control target key end

     0   :  { %s895_s1 = inlined_call_operand.vmem [shape: bf16[128,512], index: 1, kind: input, shape index: {}]   ;;  %s896_s0 = inlined_call_operand.vmem [shape: bf16[64,128], index: 0, kind: input, shape index: {}]   ;;  %s897_s2 = inlined_call_operand.vmem [shape: f32[1,512], index: 2, kind: input, shape index: {}]   ;;  %s898_s3 = inlined_call_operand.vmem [shape: bf16[64,512], index: 3, kind: output, shape index: {}]  }
   0x1   :  { %v530_v0 = vld [vmem:[%s895_s1 + $0xe0] sm:$0xf]  ;;  %v578_v1 = vld [vmem:[%s895_s1 + $0xec] sm:$0xf0]  ;;  %v576_v2 = vld [vmem:[%s895_s1 + $0xe4] sm:$0xf] }
   0x2   :  { %v531_v3 = vor.u32 %v578_v1, %v530_v0  ;;  %v532_v4 = vld [vmem:[%s895_s1 + $0xf0] sm:$0xf0]  ;;  %v538_v5 = vld [vmem:[%s895_s1 + $0xe8] sm:$0xf]  ;;  %v579_v6 = vld [vmem:[%s895_s1 + $0xf4] sm:$0xf0] }
   0x3   :  { %v535_v7 = vor.u32 %v576_v2, %v532_v4  ;;  %v539_v8 = vor.u32 %v579_v6, %v538_v5  ;;  %v577_v9 = vld [vmem:[%s895_s1 + $0xec] sm:$0xf]  ;;  %v540_v10 = vld [vmem:[%s895_s1 + $0xf8] sm:$0xf0]  ;;  %v514_v11 = vld [vmem:[%s895_s1 + $0xc0] sm:$0xf] }
   0x4   :  { %248 = vmatpush.bf16.msra.mxu0 %v531_v3  ;;  %v543_v12 = vor.u32 %v577_v9, %v540_v10  ;;  %v574_v13 = vld [vmem:[%s895_s1 + $0xcc] sm:$0xf0]  ;;  %v572_v14 = vld [vmem:[%s895_s1 + $0xc4] sm:$0xf]  ;;  %v516_v15 = vld [vmem:[%s895_s1 + $0xd0] sm:$0xf0] }
   0x5   :  { %277 = vmatpush.bf16.msra.mxu1 %v535_v7  ;;  %306 = vmatpush.bf16.msra.mxu2 %v539_v8  ;;  %v515_v16 = vor.u32 %v574_v13, %v514_v11  ;;  %v519_v17 = vor.u32 %v572_v14, %v516_v15  ;;  %v522_v18 = vld [vmem:[%s895_s1 + $0xc8] sm:$0xf]  ;;  %v575_v19 = vld [vmem:[%s895_s1 + $0xd4] sm:$0xf0]  ;;  %v573_v20 = vld [vmem:[%s895_s1 + $0xcc] sm:$0xf] }
   0x6   :  { %335 = vmatpush.bf16.msra.mxu3 %v543_v12  ;;  %v523_v21 = vor.u32 %v575_v19, %v522_v18  ;;  %v524_v22 = vld [vmem:[%s895_s1 + $0xd8] sm:$0xf0]  ;;  %v498_v23 = vld [vmem:[%s895_s1 + $0xa0] sm:$0xf]  ;;  %v570_v24 = vld [vmem:[%s895_s1 + $0xac] sm:$0xf0] }
   0x7   :  { %v527_v25 = vor.u32 %v573_v20, %v524_v22  ;;  %v568_v26 = vld [vmem:[%s895_s1 + $0xa4] sm:$0xf]  ;;  %v500_v27 = vld [vmem:[%s895_s1 + $0xb0] sm:$0xf0]  ;;  %v506_v28 = vld [vmem:[%s895_s1 + $0xa8] sm:$0xf]  ;;  %v499_v29 = vor.u32 %v570_v24, %v498_v23 }
   0x8   :  { %249 = vmatpush.bf16.msra.mxu0 %v515_v16  ;;  %v571_v30 = vld [vmem:[%s895_s1 + $0xb4] sm:$0xf0]  ;;  %v569_v31 = vld [vmem:[%s895_s1 + $0xac] sm:$0xf]  ;;  %v508_v32 = vld [vmem:[%s895_s1 + $0xb8] sm:$0xf0]  ;;  %v503_v33 = vor.u32 %v568_v26, %v500_v27 }
   0x9   :  { %278 = vmatpush.bf16.msra.mxu1 %v519_v17  ;;  %307 = vmatpush.bf16.msra.mxu2 %v523_v21  ;;  %v507_v34 = vor.u32 %v571_v30, %v506_v28  ;;  %v482_v35 = vld [vmem:[%s895_s1 + $0x80] sm:$0xf]  ;;  %v566_v36 = vld [vmem:[%s895_s1 + $0x8c] sm:$0xf0]  ;;  %v564_v37 = vld [vmem:[%s895_s1 + $0x84] sm:$0xf]  ;;  %v511_v38 = vor.u32 %v569_v31, %v508_v32 }
   0xa   :  { %336 = vmatpush.bf16.msra.mxu3 %v527_v25  ;;  %v484_v39 = vld [vmem:[%s895_s1 + $0x90] sm:$0xf0]  ;;  %v490_v40 = vld [vmem:[%s895_s1 + $0x88] sm:$0xf]  ;;  %v567_v41 = vld [vmem:[%s895_s1 + $0x94] sm:$0xf0]  ;;  %v483_v44 = vor.u32 %v566_v36, %v482_v35 }
   0xb   :  { %v565_v42 = vld [vmem:[%s895_s1 + $0x8c] sm:$0xf]  ;;  %v492_v43 = vld [vmem:[%s895_s1 + $0x98] sm:$0xf0]  ;;  %v487_v45 = vor.u32 %v564_v37, %v484_v39  ;;  %v491_v46 = vor.u32 %v567_v41, %v490_v40  ;;  %v466_v47 = vld [vmem:[%s895_s1 + $0x60] sm:$0xf] }
   0xc   :  { %250 = vmatpush.bf16.msra.mxu0 %v499_v29  ;;  %v562_v48 = vld [vmem:[%s895_s1 + $0x6c] sm:$0xf0]  ;;  %v560_v49 = vld [vmem:[%s895_s1 + $0x64] sm:$0xf]  ;;  %v495_v50 = vor.u32 %v565_v42, %v492_v43  ;;  %v468_v51 = vld [vmem:[%s895_s1 + $0x70] sm:$0xf0] }
   0xd   :  { %279 = vmatpush.bf16.msra.mxu1 %v503_v33  ;;  %308 = vmatpush.bf16.msra.mxu2 %v507_v34  ;;  %v474_v52 = vld [vmem:[%s895_s1 + $0x68] sm:$0xf]  ;;  %v563_v53 = vld [vmem:[%s895_s1 + $0x74] sm:$0xf0]  ;;  %v561_v54 = vld [vmem:[%s895_s1 + $0x6c] sm:$0xf]  ;;  %v467_v56 = vor.u32 %v562_v48, %v466_v47  ;;  %v471_v57 = vor.u32 %v560_v49, %v468_v51 }
   0xe   :  { %337 = vmatpush.bf16.msra.mxu3 %v511_v38  ;;  %v476_v55 = vld [vmem:[%s895_s1 + $0x78] sm:$0xf0]  ;;  %v475_v58 = vor.u32 %v563_v53, %v474_v52  ;;  %v450_v59 = vld [vmem:[%s895_s1 + $0x40] sm:$0xf]  ;;  %v558_v60 = vld [vmem:[%s895_s1 + $0x4c] sm:$0xf0] }
   0xf   :  { %v556_v61 = vld [vmem:[%s895_s1 + $0x44] sm:$0xf]  ;;  %v479_v62 = vor.u32 %v561_v54, %v476_v55  ;;  %v452_v63 = vld [vmem:[%s895_s1 + $0x50] sm:$0xf0]  ;;  %v458_v0 = vld [vmem:[%s895_s1 + $0x48] sm:$0xf]  ;;  %v451_v4 = vor.u32 %v558_v60, %v450_v59 }
  0x10   :  { %251 = vmatpush.bf16.msra.mxu0 %v483_v44  ;;  %v559_v1 = vld [vmem:[%s895_s1 + $0x54] sm:$0xf0]  ;;  %v557_v2 = vld [vmem:[%s895_s1 + $0x4c] sm:$0xf]  ;;  %v460_v3 = vld [vmem:[%s895_s1 + $0x58] sm:$0xf0]  ;;  %v455_v5 = vor.u32 %v556_v61, %v452_v63 }
  0x11   :  { %280 = vmatpush.bf16.msra.mxu1 %v487_v45  ;;  %309 = vmatpush.bf16.msra.mxu2 %v491_v46  ;;  %v459_v6 = vor.u32 %v559_v1, %v458_v0  ;;  %v434_v7 = vld [vmem:[%s895_s1 + $0x20] sm:$0xf]  ;;  %v554_v8 = vld [vmem:[%s895_s1 + $0x2c] sm:$0xf0]  ;;  %v552_v9 = vld [vmem:[%s895_s1 + $0x24] sm:$0xf]  ;;  %v463_v10 = vor.u32 %v557_v2, %v460_v3 }
  0x12   :  { %338 = vmatpush.bf16.msra.mxu3 %v495_v50  ;;  %v436_v11 = vld [vmem:[%s895_s1 + $0x30] sm:$0xf0]  ;;  %v442_v12 = vld [vmem:[%s895_s1 + $0x28] sm:$0xf]  ;;  %v555_v13 = vld [vmem:[%s895_s1 + $0x34] sm:$0xf0]  ;;  %v435_v16 = vor.u32 %v554_v8, %v434_v7 }
  0x13   :  { %v553_v14 = vld [vmem:[%s895_s1 + $0x2c] sm:$0xf]  ;;  %v444_v15 = vld [vmem:[%s895_s1 + $0x38] sm:$0xf0]  ;;  %v439_v17 = vor.u32 %v552_v9, %v436_v11  ;;  %v443_v18 = vor.u32 %v555_v13, %v442_v12  ;;  %v418_v19 = vld [vmem:[%s895_s1] sm:$0xf] }
  0x14   :  { %252 = vmatpush.bf16.msra.mxu0 %v467_v56  ;;  %v550_v20 = vld [vmem:[%s895_s1 + $0xc] sm:$0xf0]  ;;  %v548_v21 = vld [vmem:[%s895_s1 + $0x4] sm:$0xf]  ;;  %v447_v22 = vor.u32 %v553_v14, %v444_v15  ;;  %v420_v23 = vld [vmem:[%s895_s1 + $0x10] sm:$0xf0] }
  0x15   :  { %281 = vmatpush.bf16.msra.mxu1 %v471_v57  ;;  %310 = vmatpush.bf16.msra.mxu2 %v475_v58  ;;  %v426_v24 = vld [vmem:[%s895_s1 + $0x8] sm:$0xf]  ;;  %v551_v25 = vld [vmem:[%s895_s1 + $0x14] sm:$0xf0]  ;;  %v549_v26 = vld [vmem:[%s895_s1 + $0xc] sm:$0xf]  ;;  %v419_v28 = vor.u32 %v550_v20, %v418_v19  ;;  %v423_v29 = vor.u32 %v548_v21, %v420_v23 }
  0x16   :  { %339 = vmatpush.bf16.msra.mxu3 %v479_v62  ;;  %v428_v27 = vld [vmem:[%s895_s1 + $0x18] sm:$0xf0]  ;;  %v427_v30 = vor.u32 %v551_v25, %v426_v24  ;;  %v544_v32 = vld [vmem:[%s896_s0] sm:$0xff]  ;;  %v545_v33 = vld [vmem:[%s896_s0 + $0x8] sm:$0xff] }
  0x17   :  { %v431_v31 = vor.u32 %v549_v26, %v428_v27  ;;  %v546_v34 = vld [vmem:[%s896_s0 + $0x10] sm:$0xff]  ;;  %v547_v35 = vld [vmem:[%s896_s0 + $0x18] sm:$0xff]  ;;  %v54_v36 = vld [vmem:[%s897_s2] sm:$0xf] }
  0x18   :  { %253 = vmatpush.bf16.msra.mxu0 %v451_v4  ;;  %v807_v37 = vperm.slane %v54_v36, 0  ;;  %v809_v38 = vperm.slane %v54_v36, 1  ;;  %v813_v44 = vperm.slane %v54_v36, 2  ;;  %v815_v45 = vperm.slane %v54_v36, 3 }
  0x19   :  { %282 = vmatpush.bf16.msra.mxu1 %v455_v5  ;;  %311 = vmatpush.bf16.msra.mxu2 %v459_v6 }
  0x1a   :  { %340 = vmatpush.bf16.msra.mxu3 %v463_v10 }
  0x1c   :  { %254 = vmatpush.bf16.msra.mxu0 %v435_v16 }
  0x1d   :  { %283 = vmatpush.bf16.msra.mxu1 %v439_v17  ;;  %312 = vmatpush.bf16.msra.mxu2 %v443_v18 }
  0x1e   :  { %341 = vmatpush.bf16.msra.mxu3 %v447_v22 }
  0x20   :  { %255 = vmatpush.bf16.msra.mxu0 %v419_v28 }
  0x21   :  { %284 = vmatpush.bf16.msra.mxu1 %v423_v29  ;;  %313 = vmatpush.bf16.msra.mxu2 %v427_v30 }
  0x22   :  { %342 = vmatpush.bf16.msra.mxu3 %v431_v31 }
  0x23   :  { %256 = vmatmul.bf16.vlgmr.msra.gmra.mxu0 %v544_v32 }
  0x24   :  { %285 = vmatmul.bf16.vlgmr.msra.gmra.mxu1 %v544_v32  ;;  %314 = vmatmul.bf16.vlgmr.msra.gmra.mxu2 %v544_v32 }
  0x25   :  { %343 = vmatmul.bf16.vlgmr.msra.gmra.mxu3 %v544_v32 }
  0x33   :  { %261 = vmatmul.bf16.gmra.mxu0 %v545_v33 }
  0x34   :  { %290 = vmatmul.bf16.gmra.mxu1 %v545_v33  ;;  %319 = vmatmul.bf16.gmra.mxu2 %v545_v33 }
  0x35   :  { %348 = vmatmul.bf16.gmra.mxu3 %v545_v33 }
  0x43   :  { %266 = vmatmul.bf16.gmra.mxu0 %v546_v34 }
  0x44   :  { %295 = vmatmul.bf16.gmra.mxu1 %v546_v34  ;;  %324 = vmatmul.bf16.gmra.mxu2 %v546_v34 }
  0x45   :  { %353 = vmatmul.bf16.gmra.mxu3 %v546_v34 }
  0x53   :  { %271 = vmatmul.bf16.gmra.mxu0 %v547_v35 }
  0x54   :  { %300 = vmatmul.bf16.gmra.mxu1 %v547_v35  ;;  %329 = vmatmul.bf16.gmra.mxu2 %v547_v35 }
  0x55   :  { %358 = vmatmul.bf16.gmra.mxu3 %v547_v35 }
  0xa0   :  { %v257_v39 = vpop.f32.mrf.mxu0 }
  0xa1   :  { %v258_v40 = vadd.f32 %v257_v39, %v807_v37  ;;  %v286_v41 = vpop.f32.mrf.mxu1 }
  0xa2   :  { %v287_v42 = vadd.f32 %v286_v41, %v809_v38 }
  0xa4   :  { %v364_v43 = vpack.c.bf16 %v287_v42, %v258_v40 }
  0xa6   :  { %380 = vst [vmem:[%s898_s3] sm:$0xff] %v364_v43 }
  0xa7   :  { %v315_v46 = vpop.f32.mrf.mxu2 }
  0xa8   :  { %v316_v47 = vadd.f32 %v315_v46, %v813_v44  ;;  %v344_v48 = vpop.f32.mrf.mxu3  ;;  %v259_v49 = vpop.f32.mrf.mxu0 }
  0xa9   :  { %v345_v50 = vadd.f32 %v344_v48, %v815_v45  ;;  %v260_v51 = vadd.f32 %v259_v49, %v807_v37  ;;  %v288_v52 = vpop.f32.mrf.mxu1 }
  0xaa   :  { %v289_v53 = vadd.f32 %v288_v52, %v809_v38 }
  0xab   :  { %v365_v54 = vpack.c.bf16 %v345_v50, %v316_v47 }
  0xac   :  { %v366_v55 = vpack.c.bf16 %v289_v53, %v260_v51 }
  0xad   :  { %381 = vst [vmem:[%s898_s3 + $0x8] sm:$0xff] %v365_v54 }
  0xae   :  { %382 = vst [vmem:[%s898_s3 + $0x10] sm:$0xff] %v366_v55 }
  0xaf   :  { %v317_v56 = vpop.f32.mrf.mxu2 }
  0xb0   :  { %v318_v57 = vadd.f32 %v317_v56, %v813_v44  ;;  %v346_v58 = vpop.f32.mrf.mxu3  ;;  %v262_v59 = vpop.f32.mrf.mxu0 }
  0xb1   :  { %v347_v60 = vadd.f32 %v346_v58, %v815_v45  ;;  %v263_v61 = vadd.f32 %v262_v59, %v807_v37  ;;  %v291_v62 = vpop.f32.mrf.mxu1 }
  0xb2   :  { %v292_v63 = vadd.f32 %v291_v62, %v809_v38 }
  0xb3   :  { %v367_v0 = vpack.c.bf16 %v347_v60, %v318_v57 }
  0xb4   :  { %v368_v1 = vpack.c.bf16 %v292_v63, %v263_v61 }
  0xb5   :  { %383 = vst [vmem:[%s898_s3 + $0x18] sm:$0xff] %v367_v0 }
  0xb6   :  { %384 = vst [vmem:[%s898_s3 + $0x20] sm:$0xff] %v368_v1 }
  0xb7   :  { %v320_v2 = vpop.f32.mrf.mxu2 }
  0xb8   :  { %v321_v3 = vadd.f32 %v320_v2, %v813_v44  ;;  %v349_v4 = vpop.f32.mrf.mxu3  ;;  %v264_v5 = vpop.f32.mrf.mxu0 }
  0xb9   :  { %v350_v6 = vadd.f32 %v349_v4, %v815_v45  ;;  %v265_v7 = vadd.f32 %v264_v5, %v807_v37  ;;  %v293_v8 = vpop.f32.mrf.mxu1 }
  0xba   :  { %v294_v9 = vadd.f32 %v293_v8, %v809_v38 }
  0xbb   :  { %v369_v10 = vpack.c.bf16 %v350_v6, %v321_v3 }
  0xbc   :  { %v370_v11 = vpack.c.bf16 %v294_v9, %v265_v7 }
  0xbd   :  { %385 = vst [vmem:[%s898_s3 + $0x28] sm:$0xff] %v369_v10 }
  0xbe   :  { %386 = vst [vmem:[%s898_s3 + $0x30] sm:$0xff] %v370_v11 }
  0xbf   :  { %v322_v12 = vpop.f32.mrf.mxu2 }
  0xc0   :  { %v323_v13 = vadd.f32 %v322_v12, %v813_v44  ;;  %v351_v14 = vpop.f32.mrf.mxu3  ;;  %v267_v15 = vpop.f32.mrf.mxu0 }
  0xc1   :  { %v352_v16 = vadd.f32 %v351_v14, %v815_v45  ;;  %v268_v17 = vadd.f32 %v267_v15, %v807_v37  ;;  %v296_v18 = vpop.f32.mrf.mxu1 }
  0xc2   :  { %v297_v19 = vadd.f32 %v296_v18, %v809_v38 }
  0xc3   :  { %v371_v20 = vpack.c.bf16 %v352_v16, %v323_v13 }
  0xc4   :  { %v372_v21 = vpack.c.bf16 %v297_v19, %v268_v17 }
  0xc5   :  { %387 = vst [vmem:[%s898_s3 + $0x38] sm:$0xff] %v371_v20 }
  0xc6   :  { %388 = vst [vmem:[%s898_s3 + $0x40] sm:$0xff] %v372_v21 }
  0xc7   :  { %v325_v22 = vpop.f32.mrf.mxu2 }
  0xc8   :  { %v326_v23 = vadd.f32 %v325_v22, %v813_v44  ;;  %v354_v24 = vpop.f32.mrf.mxu3  ;;  %v269_v25 = vpop.f32.mrf.mxu0 }
  0xc9   :  { %v355_v26 = vadd.f32 %v354_v24, %v815_v45  ;;  %v270_v27 = vadd.f32 %v269_v25, %v807_v37  ;;  %v298_v28 = vpop.f32.mrf.mxu1 }
  0xca   :  { %v299_v29 = vadd.f32 %v298_v28, %v809_v38 }
  0xcb   :  { %v373_v30 = vpack.c.bf16 %v355_v26, %v326_v23 }
  0xcc   :  { %v374_v31 = vpack.c.bf16 %v299_v29, %v270_v27 }
  0xcd   :  { %389 = vst [vmem:[%s898_s3 + $0x48] sm:$0xff] %v373_v30 }
  0xce   :  { %390 = vst [vmem:[%s898_s3 + $0x50] sm:$0xff] %v374_v31 }
  0xcf   :  { %v327_v32 = vpop.f32.mrf.mxu2 }
  0xd0   :  { %v328_v33 = vadd.f32 %v327_v32, %v813_v44  ;;  %v356_v34 = vpop.f32.mrf.mxu3  ;;  %v272_v35 = vpop.f32.mrf.mxu0 }
  0xd1   :  { %v357_v36 = vadd.f32 %v356_v34, %v815_v45  ;;  %v273_v39 = vadd.f32 %v272_v35, %v807_v37  ;;  %v301_v40 = vpop.f32.mrf.mxu1 }
  0xd2   :  { %v302_v41 = vadd.f32 %v301_v40, %v809_v38 }
  0xd3   :  { %v375_v42 = vpack.c.bf16 %v357_v36, %v328_v33 }
  0xd4   :  { %v376_v43 = vpack.c.bf16 %v302_v41, %v273_v39 }
  0xd5   :  { %391 = vst [vmem:[%s898_s3 + $0x58] sm:$0xff] %v375_v42 }
  0xd6   :  { %392 = vst [vmem:[%s898_s3 + $0x60] sm:$0xff] %v376_v43 }
  0xd7   :  { %v330_v46 = vpop.f32.mrf.mxu2 }
  0xd8   :  { %v331_v47 = vadd.f32 %v330_v46, %v813_v44  ;;  %v359_v48 = vpop.f32.mrf.mxu3  ;;  %v274_v49 = vpop.f32.mrf.mxu0 }
  0xd9   :  { %v360_v50 = vadd.f32 %v359_v48, %v815_v45  ;;  %v275_v51 = vadd.f32 %v274_v49, %v807_v37  ;;  %v303_v52 = vpop.f32.mrf.mxu1 }
  0xda   :  { %v304_v53 = vadd.f32 %v303_v52, %v809_v38 }
  0xdb   :  { %v377_v54 = vpack.c.bf16 %v360_v50, %v331_v47 }
  0xdc   :  { %v378_v55 = vpack.c.bf16 %v304_v53, %v275_v51 }
  0xdd   :  { %393 = vst [vmem:[%s898_s3 + $0x68] sm:$0xff] %v377_v54 }
  0xde   :  { %394 = vst [vmem:[%s898_s3 + $0x70] sm:$0xff] %v378_v55 }
  0xdf   :  { %v332_v56 = vpop.f32.mrf.mxu2 }
  0xe0   :  { %v333_v57 = vadd.f32 %v332_v56, %v813_v44  ;;  %v361_v58 = vpop.f32.mrf.mxu3 }
  0xe1   :  { %v362_v59 = vadd.f32 %v361_v58, %v815_v45 }
  0xe3   :  { %v379_v37 = vpack.c.bf16 %v362_v59, %v333_v57 }
  0xe5   :  { %395 = vst [vmem:[%s898_s3 + $0x78] sm:$0xff] %v379_v37 }

// kernel: lstm_decoder_forward.9
= control target key start
LH: loop header
LB: loop body
LE: loop exit
PB: predicated region body
PF: predicated region fallthrough
CT: control target
= control target key end

     0   :  { %s323_s1 = inlined_call_operand.vmem [shape: bf16[128,128], index: 1, kind: input, shape index: {}]   ;;  %s324_s2 = inlined_call_operand.vmem [shape: f32[1,128], index: 2, kind: input, shape index: {}]   ;;  %s325_s0 = inlined_call_operand.vmem [shape: bf16[64,128], index: 0, kind: input, shape index: {}]   ;;  %s326_s3 = inlined_call_operand.vmem [shape: f32[64,128], index: 3, kind: output, shape index: {}]  }
   0x1   :  { %v214_v0 = vld [vmem:[%s323_s1 + $0x38] sm:$0xff]  ;;  %v213_v1 = vld [vmem:[%s323_s1 + $0x30] sm:$0xff]  ;;  %v212_v2 = vld [vmem:[%s323_s1 + $0x28] sm:$0xff] }
   0x2   :  { %114 = vmatpush.bf16.msra.mxu0 %v214_v0  ;;  %215 = vmatpush.bf16.msra.mxu1 %v214_v0  ;;  %v211_v3 = vld [vmem:[%s323_s1 + $0x20] sm:$0xff]  ;;  %v210_v4 = vld [vmem:[%s323_s1 + $0x18] sm:$0xff]  ;;  %v209_v5 = vld [vmem:[%s323_s1 + $0x10] sm:$0xff] }
   0x3   :  { %216 = vmatpush.bf16.msra.mxu2 %v214_v0  ;;  %217 = vmatpush.bf16.msra.mxu3 %v214_v0  ;;  %v208_v6 = vld [vmem:[%s323_s1 + $0x8] sm:$0xff]  ;;  %v207_v7 = vld [vmem:[%s323_s1] sm:$0xff]  ;;  %v205_v10 = vld [vmem:[%s325_s0 + $0x10] sm:$0xff] }
   0x4   :  { %v203_v8 = vld [vmem:[%s325_s0] sm:$0xff]  ;;  %v204_v9 = vld [vmem:[%s325_s0 + $0x8] sm:$0xff]  ;;  %v206_v11 = vld [vmem:[%s325_s0 + $0x18] sm:$0xff] }
   0x5   :  { %v239_v12 = vld [vmem:[%s324_s2] ss:$0 sm:$0xff] }
   0x6   :  { %115 = vmatpush.bf16.msra.mxu0 %v213_v1  ;;  %218 = vmatpush.bf16.msra.mxu1 %v213_v1 }
   0x7   :  { %219 = vmatpush.bf16.msra.mxu2 %v213_v1  ;;  %220 = vmatpush.bf16.msra.mxu3 %v213_v1 }
   0xa   :  { %116 = vmatpush.bf16.msra.mxu0 %v212_v2  ;;  %221 = vmatpush.bf16.msra.mxu1 %v212_v2 }
   0xb   :  { %222 = vmatpush.bf16.msra.mxu2 %v212_v2  ;;  %223 = vmatpush.bf16.msra.mxu3 %v212_v2 }
   0xe   :  { %117 = vmatpush.bf16.msra.mxu0 %v211_v3  ;;  %224 = vmatpush.bf16.msra.mxu1 %v211_v3 }
   0xf   :  { %225 = vmatpush.bf16.msra.mxu2 %v211_v3  ;;  %226 = vmatpush.bf16.msra.mxu3 %v211_v3 }
  0x12   :  { %118 = vmatpush.bf16.msra.mxu0 %v210_v4  ;;  %227 = vmatpush.bf16.msra.mxu1 %v210_v4 }
  0x13   :  { %228 = vmatpush.bf16.msra.mxu2 %v210_v4  ;;  %229 = vmatpush.bf16.msra.mxu3 %v210_v4 }
  0x16   :  { %119 = vmatpush.bf16.msra.mxu0 %v209_v5  ;;  %230 = vmatpush.bf16.msra.mxu1 %v209_v5 }
  0x17   :  { %231 = vmatpush.bf16.msra.mxu2 %v209_v5  ;;  %232 = vmatpush.bf16.msra.mxu3 %v209_v5 }
  0x1a   :  { %120 = vmatpush.bf16.msra.mxu0 %v208_v6  ;;  %233 = vmatpush.bf16.msra.mxu1 %v208_v6 }
  0x1b   :  { %234 = vmatpush.bf16.msra.mxu2 %v208_v6  ;;  %235 = vmatpush.bf16.msra.mxu3 %v208_v6 }
  0x1e   :  { %121 = vmatpush.bf16.msra.mxu0 %v207_v7  ;;  %236 = vmatpush.bf16.msra.mxu1 %v207_v7 }
  0x1f   :  { %237 = vmatpush.bf16.msra.mxu2 %v207_v7  ;;  %238 = vmatpush.bf16.msra.mxu3 %v207_v7 }
  0x21   :  { %122 = vmatmul.bf16.vlgmr.msra.gmra.mxu0 %v203_v8  ;;  %127 = vmatmul.bf16.vlgmr.msra.gmra.mxu1 %v204_v9 }
  0x22   :  { %132 = vmatmul.bf16.vlgmr.msra.gmra.mxu2 %v205_v10  ;;  %137 = vmatmul.bf16.vlgmr.msra.gmra.mxu3 %v206_v11 }
  0x9e   :  { %v123_v13 = vpop.f32.mrf.mxu0  ;;  %v128_v14 = vpop.f32.mrf.mxu1 }
  0x9f   :  { %v124_v15 = vadd.f32 %v239_v12, %v123_v13  ;;  %v129_v16 = vadd.f32 %v239_v12, %v128_v14 }
  0xa1   :  { %143 = vst [vmem:[%s326_s3] sm:$0xff] %v124_v15 }
  0xa2   :  { %145 = vst [vmem:[%s326_s3 + $0x10] sm:$0xff] %v129_v16 }
  0xa5   :  { %v133_v17 = vpop.f32.mrf.mxu2  ;;  %v138_v18 = vpop.f32.mrf.mxu3 }
  0xa6   :  { %v134_v19 = vadd.f32 %v239_v12, %v133_v17  ;;  %v139_v20 = vadd.f32 %v239_v12, %v138_v18  ;;  %v125_v21 = vpop.f32.mrf.mxu0  ;;  %v130_v22 = vpop.f32.mrf.mxu1 }
  0xa7   :  { %v126_v23 = vadd.f32 %v239_v12, %v125_v21  ;;  %v131_v24 = vadd.f32 %v239_v12, %v130_v22 }
  0xa8   :  { %147 = vst [vmem:[%s326_s3 + $0x20] sm:$0xff] %v134_v19 }
  0xa9   :  { %149 = vst [vmem:[%s326_s3 + $0x30] sm:$0xff] %v139_v20 }
  0xaa   :  { %144 = vst [vmem:[%s326_s3 + $0x8] sm:$0xff] %v126_v23 }
  0xab   :  { %146 = vst [vmem:[%s326_s3 + $0x18] sm:$0xff] %v131_v24 }
  0xad   :  { %v135_v25 = vpop.f32.mrf.mxu2  ;;  %v140_v26 = vpop.f32.mrf.mxu3 }
  0xae   :  { %v136_v27 = vadd.f32 %v239_v12, %v135_v25  ;;  %v141_v28 = vadd.f32 %v239_v12, %v140_v26 }
  0xb0   :  { %148 = vst [vmem:[%s326_s3 + $0x28] sm:$0xff] %v136_v27 }
  0xb1   :  { %150 = vst [vmem:[%s326_s3 + $0x38] sm:$0xff] %v141_v28 }

// kernel: lstm_decoder_forward.6
= control target key start
LH: loop header
LB: loop body
LE: loop exit
PB: predicated region body
PF: predicated region fallthrough
CT: control target
= control target key end

     0   :  { %s2294_s1 = inlined_call_operand.vmem [shape: bf16[128,512], index: 1, kind: input, shape index: {}]   ;;  %s2295_s2 = inlined_call_operand.vmem [shape: f32[8,128], index: 2, kind: input, shape index: {}]   ;;  %s2296_s0 = inlined_call_operand.vmem [shape: bf16[8,8,512], index: 0, kind: input, shape index: {}]   ;;  %s2297_s3 = inlined_call_operand.vmem [shape: f32[8,128], index: 3, kind: input, shape index: {}]   ;;  %s2298_s4 = inlined_call_operand.vmem [shape: bf16[8,8,128], index: 4, kind: output, shape index: {0}]   ;;  %s2299_s6 = inlined_call_operand.vmem [shape: f32[8,128], index: 6, kind: output, shape index: {2}]   ;;  %s2300_s5 = inlined_call_operand.vmem [shape: f32[8,128], index: 5, kind: output, shape index: {1}]  }
   0x1   :  { %v1416_v0 = vld [vmem:[%s2294_s1 + $0xe0] sm:$0xf]  ;;  %v1505_v1 = vld [vmem:[%s2294_s1 + $0xec] sm:$0xf0]  ;;  %v1503_v2 = vld [vmem:[%s2294_s1 + $0xe4] sm:$0xf] }
   0x2   :  { %v1679_v3 = vor.u32 %v1505_v1, %v1416_v0  ;;  %v1418_v4 = vld [vmem:[%s2294_s1 + $0xf0] sm:$0xf0]  ;;  %v1504_v5 = vld [vmem:[%s2294_s1 + $0xec] sm:$0xf]  ;;  %v1426_v6 = vld [vmem:[%s2294_s1 + $0xf8] sm:$0xf0] }
   0x3   :  { %v1690_v7 = vor.u32 %v1503_v2, %v1418_v4  ;;  %v1692_v8 = vor.u32 %v1504_v5, %v1426_v6  ;;  %v1400_v9 = vld [vmem:[%s2294_s1 + $0xc0] sm:$0xf]  ;;  %v1501_v10 = vld [vmem:[%s2294_s1 + $0xcc] sm:$0xf0]  ;;  %v1499_v11 = vld [vmem:[%s2294_s1 + $0xc4] sm:$0xf] }
   0x4   :  { %229 = vmatpush.bf16.msra.mxu0 %v1679_v3  ;;  %v1704_v12 = vor.u32 %v1501_v10, %v1400_v9  ;;  %v1402_v13 = vld [vmem:[%s2294_s1 + $0xd0] sm:$0xf0]  ;;  %v1500_v14 = vld [vmem:[%s2294_s1 + $0xcc] sm:$0xf]  ;;  %v1410_v15 = vld [vmem:[%s2294_s1 + $0xd8] sm:$0xf0] }
   0x5   :  { %242 = vmatpush.bf16.msra.mxu1 %v1690_v7  ;;  %268 = vmatpush.bf16.msra.mxu3 %v1692_v8  ;;  %v1717_v16 = vor.u32 %v1499_v11, %v1402_v13  ;;  %v1719_v17 = vor.u32 %v1500_v14, %v1410_v15  ;;  %v1424_v18 = vld [vmem:[%s2294_s1 + $0xe8] sm:$0xf]  ;;  %v1506_v19 = vld [vmem:[%s2294_s1 + $0xf4] sm:$0xf0]  ;;  %v1384_v20 = vld [vmem:[%s2294_s1 + $0xa0] sm:$0xf] }
   0x6   :  { %v1730_v21 = vor.u32 %v1506_v19, %v1424_v18  ;;  %v1497_v22 = vld [vmem:[%s2294_s1 + $0xac] sm:$0xf0]  ;;  %v1495_v23 = vld [vmem:[%s2294_s1 + $0xa4] sm:$0xf]  ;;  %v1386_v24 = vld [vmem:[%s2294_s1 + $0xb0] sm:$0xf0] }
   0x7   :  { %v1496_v25 = vld [vmem:[%s2294_s1 + $0xac] sm:$0xf]  ;;  %v1394_v26 = vld [vmem:[%s2294_s1 + $0xb8] sm:$0xf0]  ;;  %v1408_v27 = vld [vmem:[%s2294_s1 + $0xc8] sm:$0xf]  ;;  %v1752_v28 = vor.u32 %v1497_v22, %v1384_v20  ;;  %v1765_v32 = vor.u32 %v1495_v23, %v1386_v24 }
   0x8   :  { %230 = vmatpush.bf16.msra.mxu0 %v1704_v12  ;;  %255 = vmatpush.bf16.msra.mxu2 %v1730_v21  ;;  %v1502_v29 = vld [vmem:[%s2294_s1 + $0xd4] sm:$0xf0]  ;;  %v1368_v30 = vld [vmem:[%s2294_s1 + $0x80] sm:$0xf]  ;;  %v1493_v31 = vld [vmem:[%s2294_s1 + $0x8c] sm:$0xf0]  ;;  %v1767_v33 = vor.u32 %v1496_v25, %v1394_v26 }
   0x9   :  { %243 = vmatpush.bf16.msra.mxu1 %v1717_v16  ;;  %269 = vmatpush.bf16.msra.mxu3 %v1719_v17  ;;  %v1769_v34 = vor.u32 %v1502_v29, %v1408_v27  ;;  %v1491_v35 = vld [vmem:[%s2294_s1 + $0x84] sm:$0xf]  ;;  %v1370_v36 = vld [vmem:[%s2294_s1 + $0x90] sm:$0xf0]  ;;  %v1492_v37 = vld [vmem:[%s2294_s1 + $0x8c] sm:$0xf]  ;;  %v1791_v41 = vor.u32 %v1493_v31, %v1368_v30 }
   0xa   :  { %v1378_v38 = vld [vmem:[%s2294_s1 + $0x98] sm:$0xf0]  ;;  %v1392_v39 = vld [vmem:[%s2294_s1 + $0xa8] sm:$0xf]  ;;  %v1498_v40 = vld [vmem:[%s2294_s1 + $0xb4] sm:$0xf0]  ;;  %v1803_v45 = vor.u32 %v1491_v35, %v1370_v36 }
   0xb   :  { %v1793_v42 = vor.u32 %v1498_v40, %v1392_v39  ;;  %v1352_v43 = vld [vmem:[%s2294_s1 + $0x60] sm:$0xf]  ;;  %v1489_v44 = vld [vmem:[%s2294_s1 + $0x6c] sm:$0xf0]  ;;  %v1805_v46 = vor.u32 %v1492_v37, %v1378_v38  ;;  %v1487_v47 = vld [vmem:[%s2294_s1 + $0x64] sm:$0xf] }
   0xc   :  { %231 = vmatpush.bf16.msra.mxu0 %v1752_v28  ;;  %256 = vmatpush.bf16.msra.mxu2 %v1769_v34  ;;  %v1376_v48 = vld [vmem:[%s2294_s1 + $0x88] sm:$0xf]  ;;  %v1494_v49 = vld [vmem:[%s2294_s1 + $0x94] sm:$0xf0]  ;;  %v1354_v50 = vld [vmem:[%s2294_s1 + $0x70] sm:$0xf0]  ;;  %v1827_v53 = vor.u32 %v1489_v44, %v1352_v43 }
   0xd   :  { %244 = vmatpush.bf16.msra.mxu1 %v1765_v32  ;;  %270 = vmatpush.bf16.msra.mxu3 %v1767_v33  ;;  %v1488_v51 = vld [vmem:[%s2294_s1 + $0x6c] sm:$0xf]  ;;  %v1362_v52 = vld [vmem:[%s2294_s1 + $0x78] sm:$0xf0]  ;;  %v1829_v54 = vor.u32 %v1494_v49, %v1376_v48  ;;  %v1336_v55 = vld [vmem:[%s2294_s1 + $0x40] sm:$0xf]  ;;  %v1839_v57 = vor.u32 %v1487_v47, %v1354_v50 }
   0xe   :  { %v1485_v56 = vld [vmem:[%s2294_s1 + $0x4c] sm:$0xf0]  ;;  %v1841_v58 = vor.u32 %v1488_v51, %v1362_v52  ;;  %v1483_v59 = vld [vmem:[%s2294_s1 + $0x44] sm:$0xf]  ;;  %v1360_v60 = vld [vmem:[%s2294_s1 + $0x68] sm:$0xf] }
   0xf   :  { %v1490_v61 = vld [vmem:[%s2294_s1 + $0x74] sm:$0xf0]  ;;  %v1338_v62 = vld [vmem:[%s2294_s1 + $0x50] sm:$0xf0]  ;;  %v1484_v63 = vld [vmem:[%s2294_s1 + $0x4c] sm:$0xf]  ;;  %v1863_v1 = vor.u32 %v1485_v56, %v1336_v55 }
  0x10   :  { %232 = vmatpush.bf16.msra.mxu0 %v1791_v41  ;;  %257 = vmatpush.bf16.msra.mxu2 %v1793_v42  ;;  %v1346_v0 = vld [vmem:[%s2294_s1 + $0x58] sm:$0xf0]  ;;  %v1865_v2 = vor.u32 %v1490_v61, %v1360_v60  ;;  %v1320_v4 = vld [vmem:[%s2294_s1 + $0x20] sm:$0xf]  ;;  %v1481_v5 = vld [vmem:[%s2294_s1 + $0x2c] sm:$0xf0]  ;;  %v1875_v6 = vor.u32 %v1483_v59, %v1338_v62 }
  0x11   :  { %245 = vmatpush.bf16.msra.mxu1 %v1803_v45  ;;  %271 = vmatpush.bf16.msra.mxu3 %v1805_v46  ;;  %v1877_v9 = vor.u32 %v1484_v63, %v1346_v0  ;;  %v1479_v10 = vld [vmem:[%s2294_s1 + $0x24] sm:$0xf]  ;;  %v1344_v11 = vld [vmem:[%s2294_s1 + $0x48] sm:$0xf]  ;;  %v1486_v13 = vld [vmem:[%s2294_s1 + $0x54] sm:$0xf0]  ;;  %v1899_v19 = vor.u32 %v1481_v5, %v1320_v4 }
  0x12   :  { %v1322_v14 = vld [vmem:[%s2294_s1 + $0x30] sm:$0xf0]  ;;  %v1480_v15 = vld [vmem:[%s2294_s1 + $0x2c] sm:$0xf]  ;;  %v1330_v18 = vld [vmem:[%s2294_s1 + $0x38] sm:$0xf0]  ;;  %v1901_v20 = vor.u32 %v1486_v13, %v1344_v11 }
  0x13   :  { %v1304_v22 = vld [vmem:[%s2294_s1] sm:$0xf]  ;;  %v1477_v23 = vld [vmem:[%s2294_s1 + $0xc] sm:$0xf0]  ;;  %v1911_v24 = vor.u32 %v1479_v10, %v1322_v14  ;;  %v1913_v25 = vor.u32 %v1480_v15, %v1330_v18  ;;  %v1475_v26 = vld [vmem:[%s2294_s1 + $0x4] sm:$0xf] }
  0x14   :  { %233 = vmatpush.bf16.msra.mxu0 %v1827_v53  ;;  %258 = vmatpush.bf16.msra.mxu2 %v1829_v54  ;;  %v1328_v27 = vld [vmem:[%s2294_s1 + $0x28] sm:$0xf]  ;;  %v1482_v29 = vld [vmem:[%s2294_s1 + $0x34] sm:$0xf0]  ;;  %v1306_v30 = vld [vmem:[%s2294_s1 + $0x10] sm:$0xf0]  ;;  %v1935_v36 = vor.u32 %v1477_v23, %v1304_v22 }
  0x15   :  { %246 = vmatpush.bf16.msra.mxu1 %v1839_v57  ;;  %272 = vmatpush.bf16.msra.mxu3 %v1841_v58  ;;  %v1476_v31 = vld [vmem:[%s2294_s1 + $0xc] sm:$0xf]  ;;  %v1314_v35 = vld [vmem:[%s2294_s1 + $0x18] sm:$0xf0]  ;;  %v24_v37 = vld [vmem:[%s2295_s2] sm:$0xff]  ;;  %v1940_v38 = vor.u32 %v1482_v29, %v1328_v27  ;;  %v1944_v39 = vor.u32 %v1475_v26, %v1306_v30 }
  0x16   :  { %v1946_v40 = vor.u32 %v1476_v31, %v1314_v35  ;;  %v1312_v43 = vld [vmem:[%s2294_s1 + $0x8] sm:$0xf]  ;;  %v1478_v44 = vld [vmem:[%s2294_s1 + $0x14] sm:$0xf0]  ;;  %v68_v47 = vpack.c.bf16 %v24_v37, %v24_v37  ;;  %v62_v49 = vld [vmem:[%s2296_s0] sm:$0xff] }
  0x17   :  { %v1958_v48 = vor.u32 %v1478_v44, %v1312_v43  ;;  %v64_v50 = vunpack.c.l.bf16 %v62_v49  ;;  %v65_v51 = vunpack.c.h.bf16 %v62_v49  ;;  %v63_v59 = vld [vmem:[%s2296_s0 + $0x8] sm:$0xff] }
  0x18   :  { %234 = vmatpush.bf16.msra.mxu0 %v1863_v1  ;;  %259 = vmatpush.bf16.msra.mxu2 %v1865_v2  ;;  %v67_v63 = vunpack.c.h.bf16 %v63_v59  ;;  %v66_v23 = vunpack.c.l.bf16 %v63_v59 }
  0x19   :  { %247 = vmatpush.bf16.msra.mxu1 %v1875_v6  ;;  %273 = vmatpush.bf16.msra.mxu3 %v1877_v9 }
  0x1c   :  { %235 = vmatpush.bf16.msra.mxu0 %v1899_v19  ;;  %260 = vmatpush.bf16.msra.mxu2 %v1901_v20 }
  0x1d   :  { %248 = vmatpush.bf16.msra.mxu1 %v1911_v24  ;;  %274 = vmatpush.bf16.msra.mxu3 %v1913_v25 }
  0x20   :  { %236 = vmatpush.bf16.msra.mxu0 %v1935_v36  ;;  %261 = vmatpush.bf16.msra.mxu2 %v1940_v38 }
  0x21   :  { %249 = vmatpush.bf16.msra.mxu1 %v1944_v39  ;;  %275 = vmatpush.bf16.msra.mxu3 %v1946_v40 }
  0x23   :  { %237 = vmatmul.bf16.vlgmr.msra.gmra.mxu0 %v68_v47 }
  0x24   :  { %362 = vmatpush.bf16.msrb.mxu0 %v1679_v3  ;;  %250 = vmatmul.bf16.vlgmr.msra.gmra.mxu1 %v68_v47 }
  0x25   :  { %375 = vmatpush.bf16.msrb.mxu1 %v1690_v7  ;;  %401 = vmatpush.bf16.msrb.mxu3 %v1692_v8 }
  0x26   :  { %276 = vmatmul.bf16.vlgmr.msra.gmra.mxu3 %v68_v47  ;;  %262 = vmatpush.bf16.msra.mxu2 %v1958_v48 }
  0x28   :  { %363 = vmatpush.bf16.msrb.mxu0 %v1704_v12 }
  0x29   :  { %376 = vmatpush.bf16.msrb.mxu1 %v1717_v16  ;;  %402 = vmatpush.bf16.msrb.mxu3 %v1719_v17 }
  0x2a   :  { %388 = vmatpush.bf16.msrb.mxu2 %v1730_v21 }
  0x2b   :  { %263 = vmatmul.bf16.vlgmr.msra.gmra.mxu2 %v68_v47 }
  0x2c   :  { %364 = vmatpush.bf16.msrb.mxu0 %v1752_v28 }
  0x2d   :  { %377 = vmatpush.bf16.msrb.mxu1 %v1765_v32  ;;  %403 = vmatpush.bf16.msrb.mxu3 %v1767_v33 }
  0x2e   :  { %389 = vmatpush.bf16.msrb.mxu2 %v1769_v34 }
  0x30   :  { %365 = vmatpush.bf16.msrb.mxu0 %v1791_v41 }
  0x31   :  { %378 = vmatpush.bf16.msrb.mxu1 %v1803_v45  ;;  %404 = vmatpush.bf16.msrb.mxu3 %v1805_v46 }
  0x32   :  { %390 = vmatpush.bf16.msrb.mxu2 %v1793_v42 }
  0x34   :  { %366 = vmatpush.bf16.msrb.mxu0 %v1827_v53 }
  0x35   :  { %379 = vmatpush.bf16.msrb.mxu1 %v1839_v57  ;;  %405 = vmatpush.bf16.msrb.mxu3 %v1841_v58 }
  0x36   :  { %391 = vmatpush.bf16.msrb.mxu2 %v1829_v54 }
  0x38   :  { %367 = vmatpush.bf16.msrb.mxu0 %v1863_v1 }
  0x39   :  { %380 = vmatpush.bf16.msrb.mxu1 %v1875_v6  ;;  %406 = vmatpush.bf16.msrb.mxu3 %v1877_v9 }
  0x3a   :  { %392 = vmatpush.bf16.msrb.mxu2 %v1865_v2 }
  0x3c   :  { %368 = vmatpush.bf16.msrb.mxu0 %v1899_v19 }
  0x3d   :  { %381 = vmatpush.bf16.msrb.mxu1 %v1911_v24  ;;  %407 = vmatpush.bf16.msrb.mxu3 %v1913_v25 }
  0x3e   :  { %393 = vmatpush.bf16.msrb.mxu2 %v1901_v20 }
  0x40   :  { %369 = vmatpush.bf16.msrb.mxu0 %v1935_v36 }
  0x41   :  { %382 = vmatpush.bf16.msrb.mxu1 %v1944_v39  ;;  %408 = vmatpush.bf16.msrb.mxu3 %v1946_v40 }
  0x42   :  { %394 = vmatpush.bf16.msrb.mxu2 %v1940_v38 }
  0x44   :  { %496 = vmatpush.bf16.msra.mxu0 %v1679_v3 }
  0x45   :  { %509 = vmatpush.bf16.msra.mxu1 %v1690_v7  ;;  %535 = vmatpush.bf16.msra.mxu3 %v1692_v8 }
  0x46   :  { %395 = vmatpush.bf16.msrb.mxu2 %v1958_v48 }
  0x48   :  { %497 = vmatpush.bf16.msra.mxu0 %v1704_v12 }
  0x49   :  { %510 = vmatpush.bf16.msra.mxu1 %v1717_v16  ;;  %536 = vmatpush.bf16.msra.mxu3 %v1719_v17 }
  0x4a   :  { %522 = vmatpush.bf16.msra.mxu2 %v1730_v21 }
  0x4c   :  { %498 = vmatpush.bf16.msra.mxu0 %v1752_v28 }
  0x4d   :  { %511 = vmatpush.bf16.msra.mxu1 %v1765_v32  ;;  %537 = vmatpush.bf16.msra.mxu3 %v1767_v33 }
  0x4e   :  { %523 = vmatpush.bf16.msra.mxu2 %v1769_v34 }
  0x50   :  { %499 = vmatpush.bf16.msra.mxu0 %v1791_v41 }
  0x51   :  { %512 = vmatpush.bf16.msra.mxu1 %v1803_v45  ;;  %538 = vmatpush.bf16.msra.mxu3 %v1805_v46 }
  0x52   :  { %524 = vmatpush.bf16.msra.mxu2 %v1793_v42 }
  0x54   :  { %500 = vmatpush.bf16.msra.mxu0 %v1827_v53 }
  0x55   :  { %513 = vmatpush.bf16.msra.mxu1 %v1839_v57  ;;  %539 = vmatpush.bf16.msra.mxu3 %v1841_v58 }
  0x56   :  { %525 = vmatpush.bf16.msra.mxu2 %v1829_v54 }
  0x58   :  { %501 = vmatpush.bf16.msra.mxu0 %v1863_v1 }
  0x59   :  { %514 = vmatpush.bf16.msra.mxu1 %v1875_v6  ;;  %540 = vmatpush.bf16.msra.mxu3 %v1877_v9 }
  0x5a   :  { %526 = vmatpush.bf16.msra.mxu2 %v1865_v2 }
  0x5c   :  { %502 = vmatpush.bf16.msra.mxu0 %v1899_v19 }
  0x5d   :  { %515 = vmatpush.bf16.msra.mxu1 %v1911_v24  ;;  %541 = vmatpush.bf16.msra.mxu3 %v1913_v25 }
  0x5e   :  { %527 = vmatpush.bf16.msra.mxu2 %v1901_v20 }
  0x60   :  { %503 = vmatpush.bf16.msra.mxu0 %v1935_v36 }
  0x61   :  { %516 = vmatpush.bf16.msra.mxu1 %v1944_v39  ;;  %542 = vmatpush.bf16.msra.mxu3 %v1946_v40 }
  0x62   :  { %528 = vmatpush.bf16.msra.mxu2 %v1940_v38 }
  0x66   :  { %529 = vmatpush.bf16.msra.mxu2 %v1958_v48 }
  0xa0   :  { %v238_v52 = vpop.f32.mrf.mxu0 }
  0xa1   :  { %v281_v55 = vadd.f32 %v238_v52, %v64_v50  ;;  %v251_v56 = vpop.f32.mrf.mxu1 }
  0xa2   :  { %v282_v60 = vadd.f32 %v251_v56, %v65_v51 }
  0xa3   :  { %v1430_v61 = vmul.f32 -1.442695, %v281_v55 }
  0xa4   :  { %v1431_v62 = vmul.f32 -1.442695, %v282_v60 }
  0xa5   :  { %1507 = vpow2.f32 %v1430_v61 }
  0xa6   :  { %1509 = vpow2.f32 %v1431_v62 }
  0xa8   :  { %v240_v5 = vpop.f32.mrf.mxu0 }
  0xa9   :  { %v277_v0 = vpop.f32.mrf.mxu3  ;;  %v253_v10 = vpop.f32.mrf.mxu1 }
  0xaa   :  { %v284_v4 = vadd.f32 %v277_v0, %v67_v63  ;;  %v26_v10 = vld [vmem:[%s2297_s3] sm:$0xff] }
  0xab   :  { %v1508_v13 = vpop.eup %1507 }
  0xac   :  { %v1432_v11 = vmul.f32 -1.442695, %v284_v4  ;;  %v1510_v15 = vpop.eup %1509  ;;  %v288_v18 = vadd.f32 1.0, %v1508_v13 }
  0xad   :  { %v307_v22 = vadd.f32 1.0, %v1510_v15 }
  0xae   :  { %v264_v14 = vpop.f32.mrf.mxu2  ;;  %1511 = vpow2.f32 %v1432_v11  ;;  %v300_v50 = vand.u32 2147483648, %v288_v18  ;;  %v298_v55 = vand.u32 2147483647, %v288_v18  ;;  %vm294_vm2 = vweird.f32 %v288_v18 }
  0xaf   :  { %1513 = vrcp.f32 %v288_v18  ;;  %v283_v29 = vadd.f32 %v264_v14, %v66_v23  ;;  %v319_v51 = vand.u32 2147483648, %v307_v22  ;;  %v317_v59 = vand.u32 2147483647, %v307_v22 }
  0xb0   :  { %1515 = vrcp.f32 %v307_v22  ;;  %vm313_vm3 = vweird.f32 %v307_v22  ;;  %v301_v0 = vor.u32 1.1754944e-38, %v300_v50  ;;  %vm299_vm6 = vcmp.eq.f32.partialorder %v298_v55, 8.507059e+37 }
  0xb1   :  { %v279_v26 = vpop.f32.mrf.mxu3  ;;  %v320_v5 = vor.u32 1.1754944e-38, %v319_v51  ;;  %vm318_vm7 = vcmp.eq.f32.partialorder %v317_v59, 8.507059e+37 }
  0xb4   :  { %v1512_v27 = vpop.eup %1511 }
  0xb5   :  { %v327_v30 = vadd.f32 1.0, %v1512_v27  ;;  %v1514_v35 = vpop.eup %1513 }
  0xb6   :  { %v266_v31 = vpop.f32.mrf.mxu2  ;;  %v1516_v37 = vpop.eup %1515  ;;  %v290_v43 = vmul.f32 %v1514_v35, %v288_v18  ;;  %vm295_vm0 = vweird.f32 %v1514_v35 }
  0xb7   :  { %1517 = vrcp.f32 %v327_v30  ;;  %v309_v44 = vmul.f32 %v1516_v37, %v307_v22  ;;  %vm314_vm1 = vweird.f32 %v1516_v37  ;;  %vm296_vm4 = vmor %vm294_vm2, %vm295_vm0  ;;  %v339_v31 = vand.u32 2147483648, %v327_v30 }
  0xb8   :  { %1519 = vtanh.f32 %v283_v29  ;;  %v291_v47 = vsub.f32 1.0, %v290_v43  ;;  %vm315_vm5 = vmor %vm313_vm3, %vm314_vm1  ;;  %vm333_vm9 = vweird.f32 %v327_v30  ;;  %v337_v43 = vand.u32 2147483647, %v327_v30 }
  0xb9   :  { %v310_v49 = vsub.f32 1.0, %v309_v44  ;;  %v340_v44 = vor.u32 1.1754944e-38, %v339_v31 }
  0xba   :  { %v292_v52 = vmul.f32 %v1514_v35, %v291_v47  ;;  %vm338_vm11 = vcmp.eq.f32.partialorder %v337_v43, 8.507059e+37 }
  0xbb   :  { %v311_v56 = vmul.f32 %v1516_v37, %v310_v49 }
  0xbc   :  { %v293_v61 = vadd.f32 %v1514_v35, %v292_v52 }
  0xbd   :  { %v1518_v60 = vpop.eup %1517  ;;  %v312_v4 = vadd.f32 %v1516_v37, %v311_v56 }
  0xbe   :  { %v1520_v62 = vpop.eup %1519  ;;  %v329_v63 = vmul.f32 %v1518_v60, %v327_v30  ;;  %v297_v11 = vsel %vm296_vm4, %v1514_v35, %v293_v61  ;;  %vm334_vm8 = vweird.f32 %v1518_v60  ;;  %v1433_v30 = vld [vmem:[%s2296_s0 + $0x10] sm:$0xff]  ;;  %v1434_v61 = vld [vmem:[%s2296_s0 + $0x18] sm:$0xff] }
  0xbf   :  { %v302_v14 = vsel %vm299_vm6, %v301_v0, %v297_v11  ;;  %v316_v15 = vsel %vm315_vm5, %v1516_v37, %v312_v4  ;;  %vm335_vm10 = vmor %vm333_vm9, %vm334_vm8  ;;  %v357_v51 = vunpack.c.l.bf16 %v1433_v30  ;;  %v358_v52 = vunpack.c.h.bf16 %v1433_v30 }
  0xc0   :  { %v330_v13 = vsub.f32 1.0, %v329_v63  ;;  %v321_v23 = vsel %vm318_vm7, %v320_v5, %v316_v15  ;;  %v344_v18 = vmul.f32 %v1520_v62, %v302_v14  ;;  %v360_v0 = vunpack.c.h.bf16 %v1434_v61 }
  0xc1   :  { %v343_v22 = vmul.f32 %v321_v23, %v26_v10  ;;  %v359_v31 = vunpack.c.l.bf16 %v1434_v61 }
  0xc2   :  { %v331_v26 = vmul.f32 %v1518_v60, %v330_v13 }
  0xc3   :  { %v2034_v27 = vadd.f32 %v344_v18, %v343_v22 }
  0xc4   :  { %v332_v29 = vadd.f32 %v1518_v60, %v331_v26 }
  0xc5   :  { %1521 = vtanh.f32 %v2034_v27 }
  0xc6   :  { %v336_v35 = vsel %vm335_vm10, %v1518_v60, %v332_v29 }
  0xc7   :  { %v341_v37 = vsel %vm338_vm11, %v340_v44, %v336_v35 }
  0xcb   :  { %v1522_v47 = vpop.eup %1521 }
  0xcc   :  { %v347_v49 = vmul.f32 %v1522_v47, %v341_v37 }
  0xce   :  { %v350_v50 = vpack.c.bf16 %v347_v49, %v347_v49 }
  0xd0   :  { %351 = vst [vmem:[%s2298_s4] sm:$0xf] %v350_v50  ;;  %370 = vmatmul.bf16.vlgmr.msrb.gmra.mxu0 %v350_v50  ;;  %383 = vmatmul.bf16.vlgmr.msrb.gmra.mxu1 %v350_v50 }
  0xd1   :  { %396 = vmatmul.bf16.vlgmr.msrb.gmra.mxu2 %v350_v50  ;;  %409 = vmatmul.bf16.vlgmr.msrb.gmra.mxu3 %v350_v50 }
  0xd2   :  { %630 = vmatpush.bf16.msrb.mxu0 %v1679_v3  ;;  %643 = vmatpush.bf16.msrb.mxu1 %v1690_v7 }
  0xd3   :  { %656 = vmatpush.bf16.msrb.mxu2 %v1730_v21  ;;  %669 = vmatpush.bf16.msrb.mxu3 %v1692_v8 }
  0xd6   :  { %631 = vmatpush.bf16.msrb.mxu0 %v1704_v12  ;;  %644 = vmatpush.bf16.msrb.mxu1 %v1717_v16 }
  0xd7   :  { %657 = vmatpush.bf16.msrb.mxu2 %v1769_v34  ;;  %670 = vmatpush.bf16.msrb.mxu3 %v1719_v17 }
  0xda   :  { %632 = vmatpush.bf16.msrb.mxu0 %v1752_v28  ;;  %645 = vmatpush.bf16.msrb.mxu1 %v1765_v32 }
  0xdb   :  { %658 = vmatpush.bf16.msrb.mxu2 %v1793_v42  ;;  %671 = vmatpush.bf16.msrb.mxu3 %v1767_v33 }
  0xde   :  { %633 = vmatpush.bf16.msrb.mxu0 %v1791_v41  ;;  %646 = vmatpush.bf16.msrb.mxu1 %v1803_v45 }
  0xdf   :  { %659 = vmatpush.bf16.msrb.mxu2 %v1829_v54  ;;  %672 = vmatpush.bf16.msrb.mxu3 %v1805_v46 }
  0xe2   :  { %634 = vmatpush.bf16.msrb.mxu0 %v1827_v53  ;;  %647 = vmatpush.bf16.msrb.mxu1 %v1839_v57 }
  0xe3   :  { %660 = vmatpush.bf16.msrb.mxu2 %v1865_v2  ;;  %673 = vmatpush.bf16.msrb.mxu3 %v1841_v58 }
  0xe6   :  { %635 = vmatpush.bf16.msrb.mxu0 %v1863_v1  ;;  %648 = vmatpush.bf16.msrb.mxu1 %v1875_v6 }
  0xe7   :  { %661 = vmatpush.bf16.msrb.mxu2 %v1901_v20  ;;  %674 = vmatpush.bf16.msrb.mxu3 %v1877_v9 }
  0xea   :  { %636 = vmatpush.bf16.msrb.mxu0 %v1899_v19  ;;  %649 = vmatpush.bf16.msrb.mxu1 %v1911_v24 }
  0xeb   :  { %662 = vmatpush.bf16.msrb.mxu2 %v1940_v38  ;;  %675 = vmatpush.bf16.msrb.mxu3 %v1913_v25 }
  0xee   :  { %637 = vmatpush.bf16.msrb.mxu0 %v1935_v36  ;;  %650 = vmatpush.bf16.msrb.mxu1 %v1944_v39 }
  0xef   :  { %663 = vmatpush.bf16.msrb.mxu2 %v1958_v48  ;;  %676 = vmatpush.bf16.msrb.mxu3 %v1946_v40 }
 0x14d   :  { %v371_v55 = vpop.f32.mrf.mxu0  ;;  %v384_v56 = vpop.f32.mrf.mxu1 }
 0x14e   :  { %v414_v59 = vadd.f32 %v371_v55, %v357_v51  ;;  %v415_v60 = vadd.f32 %v384_v56, %v358_v52 }
 0x150   :  { %v1435_v62 = vmul.f32 -1.442695, %v414_v59  ;;  %v1436_v63 = vmul.f32 -1.442695, %v415_v60 }
 0x152   :  { %1523 = vpow2.f32 %v1435_v62 }
 0x153   :  { %1525 = vpow2.f32 %v1436_v63 }
 0x154   :  { %v397_v4 = vpop.f32.mrf.mxu2  ;;  %v410_v5 = vpop.f32.mrf.mxu3 }
 0x155   :  { %v417_v10 = vadd.f32 %v410_v5, %v360_v0  ;;  %v373_v11 = vpop.f32.mrf.mxu0  ;;  %v386_v13 = vpop.f32.mrf.mxu1  ;;  %v416_v47 = vadd.f32 %v397_v4, %v359_v31 }
 0x157   :  { %v1437_v14 = vmul.f32 -1.442695, %v417_v10 }
 0x158   :  { %v1524_v15 = vpop.eup %1523 }
 0x159   :  { %v1526_v23 = vpop.eup %1525  ;;  %v421_v18 = vadd.f32 1.0, %v1524_v15  ;;  %1527 = vpow2.f32 %v1437_v14 }
 0x15a   :  { %v440_v26 = vadd.f32 1.0, %v1526_v23 }
 0x15b   :  { %1529 = vrcp.f32 %v421_v18  ;;  %v433_v52 = vand.u32 2147483648, %v421_v18  ;;  %v431_v59 = vand.u32 2147483647, %v421_v18  ;;  %vm427_vm14 = vweird.f32 %v421_v18 }
 0x15c   :  { %1531 = vrcp.f32 %v440_v26  ;;  %v399_v22 = vpop.f32.mrf.mxu2  ;;  %v412_v29 = vpop.f32.mrf.mxu3  ;;  %v452_v55 = vand.u32 2147483648, %v440_v26  ;;  %v450_v62 = vand.u32 2147483647, %v440_v26  ;;  %vm446_vm15 = vweird.f32 %v440_v26 }
 0x15d   :  { %v434_v0 = vor.u32 1.1754944e-38, %v433_v52  ;;  %vm432_vm2 = vcmp.eq.f32.partialorder %v431_v59, 8.507059e+37 }
 0x15e   :  { %v453_v10 = vor.u32 1.1754944e-38, %v452_v55  ;;  %vm451_vm3 = vcmp.eq.f32.partialorder %v450_v62, 8.507059e+37 }
 0x15f   :  { %v1528_v43 = vpop.eup %1527 }
 0x160   :  { %v460_v35 = vadd.f32 1.0, %v1528_v43 }
 0x161   :  { %v1530_v44 = vpop.eup %1529 }
 0x162   :  { %v1532_v37 = vpop.eup %1531  ;;  %v423_v49 = vmul.f32 %v1530_v44, %v421_v18  ;;  %1533 = vrcp.f32 %v460_v35  ;;  %vm428_vm12 = vweird.f32 %v1530_v44  ;;  %vm466_vm5 = vweird.f32 %v460_v35 }
 0x163   :  { %v442_v50 = vmul.f32 %v1532_v37, %v440_v26  ;;  %1535 = vtanh.f32 %v416_v47  ;;  %vm447_vm13 = vweird.f32 %v1532_v37  ;;  %vm429_vm0 = vmor %vm427_vm14, %vm428_vm12  ;;  %v472_v47 = vand.u32 2147483648, %v460_v35 }
 0x164   :  { %v424_v30 = vsub.f32 1.0, %v423_v49  ;;  %vm448_vm1 = vmor %vm446_vm15, %vm447_vm13 }
 0x165   :  { %v443_v51 = vsub.f32 1.0, %v442_v50  ;;  %v473_v50 = vor.u32 1.1754944e-38, %v472_v47 }
 0x166   :  { %v425_v56 = vmul.f32 %v1530_v44, %v424_v30 }
 0x167   :  { %v444_v60 = vmul.f32 %v1532_v37, %v443_v51 }
 0x168   :  { %v1534_v61 = vpop.eup %1533  ;;  %v426_v63 = vadd.f32 %v1530_v44, %v425_v56 }
 0x169   :  { %v445_v4 = vadd.f32 %v1532_v37, %v444_v60  ;;  %v462_v5 = vmul.f32 %v1534_v61, %v460_v35  ;;  %v1536_v13 = vpop.eup %1535  ;;  %vm467_vm4 = vweird.f32 %v1534_v61 }
 0x16a   :  { %v430_v11 = vsel %vm429_vm0, %v1530_v44, %v426_v63  ;;  %v470_v44 = vand.u32 2147483647, %v460_v35  ;;  %vm468_vm6 = vmor %vm466_vm5, %vm467_vm4 }
 0x16b   :  { %v435_v14 = vsel %vm432_vm2, %v434_v0, %v430_v11  ;;  %v449_v15 = vsel %vm448_vm1, %v1532_v37, %v445_v4  ;;  %v463_v23 = vsub.f32 1.0, %v462_v5 }
 0x16c   :  { %v454_v22 = vsel %vm451_vm3, %v453_v10, %v449_v15  ;;  %v477_v29 = vmul.f32 %v1536_v13, %v435_v14  ;;  %vm471_vm7 = vcmp.eq.f32.partialorder %v470_v44, 8.507059e+37 }
 0x16d   :  { %v476_v31 = vmul.f32 %v454_v22, %v2034_v27  ;;  %v464_v43 = vmul.f32 %v1534_v61, %v463_v23  ;;  %v1439_v27 = vld [vmem:[%s2296_s0 + $0x20] sm:$0xff] }
 0x16e   :  { %v491_v35 = vunpack.c.l.bf16 %v1439_v27  ;;  %v492_v55 = vunpack.c.h.bf16 %v1439_v27 }
 0x16f   :  { %v2079_v18 = vadd.f32 %v477_v29, %v476_v31  ;;  %v465_v26 = vadd.f32 %v1534_v61, %v464_v43 }
 0x171   :  { %1537 = vtanh.f32 %v2079_v18  ;;  %v469_v49 = vsel %vm468_vm6, %v1534_v61, %v465_v26  ;;  %v1440_v61 = vld [vmem:[%s2296_s0 + $0x28] sm:$0xff] }
 0x172   :  { %v474_v30 = vsel %vm471_vm7, %v473_v50, %v469_v49  ;;  %v494_v4 = vunpack.c.h.bf16 %v1440_v61  ;;  %v493_v47 = vunpack.c.l.bf16 %v1440_v61 }
 0x177   :  { %v1538_v37 = vpop.eup %1537 }
 0x178   :  { %v480_v51 = vmul.f32 %v1538_v37, %v474_v30 }
 0x17a   :  { %v483_v52 = vpack.c.bf16 %v480_v51, %v480_v51 }
 0x17c   :  { %1438 = vst [vmem:[%s2298_s4 + $0x4] sm:$0xf] %v483_v52  ;;  %504 = vmatmul.bf16.vlgmr.msra.gmra.mxu0 %v483_v52  ;;  %517 = vmatmul.bf16.vlgmr.msra.gmra.mxu1 %v483_v52 }
 0x17d   :  { %530 = vmatmul.bf16.vlgmr.msra.gmra.mxu2 %v483_v52  ;;  %543 = vmatmul.bf16.vlgmr.msra.gmra.mxu3 %v483_v52 }
 0x17e   :  { %764 = vmatpush.bf16.msra.mxu0 %v1679_v3  ;;  %777 = vmatpush.bf16.msra.mxu1 %v1690_v7 }
 0x17f   :  { %790 = vmatpush.bf16.msra.mxu2 %v1730_v21  ;;  %803 = vmatpush.bf16.msra.mxu3 %v1692_v8 }
 0x182   :  { %765 = vmatpush.bf16.msra.mxu0 %v1704_v12  ;;  %778 = vmatpush.bf16.msra.mxu1 %v1717_v16 }
 0x183   :  { %791 = vmatpush.bf16.msra.mxu2 %v1769_v34  ;;  %804 = vmatpush.bf16.msra.mxu3 %v1719_v17 }
 0x186   :  { %766 = vmatpush.bf16.msra.mxu0 %v1752_v28  ;;  %779 = vmatpush.bf16.msra.mxu1 %v1765_v32 }
 0x187   :  { %792 = vmatpush.bf16.msra.mxu2 %v1793_v42  ;;  %805 = vmatpush.bf16.msra.mxu3 %v1767_v33 }
 0x18a   :  { %767 = vmatpush.bf16.msra.mxu0 %v1791_v41  ;;  %780 = vmatpush.bf16.msra.mxu1 %v1803_v45 }
 0x18b   :  { %793 = vmatpush.bf16.msra.mxu2 %v1829_v54  ;;  %806 = vmatpush.bf16.msra.mxu3 %v1805_v46 }
 0x18e   :  { %768 = vmatpush.bf16.msra.mxu0 %v1827_v53  ;;  %781 = vmatpush.bf16.msra.mxu1 %v1839_v57 }
 0x18f   :  { %794 = vmatpush.bf16.msra.mxu2 %v1865_v2  ;;  %807 = vmatpush.bf16.msra.mxu3 %v1841_v58 }
 0x192   :  { %769 = vmatpush.bf16.msra.mxu0 %v1863_v1  ;;  %782 = vmatpush.bf16.msra.mxu1 %v1875_v6 }
 0x193   :  { %795 = vmatpush.bf16.msra.mxu2 %v1901_v20  ;;  %808 = vmatpush.bf16.msra.mxu3 %v1877_v9 }
 0x196   :  { %770 = vmatpush.bf16.msra.mxu0 %v1899_v19  ;;  %783 = vmatpush.bf16.msra.mxu1 %v1911_v24 }
 0x197   :  { %796 = vmatpush.bf16.msra.mxu2 %v1940_v38  ;;  %809 = vmatpush.bf16.msra.mxu3 %v1913_v25 }
 0x19a   :  { %771 = vmatpush.bf16.msra.mxu0 %v1935_v36  ;;  %784 = vmatpush.bf16.msra.mxu1 %v1944_v39 }
 0x19b   :  { %797 = vmatpush.bf16.msra.mxu2 %v1958_v48  ;;  %810 = vmatpush.bf16.msra.mxu3 %v1946_v40 }
 0x1f9   :  { %v505_v56 = vpop.f32.mrf.mxu0  ;;  %v518_v59 = vpop.f32.mrf.mxu1 }
 0x1fa   :  { %v548_v60 = vadd.f32 %v505_v56, %v491_v35  ;;  %v549_v62 = vadd.f32 %v518_v59, %v492_v55 }
 0x1fc   :  { %v1441_v63 = vmul.f32 -1.442695, %v548_v60  ;;  %v1442_v0 = vmul.f32 -1.442695, %v549_v62 }
 0x1fe   :  { %1539 = vpow2.f32 %v1441_v63 }
 0x1ff   :  { %1541 = vpow2.f32 %v1442_v0 }
 0x200   :  { %v531_v5 = vpop.f32.mrf.mxu2  ;;  %v544_v10 = vpop.f32.mrf.mxu3 }
 0x201   :  { %v551_v11 = vadd.f32 %v544_v10, %v494_v4  ;;  %v507_v13 = vpop.f32.mrf.mxu0  ;;  %v520_v14 = vpop.f32.mrf.mxu1  ;;  %v550_v37 = vadd.f32 %v531_v5, %v493_v47 }
 0x203   :  { %v1443_v15 = vmul.f32 -1.442695, %v551_v11 }
 0x204   :  { %v1540_v23 = vpop.eup %1539 }
 0x205   :  { %v1542_v22 = vpop.eup %1541  ;;  %v555_v29 = vadd.f32 1.0, %v1540_v23  ;;  %1543 = vpow2.f32 %v1443_v15 }
 0x206   :  { %v574_v31 = vadd.f32 1.0, %v1542_v22 }
 0x207   :  { %1545 = vrcp.f32 %v555_v29  ;;  %v567_v55 = vand.u32 2147483648, %v555_v29  ;;  %v565_v60 = vand.u32 2147483647, %v555_v29  ;;  %vm561_vm10 = vweird.f32 %v555_v29 }
 0x208   :  { %1547 = vrcp.f32 %v574_v31  ;;  %v533_v43 = vpop.f32.mrf.mxu2  ;;  %v546_v26 = vpop.f32.mrf.mxu3  ;;  %v586_v56 = vand.u32 2147483648, %v574_v31  ;;  %v584_v63 = vand.u32 2147483647, %v574_v31  ;;  %vm580_vm11 = vweird.f32 %v574_v31 }
 0x209   :  { %v568_v4 = vor.u32 1.1754944e-38, %v567_v55  ;;  %vm566_vm14 = vcmp.eq.f32.partialorder %v565_v60, 8.507059e+37 }
 0x20a   :  { %v587_v11 = vor.u32 1.1754944e-38, %v586_v56  ;;  %vm585_vm15 = vcmp.eq.f32.partialorder %v584_v63, 8.507059e+37 }
 0x20b   :  { %v1544_v44 = vpop.eup %1543 }
 0x20c   :  { %v594_v49 = vadd.f32 1.0, %v1544_v44 }
 0x20d   :  { %v1546_v50 = vpop.eup %1545 }
 0x20e   :  { %v1548_v30 = vpop.eup %1547  ;;  %v557_v51 = vmul.f32 %v1546_v50, %v555_v29  ;;  %1549 = vrcp.f32 %v594_v49  ;;  %vm562_vm8 = vweird.f32 %v1546_v50  ;;  %vm600_vm1 = vweird.f32 %v594_v49 }
 0x20f   :  { %v576_v52 = vmul.f32 %v1548_v30, %v574_v31  ;;  %1551 = vtanh.f32 %v550_v37  ;;  %vm581_vm9 = vweird.f32 %v1548_v30  ;;  %vm563_vm12 = vmor %vm561_vm10, %vm562_vm8  ;;  %v606_v37 = vand.u32 2147483648, %v594_v49 }
 0x210   :  { %v558_v27 = vsub.f32 1.0, %v557_v51  ;;  %vm582_vm13 = vmor %vm580_vm11, %vm581_vm9 }
 0x211   :  { %v577_v35 = vsub.f32 1.0, %v576_v52  ;;  %v607_v52 = vor.u32 1.1754944e-38, %v606_v37 }
 0x212   :  { %v559_v59 = vmul.f32 %v1546_v50, %v558_v27 }
 0x213   :  { %v578_v62 = vmul.f32 %v1548_v30, %v577_v35 }
 0x214   :  { %v1550_v61 = vpop.eup %1549  ;;  %v560_v0 = vadd.f32 %v1546_v50, %v559_v59 }
 0x215   :  { %v579_v5 = vadd.f32 %v1548_v30, %v578_v62  ;;  %v596_v10 = vmul.f32 %v1550_v61, %v594_v49  ;;  %v1552_v14 = vpop.eup %1551  ;;  %vm601_vm0 = vweird.f32 %v1550_v61 }
 0x216   :  { %v564_v13 = vsel %vm563_vm12, %v1546_v50, %v560_v0  ;;  %v604_v50 = vand.u32 2147483647, %v594_v49  ;;  %vm602_vm2 = vmor %vm600_vm1, %vm601_vm0 }
 0x217   :  { %v569_v15 = vsel %vm566_vm14, %v568_v4, %v564_v13  ;;  %v583_v23 = vsel %vm582_vm13, %v1548_v30, %v579_v5  ;;  %v597_v22 = vsub.f32 1.0, %v596_v10 }
 0x218   :  { %v588_v43 = vsel %vm585_vm15, %v587_v11, %v583_v23  ;;  %v611_v26 = vmul.f32 %v1552_v14, %v569_v15  ;;  %vm605_vm3 = vcmp.eq.f32.partialorder %v604_v50, 8.507059e+37 }
 0x219   :  { %v610_v47 = vmul.f32 %v588_v43, %v2079_v18  ;;  %v598_v44 = vmul.f32 %v1550_v61, %v597_v22  ;;  %v1445_v18 = vld [vmem:[%s2296_s0 + $0x30] sm:$0xff] }
 0x21a   :  { %v625_v49 = vunpack.c.l.bf16 %v1445_v18  ;;  %v626_v56 = vunpack.c.h.bf16 %v1445_v18 }
 0x21b   :  { %v2124_v29 = vadd.f32 %v611_v26, %v610_v47  ;;  %v599_v31 = vadd.f32 %v1550_v61, %v598_v44 }
 0x21d   :  { %1553 = vtanh.f32 %v2124_v29  ;;  %v603_v51 = vsel %vm602_vm2, %v1550_v61, %v599_v31  ;;  %v1446_v61 = vld [vmem:[%s2296_s0 + $0x38] sm:$0xff] }
 0x21e   :  { %v608_v27 = vsel %vm605_vm3, %v607_v52, %v603_v51  ;;  %v628_v5 = vunpack.c.h.bf16 %v1446_v61  ;;  %v627_v37 = vunpack.c.l.bf16 %v1446_v61 }
 0x223   :  { %v1554_v30 = vpop.eup %1553 }
 0x224   :  { %v614_v35 = vmul.f32 %v1554_v30, %v608_v27 }
 0x226   :  { %v617_v55 = vpack.c.bf16 %v614_v35, %v614_v35 }
 0x228   :  { %1444 = vst [vmem:[%s2298_s4 + $0x8] sm:$0xf] %v617_v55  ;;  %638 = vmatmul.bf16.vlgmr.msrb.gmra.mxu0 %v617_v55  ;;  %651 = vmatmul.bf16.vlgmr.msrb.gmra.mxu1 %v617_v55 }
 0x229   :  { %664 = vmatmul.bf16.vlgmr.msrb.gmra.mxu2 %v617_v55  ;;  %677 = vmatmul.bf16.vlgmr.msrb.gmra.mxu3 %v617_v55 }
 0x22a   :  { %898 = vmatpush.bf16.msrb.mxu0 %v1679_v3  ;;  %911 = vmatpush.bf16.msrb.mxu1 %v1690_v7 }
 0x22b   :  { %924 = vmatpush.bf16.msrb.mxu2 %v1730_v21  ;;  %937 = vmatpush.bf16.msrb.mxu3 %v1692_v8 }
 0x22e   :  { %899 = vmatpush.bf16.msrb.mxu0 %v1704_v12  ;;  %912 = vmatpush.bf16.msrb.mxu1 %v1717_v16 }
 0x22f   :  { %925 = vmatpush.bf16.msrb.mxu2 %v1769_v34  ;;  %938 = vmatpush.bf16.msrb.mxu3 %v1719_v17 }
 0x232   :  { %900 = vmatpush.bf16.msrb.mxu0 %v1752_v28  ;;  %913 = vmatpush.bf16.msrb.mxu1 %v1765_v32 }
 0x233   :  { %926 = vmatpush.bf16.msrb.mxu2 %v1793_v42  ;;  %939 = vmatpush.bf16.msrb.mxu3 %v1767_v33 }
 0x236   :  { %901 = vmatpush.bf16.msrb.mxu0 %v1791_v41  ;;  %914 = vmatpush.bf16.msrb.mxu1 %v1803_v45 }
 0x237   :  { %927 = vmatpush.bf16.msrb.mxu2 %v1829_v54  ;;  %940 = vmatpush.bf16.msrb.mxu3 %v1805_v46 }
 0x23a   :  { %902 = vmatpush.bf16.msrb.mxu0 %v1827_v53  ;;  %915 = vmatpush.bf16.msrb.mxu1 %v1839_v57 }
 0x23b   :  { %928 = vmatpush.bf16.msrb.mxu2 %v1865_v2  ;;  %941 = vmatpush.bf16.msrb.mxu3 %v1841_v58 }
 0x23e   :  { %903 = vmatpush.bf16.msrb.mxu0 %v1863_v1  ;;  %916 = vmatpush.bf16.msrb.mxu1 %v1875_v6 }
 0x23f   :  { %929 = vmatpush.bf16.msrb.mxu2 %v1901_v20  ;;  %942 = vmatpush.bf16.msrb.mxu3 %v1877_v9 }
 0x242   :  { %904 = vmatpush.bf16.msrb.mxu0 %v1899_v19  ;;  %917 = vmatpush.bf16.msrb.mxu1 %v1911_v24 }
 0x243   :  { %930 = vmatpush.bf16.msrb.mxu2 %v1940_v38  ;;  %943 = vmatpush.bf16.msrb.mxu3 %v1913_v25 }
 0x246   :  { %905 = vmatpush.bf16.msrb.mxu0 %v1935_v36  ;;  %918 = vmatpush.bf16.msrb.mxu1 %v1944_v39 }
 0x247   :  { %931 = vmatpush.bf16.msrb.mxu2 %v1958_v48  ;;  %944 = vmatpush.bf16.msrb.mxu3 %v1946_v40 }
 0x2a5   :  { %v639_v59 = vpop.f32.mrf.mxu0  ;;  %v652_v60 = vpop.f32.mrf.mxu1 }
 0x2a6   :  { %v682_v62 = vadd.f32 %v639_v59, %v625_v49  ;;  %v683_v63 = vadd.f32 %v652_v60, %v626_v56 }
 0x2a8   :  { %v1447_v0 = vmul.f32 -1.442695, %v682_v62  ;;  %v1448_v4 = vmul.f32 -1.442695, %v683_v63 }
 0x2aa   :  { %1555 = vpow2.f32 %v1447_v0 }
 0x2ab   :  { %1557 = vpow2.f32 %v1448_v4 }
 0x2ac   :  { %v665_v10 = vpop.f32.mrf.mxu2  ;;  %v678_v11 = vpop.f32.mrf.mxu3 }
 0x2ad   :  { %v685_v13 = vadd.f32 %v678_v11, %v628_v5  ;;  %v641_v14 = vpop.f32.mrf.mxu0  ;;  %v654_v15 = vpop.f32.mrf.mxu1  ;;  %v684_v30 = vadd.f32 %v665_v10, %v627_v37 }
 0x2af   :  { %v1449_v23 = vmul.f32 -1.442695, %v685_v13 }
 0x2b0   :  { %v1556_v22 = vpop.eup %1555 }
 0x2b1   :  { %v1558_v43 = vpop.eup %1557  ;;  %v689_v26 = vadd.f32 1.0, %v1556_v22  ;;  %1559 = vpow2.f32 %v1449_v23 }
 0x2b2   :  { %v708_v47 = vadd.f32 1.0, %v1558_v43 }
 0x2b3   :  { %1561 = vrcp.f32 %v689_v26  ;;  %v701_v56 = vand.u32 2147483648, %v689_v26  ;;  %v699_v62 = vand.u32 2147483647, %v689_v26  ;;  %vm695_vm6 = vweird.f32 %v689_v26 }
 0x2b4   :  { %1563 = vrcp.f32 %v708_v47  ;;  %v667_v44 = vpop.f32.mrf.mxu2  ;;  %v680_v31 = vpop.f32.mrf.mxu3  ;;  %v720_v59 = vand.u32 2147483648, %v708_v47  ;;  %v718_v0 = vand.u32 2147483647, %v708_v47  ;;  %vm714_vm7 = vweird.f32 %v708_v47 }
 0x2b5   :  { %v702_v5 = vor.u32 1.1754944e-38, %v701_v56  ;;  %vm700_vm10 = vcmp.eq.f32.partialorder %v699_v62, 8.507059e+37 }
 0x2b6   :  { %v721_v13 = vor.u32 1.1754944e-38, %v720_v59  ;;  %vm719_vm11 = vcmp.eq.f32.partialorder %v718_v0, 8.507059e+37 }
 0x2b7   :  { %v1560_v50 = vpop.eup %1559 }
 0x2b8   :  { %v728_v51 = vadd.f32 1.0, %v1560_v50 }
 0x2b9   :  { %v1562_v52 = vpop.eup %1561 }
 0x2ba   :  { %v1564_v27 = vpop.eup %1563  ;;  %v691_v35 = vmul.f32 %v1562_v52, %v689_v26  ;;  %1565 = vrcp.f32 %v728_v51  ;;  %vm696_vm4 = vweird.f32 %v1562_v52  ;;  %vm734_vm13 = vweird.f32 %v728_v51 }
 0x2bb   :  { %v710_v55 = vmul.f32 %v1564_v27, %v708_v47  ;;  %1567 = vtanh.f32 %v684_v30  ;;  %vm715_vm5 = vweird.f32 %v1564_v27  ;;  %vm697_vm8 = vmor %vm695_vm6, %vm696_vm4  ;;  %v740_v30 = vand.u32 2147483648, %v728_v51 }
 0x2bc   :  { %v692_v18 = vsub.f32 1.0, %v691_v35  ;;  %vm716_vm9 = vmor %vm714_vm7, %vm715_vm5 }
 0x2bd   :  { %v711_v49 = vsub.f32 1.0, %v710_v55  ;;  %v741_v55 = vor.u32 1.1754944e-38, %v740_v30 }
 0x2be   :  { %v693_v60 = vmul.f32 %v1562_v52, %v692_v18 }
 0x2bf   :  { %v712_v63 = vmul.f32 %v1564_v27, %v711_v49 }
 0x2c0   :  { %v1566_v61 = vpop.eup %1565  ;;  %v694_v4 = vadd.f32 %v1562_v52, %v693_v60 }
 0x2c1   :  { %v713_v10 = vadd.f32 %v1564_v27, %v712_v63  ;;  %v730_v11 = vmul.f32 %v1566_v61, %v728_v51  ;;  %v1568_v15 = vpop.eup %1567  ;;  %vm735_vm12 = vweird.f32 %v1566_v61 }
 0x2c2   :  { %v698_v14 = vsel %vm697_vm8, %v1562_v52, %v694_v4  ;;  %v738_v52 = vand.u32 2147483647, %v728_v51  ;;  %vm736_vm14 = vmor %vm734_vm13, %vm735_vm12 }
 0x2c3   :  { %v703_v23 = vsel %vm700_vm10, %v702_v5, %v698_v14  ;;  %v717_v22 = vsel %vm716_vm9, %v1564_v27, %v713_v10  ;;  %v731_v43 = vsub.f32 1.0, %v730_v11 }
 0x2c4   :  { %v722_v44 = vsel %vm719_vm11, %v721_v13, %v717_v22  ;;  %v745_v31 = vmul.f32 %v1568_v15, %v703_v23  ;;  %vm739_vm15 = vcmp.eq.f32.partialorder %v738_v52, 8.507059e+37 }
 0x2c5   :  { %v744_v37 = vmul.f32 %v722_v44, %v2124_v29  ;;  %v732_v50 = vmul.f32 %v1566_v61, %v731_v43  ;;  %v1451_v29 = vld [vmem:[%s2296_s0 + $0x40] sm:$0xff] }
 0x2c6   :  { %v759_v51 = vunpack.c.l.bf16 %v1451_v29  ;;  %v760_v59 = vunpack.c.h.bf16 %v1451_v29 }
 0x2c7   :  { %v2169_v26 = vadd.f32 %v745_v31, %v744_v37  ;;  %v733_v47 = vadd.f32 %v1566_v61, %v732_v50 }
 0x2c9   :  { %1569 = vtanh.f32 %v2169_v26  ;;  %v737_v35 = vsel %vm736_vm14, %v1566_v61, %v733_v47  ;;  %v1452_v61 = vld [vmem:[%s2296_s0 + $0x48] sm:$0xff] }
 0x2ca   :  { %v742_v18 = vsel %vm739_vm15, %v741_v55, %v737_v35  ;;  %v762_v10 = vunpack.c.h.bf16 %v1452_v61  ;;  %v761_v30 = vunpack.c.l.bf16 %v1452_v61 }
 0x2cf   :  { %v1570_v27 = vpop.eup %1569 }
 0x2d0   :  { %v748_v49 = vmul.f32 %v1570_v27, %v742_v18 }
 0x2d2   :  { %v751_v56 = vpack.c.bf16 %v748_v49, %v748_v49 }
 0x2d4   :  { %1450 = vst [vmem:[%s2298_s4 + $0xc] sm:$0xf] %v751_v56  ;;  %772 = vmatmul.bf16.vlgmr.msra.gmra.mxu0 %v751_v56  ;;  %785 = vmatmul.bf16.vlgmr.msra.gmra.mxu1 %v751_v56 }
 0x2d5   :  { %798 = vmatmul.bf16.vlgmr.msra.gmra.mxu2 %v751_v56  ;;  %811 = vmatmul.bf16.vlgmr.msra.gmra.mxu3 %v751_v56 }
 0x2d6   :  { %1032 = vmatpush.bf16.msra.mxu0 %v1679_v3  ;;  %1045 = vmatpush.bf16.msra.mxu1 %v1690_v7 }
 0x2d7   :  { %1058 = vmatpush.bf16.msra.mxu2 %v1730_v21  ;;  %1071 = vmatpush.bf16.msra.mxu3 %v1692_v8 }
 0x2da   :  { %1033 = vmatpush.bf16.msra.mxu0 %v1704_v12  ;;  %1046 = vmatpush.bf16.msra.mxu1 %v1717_v16 }
 0x2db   :  { %1059 = vmatpush.bf16.msra.mxu2 %v1769_v34  ;;  %1072 = vmatpush.bf16.msra.mxu3 %v1719_v17 }
 0x2de   :  { %1034 = vmatpush.bf16.msra.mxu0 %v1752_v28  ;;  %1047 = vmatpush.bf16.msra.mxu1 %v1765_v32 }
 0x2df   :  { %1060 = vmatpush.bf16.msra.mxu2 %v1793_v42  ;;  %1073 = vmatpush.bf16.msra.mxu3 %v1767_v33 }
 0x2e2   :  { %1035 = vmatpush.bf16.msra.mxu0 %v1791_v41  ;;  %1048 = vmatpush.bf16.msra.mxu1 %v1803_v45 }
 0x2e3   :  { %1061 = vmatpush.bf16.msra.mxu2 %v1829_v54  ;;  %1074 = vmatpush.bf16.msra.mxu3 %v1805_v46 }
 0x2e6   :  { %1036 = vmatpush.bf16.msra.mxu0 %v1827_v53  ;;  %1049 = vmatpush.bf16.msra.mxu1 %v1839_v57 }
 0x2e7   :  { %1062 = vmatpush.bf16.msra.mxu2 %v1865_v2  ;;  %1075 = vmatpush.bf16.msra.mxu3 %v1841_v58 }
 0x2ea   :  { %1037 = vmatpush.bf16.msra.mxu0 %v1863_v1  ;;  %1050 = vmatpush.bf16.msra.mxu1 %v1875_v6 }
 0x2eb   :  { %1063 = vmatpush.bf16.msra.mxu2 %v1901_v20  ;;  %1076 = vmatpush.bf16.msra.mxu3 %v1877_v9 }
 0x2ee   :  { %1038 = vmatpush.bf16.msra.mxu0 %v1899_v19  ;;  %1051 = vmatpush.bf16.msra.mxu1 %v1911_v24 }
 0x2ef   :  { %1064 = vmatpush.bf16.msra.mxu2 %v1940_v38  ;;  %1077 = vmatpush.bf16.msra.mxu3 %v1913_v25 }
 0x2f2   :  { %1039 = vmatpush.bf16.msra.mxu0 %v1935_v36  ;;  %1052 = vmatpush.bf16.msra.mxu1 %v1944_v39 }
 0x2f3   :  { %1065 = vmatpush.bf16.msra.mxu2 %v1958_v48  ;;  %1078 = vmatpush.bf16.msra.mxu3 %v1946_v40 }
 0x351   :  { %v773_v60 = vpop.f32.mrf.mxu0  ;;  %v786_v62 = vpop.f32.mrf.mxu1 }
 0x352   :  { %v816_v63 = vadd.f32 %v773_v60, %v759_v51  ;;  %v817_v0 = vadd.f32 %v786_v62, %v760_v59 }
 0x354   :  { %v1453_v4 = vmul.f32 -1.442695, %v816_v63  ;;  %v1454_v5 = vmul.f32 -1.442695, %v817_v0 }
 0x356   :  { %1571 = vpow2.f32 %v1453_v4 }
 0x357   :  { %1573 = vpow2.f32 %v1454_v5 }
 0x358   :  { %v799_v11 = vpop.f32.mrf.mxu2  ;;  %v812_v13 = vpop.f32.mrf.mxu3 }
 0x359   :  { %v819_v14 = vadd.f32 %v812_v13, %v762_v10  ;;  %v775_v15 = vpop.f32.mrf.mxu0  ;;  %v788_v23 = vpop.f32.mrf.mxu1  ;;  %v818_v27 = vadd.f32 %v799_v11, %v761_v30 }
 0x35b   :  { %v1455_v22 = vmul.f32 -1.442695, %v819_v14 }
 0x35c   :  { %v1572_v43 = vpop.eup %1571 }
 0x35d   :  { %v1574_v44 = vpop.eup %1573  ;;  %v823_v31 = vadd.f32 1.0, %v1572_v43  ;;  %1575 = vpow2.f32 %v1455_v22 }
 0x35e   :  { %v842_v37 = vadd.f32 1.0, %v1574_v44 }
 0x35f   :  { %1577 = vrcp.f32 %v823_v31  ;;  %v835_v59 = vand.u32 2147483648, %v823_v31  ;;  %v833_v63 = vand.u32 2147483647, %v823_v31  ;;  %vm829_vm2 = vweird.f32 %v823_v31 }
 0x360   :  { %1579 = vrcp.f32 %v842_v37  ;;  %v801_v50 = vpop.f32.mrf.mxu2  ;;  %v814_v47 = vpop.f32.mrf.mxu3  ;;  %v854_v60 = vand.u32 2147483648, %v842_v37  ;;  %v852_v4 = vand.u32 2147483647, %v842_v37  ;;  %vm848_vm3 = vweird.f32 %v842_v37 }
 0x361   :  { %v836_v10 = vor.u32 1.1754944e-38, %v835_v59  ;;  %vm834_vm6 = vcmp.eq.f32.partialorder %v833_v63, 8.507059e+37 }
 0x362   :  { %v855_v14 = vor.u32 1.1754944e-38, %v854_v60  ;;  %vm853_vm7 = vcmp.eq.f32.partialorder %v852_v4, 8.507059e+37 }
 0x363   :  { %v1576_v52 = vpop.eup %1575 }
 0x364   :  { %v862_v35 = vadd.f32 1.0, %v1576_v52 }
 0x365   :  { %v1578_v55 = vpop.eup %1577 }
 0x366   :  { %v1580_v18 = vpop.eup %1579  ;;  %v825_v49 = vmul.f32 %v1578_v55, %v823_v31  ;;  %1581 = vrcp.f32 %v862_v35  ;;  %vm830_vm0 = vweird.f32 %v1578_v55  ;;  %vm868_vm9 = vweird.f32 %v862_v35 }
 0x367   :  { %v844_v56 = vmul.f32 %v1580_v18, %v842_v37  ;;  %1583 = vtanh.f32 %v818_v27  ;;  %vm849_vm1 = vweird.f32 %v1580_v18  ;;  %vm831_vm4 = vmor %vm829_vm2, %vm830_vm0  ;;  %v874_v27 = vand.u32 2147483648, %v862_v35 }
 0x368   :  { %v826_v29 = vsub.f32 1.0, %v825_v49  ;;  %vm850_vm5 = vmor %vm848_vm3, %vm849_vm1 }
 0x369   :  { %v845_v51 = vsub.f32 1.0, %v844_v56  ;;  %v875_v56 = vor.u32 1.1754944e-38, %v874_v27 }
 0x36a   :  { %v827_v62 = vmul.f32 %v1578_v55, %v826_v29 }
 0x36b   :  { %v846_v0 = vmul.f32 %v1580_v18, %v845_v51 }
 0x36c   :  { %v1582_v61 = vpop.eup %1581  ;;  %v828_v5 = vadd.f32 %v1578_v55, %v827_v62 }
 0x36d   :  { %v847_v11 = vadd.f32 %v1580_v18, %v846_v0  ;;  %v864_v13 = vmul.f32 %v1582_v61, %v862_v35  ;;  %v1584_v23 = vpop.eup %1583  ;;  %vm869_vm8 = vweird.f32 %v1582_v61 }
 0x36e   :  { %v832_v15 = vsel %vm831_vm4, %v1578_v55, %v828_v5  ;;  %v872_v55 = vand.u32 2147483647, %v862_v35  ;;  %vm870_vm10 = vmor %vm868_vm9, %vm869_vm8 }
 0x36f   :  { %v837_v22 = vsel %vm834_vm6, %v836_v10, %v832_v15  ;;  %v851_v43 = vsel %vm850_vm5, %v1580_v18, %v847_v11  ;;  %v865_v44 = vsub.f32 1.0, %v864_v13 }
 0x370   :  { %v856_v50 = vsel %vm853_vm7, %v855_v14, %v851_v43  ;;  %v879_v47 = vmul.f32 %v1584_v23, %v837_v22  ;;  %vm873_vm11 = vcmp.eq.f32.partialorder %v872_v55, 8.507059e+37 }
 0x371   :  { %v878_v30 = vmul.f32 %v856_v50, %v2169_v26  ;;  %v866_v52 = vmul.f32 %v1582_v61, %v865_v44 }
 0x373   :  { %v2214_v31 = vadd.f32 %v879_v47, %v878_v30  ;;  %v867_v37 = vadd.f32 %v1582_v61, %v866_v52 }
 0x375   :  { %1585 = vtanh.f32 %v2214_v31  ;;  %v871_v49 = vsel %vm870_vm10, %v1582_v61, %v867_v37 }
 0x376   :  { %v876_v29 = vsel %vm873_vm11, %v875_v56, %v871_v49 }
 0x37b   :  { %v1586_v18 = vpop.eup %1585 }
 0x37c   :  { %v882_v51 = vmul.f32 %v1586_v18, %v876_v29 }
 0x37e   :  { %v885_v59 = vpack.c.bf16 %v882_v51, %v882_v51 }
 0x380   :  { %1456 = vst [vmem:[%s2298_s4 + $0x10] sm:$0xf] %v885_v59  ;;  %906 = vmatmul.bf16.vlgmr.msrb.gmra.mxu0 %v885_v59  ;;  %919 = vmatmul.bf16.vlgmr.msrb.gmra.mxu1 %v885_v59 }
 0x381   :  { %932 = vmatmul.bf16.vlgmr.msrb.gmra.mxu2 %v885_v59  ;;  %945 = vmatmul.bf16.vlgmr.msrb.gmra.mxu3 %v885_v59 }
 0x382   :  { %1166 = vmatpush.bf16.msrb.mxu0 %v1679_v3  ;;  %1179 = vmatpush.bf16.msrb.mxu1 %v1690_v7  ;;  %v1457_v3 = vld [vmem:[%s2296_s0 + $0x50] sm:$0xff] }
 0x383   :  { %1192 = vmatpush.bf16.msrb.mxu2 %v1730_v21  ;;  %1205 = vmatpush.bf16.msrb.mxu3 %v1692_v8  ;;  %v893_v7 = vunpack.c.l.bf16 %v1457_v3  ;;  %v894_v8 = vunpack.c.h.bf16 %v1457_v3 }
 0x386   :  { %1167 = vmatpush.bf16.msrb.mxu0 %v1704_v12  ;;  %1180 = vmatpush.bf16.msrb.mxu1 %v1717_v16 }
 0x387   :  { %1193 = vmatpush.bf16.msrb.mxu2 %v1769_v34  ;;  %1206 = vmatpush.bf16.msrb.mxu3 %v1719_v17 }
 0x38a   :  { %1168 = vmatpush.bf16.msrb.mxu0 %v1752_v28  ;;  %1181 = vmatpush.bf16.msrb.mxu1 %v1765_v32  ;;  %v1458_v28 = vld [vmem:[%s2296_s0 + $0x58] sm:$0xff] }
 0x38b   :  { %1194 = vmatpush.bf16.msrb.mxu2 %v1793_v42  ;;  %1207 = vmatpush.bf16.msrb.mxu3 %v1767_v33  ;;  %v896_v34 = vunpack.c.h.bf16 %v1458_v28 }
 0x38e   :  { %1169 = vmatpush.bf16.msrb.mxu0 %v1791_v41  ;;  %1182 = vmatpush.bf16.msrb.mxu1 %v1803_v45 }
 0x38f   :  { %1195 = vmatpush.bf16.msrb.mxu2 %v1829_v54  ;;  %1208 = vmatpush.bf16.msrb.mxu3 %v1805_v46 }
 0x392   :  { %1170 = vmatpush.bf16.msrb.mxu0 %v1827_v53  ;;  %1183 = vmatpush.bf16.msrb.mxu1 %v1839_v57 }
 0x393   :  { %1196 = vmatpush.bf16.msrb.mxu2 %v1865_v2  ;;  %1209 = vmatpush.bf16.msrb.mxu3 %v1841_v58 }
 0x396   :  { %1171 = vmatpush.bf16.msrb.mxu0 %v1863_v1  ;;  %1184 = vmatpush.bf16.msrb.mxu1 %v1875_v6 }
 0x397   :  { %1197 = vmatpush.bf16.msrb.mxu2 %v1901_v20  ;;  %1210 = vmatpush.bf16.msrb.mxu3 %v1877_v9 }
 0x39a   :  { %1172 = vmatpush.bf16.msrb.mxu0 %v1899_v19  ;;  %1185 = vmatpush.bf16.msrb.mxu1 %v1911_v24  ;;  %v895_v19 = vunpack.c.l.bf16 %v1458_v28  ;;  %v1464_v28 = vld [vmem:[%s2296_s0 + $0x68] sm:$0xff] }
 0x39b   :  { %1198 = vmatpush.bf16.msrb.mxu2 %v1940_v38  ;;  %1211 = vmatpush.bf16.msrb.mxu3 %v1913_v25 }
 0x39e   :  { %1173 = vmatpush.bf16.msrb.mxu0 %v1935_v36  ;;  %1186 = vmatpush.bf16.msrb.mxu1 %v1944_v39 }
 0x39f   :  { %1199 = vmatpush.bf16.msrb.mxu2 %v1958_v48  ;;  %1212 = vmatpush.bf16.msrb.mxu3 %v1946_v40 }
 0x3fd   :  { %v907_v12 = vpop.f32.mrf.mxu0  ;;  %v920_v16 = vpop.f32.mrf.mxu1 }
 0x3fe   :  { %v950_v17 = vadd.f32 %v907_v12, %v893_v7  ;;  %v951_v21 = vadd.f32 %v920_v16, %v894_v8 }
 0x400   :  { %v1459_v32 = vmul.f32 -1.442695, %v950_v17  ;;  %v1460_v33 = vmul.f32 -1.442695, %v951_v21 }
 0x402   :  { %1587 = vpow2.f32 %v1459_v32 }
 0x403   :  { %1589 = vpow2.f32 %v1460_v33 }
 0x404   :  { %v933_v41 = vpop.f32.mrf.mxu2  ;;  %v946_v42 = vpop.f32.mrf.mxu3 }
 0x405   :  { %v953_v45 = vadd.f32 %v946_v42, %v896_v34  ;;  %v909_v46 = vpop.f32.mrf.mxu0  ;;  %v922_v53 = vpop.f32.mrf.mxu1  ;;  %v952_v36 = vadd.f32 %v933_v41, %v895_v19  ;;  %v1030_v34 = vunpack.c.h.bf16 %v1464_v28  ;;  %v1029_v19 = vunpack.c.l.bf16 %v1464_v28  ;;  %v1470_v28 = vld [vmem:[%s2296_s0 + $0x78] sm:$0xff] }
 0x407   :  { %v1461_v54 = vmul.f32 -1.442695, %v953_v45 }
 0x408   :  { %v1588_v57 = vpop.eup %1587 }
 0x409   :  { %v1590_v58 = vpop.eup %1589  ;;  %v957_v1 = vadd.f32 1.0, %v1588_v57  ;;  %1591 = vpow2.f32 %v1461_v54 }
 0x40a   :  { %v976_v2 = vadd.f32 1.0, %v1590_v58 }
 0x40b   :  { %1593 = vrcp.f32 %v957_v1  ;;  %v969_v35 = vand.u32 2147483648, %v957_v1  ;;  %v967_v63 = vand.u32 2147483647, %v957_v1  ;;  %vm963_vm14 = vweird.f32 %v957_v1 }
 0x40c   :  { %1595 = vrcp.f32 %v976_v2  ;;  %v935_v6 = vpop.f32.mrf.mxu2  ;;  %v948_v9 = vpop.f32.mrf.mxu3  ;;  %v988_v60 = vand.u32 2147483648, %v976_v2  ;;  %v986_v4 = vand.u32 2147483647, %v976_v2  ;;  %vm982_vm15 = vweird.f32 %v976_v2 }
 0x40d   :  { %v970_v10 = vor.u32 1.1754944e-38, %v969_v35  ;;  %vm968_vm2 = vcmp.eq.f32.partialorder %v967_v63, 8.507059e+37 }
 0x40e   :  { %v989_v14 = vor.u32 1.1754944e-38, %v988_v60  ;;  %vm987_vm3 = vcmp.eq.f32.partialorder %v986_v4, 8.507059e+37 }
 0x40f   :  { %v1592_v20 = vpop.eup %1591 }
 0x410   :  { %v996_v24 = vadd.f32 1.0, %v1592_v20 }
 0x411   :  { %v1594_v25 = vpop.eup %1593 }
 0x412   :  { %v1596_v38 = vpop.eup %1595  ;;  %v959_v39 = vmul.f32 %v1594_v25, %v957_v1  ;;  %1597 = vrcp.f32 %v996_v24  ;;  %vm964_vm12 = vweird.f32 %v1594_v25  ;;  %v1008_v55 = vand.u32 2147483648, %v996_v24 }
 0x413   :  { %v978_v40 = vmul.f32 %v1596_v38, %v976_v2  ;;  %1599 = vtanh.f32 %v952_v36  ;;  %vm983_vm13 = vweird.f32 %v1596_v38  ;;  %vm965_vm0 = vmor %vm963_vm14, %vm964_vm12  ;;  %vm1002_vm5 = vweird.f32 %v996_v24 }
 0x414   :  { %v960_v48 = vsub.f32 1.0, %v959_v39  ;;  %vm984_vm1 = vmor %vm982_vm15, %vm983_vm13  ;;  %v1006_v49 = vand.u32 2147483647, %v996_v24  ;;  %v1009_v18 = vor.u32 1.1754944e-38, %v1008_v55 }
 0x415   :  { %v979_v26 = vsub.f32 1.0, %v978_v40 }
 0x416   :  { %v961_v62 = vmul.f32 %v1594_v25, %v960_v48  ;;  %vm1007_vm7 = vcmp.eq.f32.partialorder %v1006_v49, 8.507059e+37 }
 0x417   :  { %v980_v0 = vmul.f32 %v1596_v38, %v979_v26 }
 0x418   :  { %v1598_v61 = vpop.eup %1597  ;;  %v962_v5 = vadd.f32 %v1594_v25, %v961_v62 }
 0x419   :  { %v981_v11 = vadd.f32 %v1596_v38, %v980_v0  ;;  %v998_v13 = vmul.f32 %v1598_v61, %v996_v24  ;;  %v1600_v23 = vpop.eup %1599  ;;  %vm1003_vm4 = vweird.f32 %v1598_v61 }
 0x41a   :  { %v966_v15 = vsel %vm965_vm0, %v1594_v25, %v962_v5  ;;  %vm1004_vm6 = vmor %vm1002_vm5, %vm1003_vm4 }
 0x41b   :  { %v971_v22 = vsel %vm968_vm2, %v970_v10, %v966_v15  ;;  %v985_v43 = vsel %vm984_vm1, %v1596_v38, %v981_v11  ;;  %v999_v44 = vsub.f32 1.0, %v998_v13 }
 0x41c   :  { %v990_v50 = vsel %vm987_vm3, %v989_v14, %v985_v43  ;;  %v1013_v47 = vmul.f32 %v1600_v23, %v971_v22 }
 0x41d   :  { %v1012_v30 = vmul.f32 %v990_v50, %v2214_v31  ;;  %v1000_v52 = vmul.f32 %v1598_v61, %v999_v44  ;;  %v1463_v31 = vld [vmem:[%s2296_s0 + $0x60] sm:$0xff] }
 0x41e   :  { %v1027_v7 = vunpack.c.l.bf16 %v1463_v31  ;;  %v1028_v8 = vunpack.c.h.bf16 %v1463_v31 }
 0x41f   :  { %v2259_v37 = vadd.f32 %v1013_v47, %v1012_v30  ;;  %v1001_v27 = vadd.f32 %v1598_v61, %v1000_v52 }
 0x421   :  { %1601 = vtanh.f32 %v2259_v37  ;;  %v1005_v56 = vsel %vm1004_vm6, %v1598_v61, %v1001_v27 }
 0x422   :  { %v1010_v51 = vsel %vm1007_vm7, %v1009_v18, %v1005_v56 }
 0x427   :  { %v1602_v29 = vpop.eup %1601 }
 0x428   :  { %v1016_v59 = vmul.f32 %v1602_v29, %v1010_v51 }
 0x42a   :  { %v1019_v3 = vpack.c.bf16 %v1016_v59, %v1016_v59 }
 0x42c   :  { %1462 = vst [vmem:[%s2298_s4 + $0x14] sm:$0xf] %v1019_v3  ;;  %1040 = vmatmul.bf16.vlgmr.msra.gmra.mxu0 %v1019_v3  ;;  %1053 = vmatmul.bf16.vlgmr.msra.gmra.mxu1 %v1019_v3 }
 0x42d   :  { %1066 = vmatmul.bf16.vlgmr.msra.gmra.mxu2 %v1019_v3  ;;  %1079 = vmatmul.bf16.vlgmr.msra.gmra.mxu3 %v1019_v3 }
 0x4a9   :  { %v1041_v12 = vpop.f32.mrf.mxu0  ;;  %v1054_v16 = vpop.f32.mrf.mxu1 }
 0x4aa   :  { %v1084_v17 = vadd.f32 %v1041_v12, %v1027_v7  ;;  %v1085_v21 = vadd.f32 %v1054_v16, %v1028_v8 }
 0x4ac   :  { %v1465_v32 = vmul.f32 -1.442695, %v1084_v17  ;;  %v1466_v33 = vmul.f32 -1.442695, %v1085_v21 }
 0x4ae   :  { %1603 = vpow2.f32 %v1465_v32 }
 0x4af   :  { %1605 = vpow2.f32 %v1466_v33 }
 0x4b0   :  { %v1067_v41 = vpop.f32.mrf.mxu2  ;;  %v1080_v42 = vpop.f32.mrf.mxu3 }
 0x4b1   :  { %v1087_v45 = vadd.f32 %v1080_v42, %v1030_v34  ;;  %v1043_v46 = vpop.f32.mrf.mxu0  ;;  %v1056_v53 = vpop.f32.mrf.mxu1  ;;  %v1086_v36 = vadd.f32 %v1067_v41, %v1029_v19  ;;  %v1164_v34 = vunpack.c.h.bf16 %v1470_v28  ;;  %v1163_v19 = vunpack.c.l.bf16 %v1470_v28 }
 0x4b3   :  { %v1467_v54 = vmul.f32 -1.442695, %v1087_v45 }
 0x4b4   :  { %v1604_v57 = vpop.eup %1603 }
 0x4b5   :  { %v1606_v58 = vpop.eup %1605  ;;  %v1091_v1 = vadd.f32 1.0, %v1604_v57  ;;  %1607 = vpow2.f32 %v1467_v54 }
 0x4b6   :  { %v1110_v2 = vadd.f32 1.0, %v1606_v58 }
 0x4b7   :  { %1609 = vrcp.f32 %v1091_v1  ;;  %v1103_v35 = vand.u32 2147483648, %v1091_v1  ;;  %v1101_v63 = vand.u32 2147483647, %v1091_v1  ;;  %vm1097_vm10 = vweird.f32 %v1091_v1 }
 0x4b8   :  { %1611 = vrcp.f32 %v1110_v2  ;;  %v1069_v6 = vpop.f32.mrf.mxu2  ;;  %v1082_v9 = vpop.f32.mrf.mxu3  ;;  %v1122_v60 = vand.u32 2147483648, %v1110_v2  ;;  %v1120_v4 = vand.u32 2147483647, %v1110_v2  ;;  %vm1116_vm11 = vweird.f32 %v1110_v2 }
 0x4b9   :  { %v1104_v10 = vor.u32 1.1754944e-38, %v1103_v35  ;;  %vm1102_vm14 = vcmp.eq.f32.partialorder %v1101_v63, 8.507059e+37 }
 0x4ba   :  { %v1123_v14 = vor.u32 1.1754944e-38, %v1122_v60  ;;  %vm1121_vm15 = vcmp.eq.f32.partialorder %v1120_v4, 8.507059e+37 }
 0x4bb   :  { %v1608_v20 = vpop.eup %1607 }
 0x4bc   :  { %v1130_v24 = vadd.f32 1.0, %v1608_v20 }
 0x4bd   :  { %v1610_v25 = vpop.eup %1609 }
 0x4be   :  { %v1612_v38 = vpop.eup %1611  ;;  %v1093_v39 = vmul.f32 %v1610_v25, %v1091_v1  ;;  %1613 = vrcp.f32 %v1130_v24  ;;  %vm1098_vm8 = vweird.f32 %v1610_v25  ;;  %v1142_v49 = vand.u32 2147483648, %v1130_v24 }
 0x4bf   :  { %v1112_v40 = vmul.f32 %v1612_v38, %v1110_v2  ;;  %1615 = vtanh.f32 %v1086_v36  ;;  %vm1117_vm9 = vweird.f32 %v1612_v38  ;;  %vm1099_vm12 = vmor %vm1097_vm10, %vm1098_vm8  ;;  %vm1136_vm1 = vweird.f32 %v1130_v24 }
 0x4c0   :  { %v1094_v48 = vsub.f32 1.0, %v1093_v39  ;;  %vm1118_vm13 = vmor %vm1116_vm11, %vm1117_vm9  ;;  %v1140_v56 = vand.u32 2147483647, %v1130_v24  ;;  %v1143_v29 = vor.u32 1.1754944e-38, %v1142_v49 }
 0x4c1   :  { %v1113_v26 = vsub.f32 1.0, %v1112_v40 }
 0x4c2   :  { %v1095_v62 = vmul.f32 %v1610_v25, %v1094_v48  ;;  %vm1141_vm3 = vcmp.eq.f32.partialorder %v1140_v56, 8.507059e+37 }
 0x4c3   :  { %v1114_v0 = vmul.f32 %v1612_v38, %v1113_v26 }
 0x4c4   :  { %v1614_v61 = vpop.eup %1613  ;;  %v1096_v5 = vadd.f32 %v1610_v25, %v1095_v62 }
 0x4c5   :  { %v1115_v11 = vadd.f32 %v1612_v38, %v1114_v0  ;;  %v1132_v13 = vmul.f32 %v1614_v61, %v1130_v24  ;;  %v1616_v23 = vpop.eup %1615  ;;  %vm1137_vm0 = vweird.f32 %v1614_v61 }
 0x4c6   :  { %v1100_v15 = vsel %vm1099_vm12, %v1610_v25, %v1096_v5  ;;  %vm1138_vm2 = vmor %vm1136_vm1, %vm1137_vm0 }
 0x4c7   :  { %v1105_v22 = vsel %vm1102_vm14, %v1104_v10, %v1100_v15  ;;  %v1119_v43 = vsel %vm1118_vm13, %v1612_v38, %v1115_v11  ;;  %v1133_v44 = vsub.f32 1.0, %v1132_v13 }
 0x4c8   :  { %v1124_v50 = vsel %vm1121_vm15, %v1123_v14, %v1119_v43  ;;  %v1147_v47 = vmul.f32 %v1616_v23, %v1105_v22 }
 0x4c9   :  { %v1146_v30 = vmul.f32 %v1124_v50, %v2259_v37  ;;  %v1134_v52 = vmul.f32 %v1614_v61, %v1133_v44  ;;  %v1469_v37 = vld [vmem:[%s2296_s0 + $0x70] sm:$0xff] }
 0x4ca   :  { %v1161_v7 = vunpack.c.l.bf16 %v1469_v37  ;;  %v1162_v8 = vunpack.c.h.bf16 %v1469_v37 }
 0x4cb   :  { %v2272_v27 = vadd.f32 %v1147_v47, %v1146_v30  ;;  %v1135_v55 = vadd.f32 %v1614_v61, %v1134_v52 }
 0x4cd   :  { %1617 = vtanh.f32 %v2272_v27  ;;  %v1139_v18 = vsel %vm1138_vm2, %v1614_v61, %v1135_v55 }
 0x4ce   :  { %v1144_v59 = vsel %vm1141_vm3, %v1143_v29, %v1139_v18 }
 0x4d3   :  { %v1618_v51 = vpop.eup %1617 }
 0x4d4   :  { %v1150_v3 = vmul.f32 %v1618_v51, %v1144_v59 }
 0x4d6   :  { %v1153_v31 = vpack.c.bf16 %v1150_v3, %v1150_v3 }
 0x4d8   :  { %1468 = vst [vmem:[%s2298_s4 + $0x18] sm:$0xf] %v1153_v31  ;;  %1174 = vmatmul.bf16.vlgmr.msrb.gmra.mxu0 %v1153_v31  ;;  %1187 = vmatmul.bf16.vlgmr.msrb.gmra.mxu1 %v1153_v31 }
 0x4d9   :  { %1200 = vmatmul.bf16.vlgmr.msrb.gmra.mxu2 %v1153_v31  ;;  %1213 = vmatmul.bf16.vlgmr.msrb.gmra.mxu3 %v1153_v31 }
 0x555   :  { %v1175_v12 = vpop.f32.mrf.mxu0  ;;  %v1188_v16 = vpop.f32.mrf.mxu1 }
 0x556   :  { %v1218_v17 = vadd.f32 %v1175_v12, %v1161_v7  ;;  %v1219_v21 = vadd.f32 %v1188_v16, %v1162_v8 }
 0x558   :  { %v1471_v32 = vmul.f32 -1.442695, %v1218_v17  ;;  %v1472_v33 = vmul.f32 -1.442695, %v1219_v21 }
 0x55a   :  { %1619 = vpow2.f32 %v1471_v32 }
 0x55b   :  { %1621 = vpow2.f32 %v1472_v33 }
 0x55c   :  { %v1201_v41 = vpop.f32.mrf.mxu2  ;;  %v1214_v42 = vpop.f32.mrf.mxu3 }
 0x55d   :  { %v1221_v45 = vadd.f32 %v1214_v42, %v1164_v34  ;;  %v1177_v46 = vpop.f32.mrf.mxu0  ;;  %v1190_v53 = vpop.f32.mrf.mxu1  ;;  %v1220_v36 = vadd.f32 %v1201_v41, %v1163_v19 }
 0x55f   :  { %v1473_v54 = vmul.f32 -1.442695, %v1221_v45 }
 0x560   :  { %v1620_v57 = vpop.eup %1619 }
 0x561   :  { %v1622_v58 = vpop.eup %1621  ;;  %v1225_v1 = vadd.f32 1.0, %v1620_v57  ;;  %1623 = vpow2.f32 %v1473_v54 }
 0x562   :  { %v1244_v2 = vadd.f32 1.0, %v1622_v58 }
 0x563   :  { %1625 = vrcp.f32 %v1225_v1  ;;  %v1237_v35 = vand.u32 2147483648, %v1225_v1  ;;  %v1235_v63 = vand.u32 2147483647, %v1225_v1  ;;  %vm1231_vm6 = vweird.f32 %v1225_v1 }
 0x564   :  { %1627 = vrcp.f32 %v1244_v2  ;;  %v1203_v6 = vpop.f32.mrf.mxu2  ;;  %v1216_v9 = vpop.f32.mrf.mxu3  ;;  %v1256_v60 = vand.u32 2147483648, %v1244_v2  ;;  %v1254_v4 = vand.u32 2147483647, %v1244_v2  ;;  %vm1250_vm7 = vweird.f32 %v1244_v2 }
 0x565   :  { %v1238_v10 = vor.u32 1.1754944e-38, %v1237_v35  ;;  %vm1236_vm10 = vcmp.eq.f32.partialorder %v1235_v63, 8.507059e+37 }
 0x566   :  { %v1257_v14 = vor.u32 1.1754944e-38, %v1256_v60  ;;  %vm1255_vm11 = vcmp.eq.f32.partialorder %v1254_v4, 8.507059e+37 }
 0x567   :  { %v1624_v20 = vpop.eup %1623 }
 0x568   :  { %v1264_v24 = vadd.f32 1.0, %v1624_v20 }
 0x569   :  { %v1626_v25 = vpop.eup %1625 }
 0x56a   :  { %v1628_v38 = vpop.eup %1627  ;;  %v1227_v39 = vmul.f32 %v1626_v25, %v1225_v1  ;;  %1629 = vrcp.f32 %v1264_v24  ;;  %vm1232_vm4 = vweird.f32 %v1626_v25  ;;  %v1276_v56 = vand.u32 2147483648, %v1264_v24 }
 0x56b   :  { %v1246_v40 = vmul.f32 %v1628_v38, %v1244_v2  ;;  %1631 = vtanh.f32 %v1220_v36  ;;  %vm1251_vm5 = vweird.f32 %v1628_v38  ;;  %vm1233_vm8 = vmor %vm1231_vm6, %vm1232_vm4  ;;  %vm1270_vm13 = vweird.f32 %v1264_v24 }
 0x56c   :  { %v1228_v48 = vsub.f32 1.0, %v1227_v39  ;;  %vm1252_vm9 = vmor %vm1250_vm7, %vm1251_vm5  ;;  %v1274_v18 = vand.u32 2147483647, %v1264_v24  ;;  %v1277_v51 = vor.u32 1.1754944e-38, %v1276_v56 }
 0x56d   :  { %v1247_v26 = vsub.f32 1.0, %v1246_v40 }
 0x56e   :  { %v1229_v62 = vmul.f32 %v1626_v25, %v1228_v48  ;;  %vm1275_vm15 = vcmp.eq.f32.partialorder %v1274_v18, 8.507059e+37 }
 0x56f   :  { %v1248_v0 = vmul.f32 %v1628_v38, %v1247_v26 }
 0x570   :  { %v1630_v61 = vpop.eup %1629  ;;  %v1230_v5 = vadd.f32 %v1626_v25, %v1229_v62 }
 0x571   :  { %v1249_v11 = vadd.f32 %v1628_v38, %v1248_v0  ;;  %v1266_v13 = vmul.f32 %v1630_v61, %v1264_v24  ;;  %v1632_v23 = vpop.eup %1631  ;;  %vm1271_vm12 = vweird.f32 %v1630_v61 }
 0x572   :  { %v1234_v15 = vsel %vm1233_vm8, %v1626_v25, %v1230_v5  ;;  %vm1272_vm14 = vmor %vm1270_vm13, %vm1271_vm12 }
 0x573   :  { %v1239_v22 = vsel %vm1236_vm10, %v1238_v10, %v1234_v15  ;;  %v1253_v43 = vsel %vm1252_vm9, %v1628_v38, %v1249_v11  ;;  %v1267_v44 = vsub.f32 1.0, %v1266_v13 }
 0x574   :  { %v1258_v50 = vsel %vm1255_vm11, %v1257_v14, %v1253_v43  ;;  %v1281_v47 = vmul.f32 %v1632_v23, %v1239_v22 }
 0x575   :  { %v1280_v30 = vmul.f32 %v1258_v50, %v2272_v27  ;;  %v1268_v52 = vmul.f32 %v1630_v61, %v1267_v44 }
 0x577   :  { %v1282_v55 = vadd.f32 %v1281_v47, %v1280_v30  ;;  %v1269_v49 = vadd.f32 %v1630_v61, %v1268_v52 }
 0x579   :  { %1633 = vtanh.f32 %v1282_v55  ;;  %1286 = vst [vmem:[%s2299_s6] sm:$0xff] %v1282_v55  ;;  %v1273_v29 = vsel %vm1272_vm14, %v1630_v61, %v1269_v49 }
 0x57a   :  { %v1278_v3 = vsel %vm1275_vm15, %v1277_v51, %v1273_v29 }
 0x57f   :  { %v1634_v59 = vpop.eup %1633 }
 0x580   :  { %v1284_v31 = vmul.f32 %v1634_v59, %v1278_v3 }
 0x582   :  { %1285 = vst [vmem:[%s2300_s5] sm:$0xff] %v1284_v31  ;;  %v1287_v27 = vpack.c.bf16 %v1284_v31, %v1284_v31 }
 0x584   :  { %1474 = vst [vmem:[%s2298_s4 + $0x1c] sm:$0xf] %v1287_v27 }

</bundles_post_ra>
